<compile_context>
chip_gen: v5e
topology: v5e:2x2
jax: 0.10.0
libtpu: 0.0.40
codegen_flags: <defaults>
</compile_context>

<pallas_src>
import numpy as np
import jax
import jax.numpy as jnp
from jax import lax
from jax.experimental import pallas as pl
from jax.experimental.pallas import tpu as pltpu

DILATIONS = (6, 12, 18)


def _round_up(x, m):
    return (x + m - 1) // m * m


# ------------------------------- kernel --------------------------------------
def _build_kernel(HW, Ptop, Pbot, groups, pool_idx, ck, resident):
    """groups: static tuple of (mask_col | None, ((row_start, tap_idx), ...))."""
    pad_rows = Ptop + HW + Pbot

    def kernel(x_ref, wt_ref, bias_ref, mask_ref, o_ref, xpad_ref, acc_ref):
        k = pl.program_id(1)                      # Cin-chunk index (reduction)

        @pl.when(k == 0)
        def _init():
            # Zero only the top/bottom border strips of the flat padded
            # scratch; the interior is overwritten every chunk and the border
            # stays zero for every Cin chunk of every image.
            if Ptop > 0:
                xpad_ref[0:Ptop, :] = jnp.zeros((Ptop, ck), xpad_ref.dtype)
            if Pbot > 0:
                xpad_ref[Ptop + HW:pad_rows, :] = jnp.zeros((Pbot, ck),
                                                            xpad_ref.dtype)
            # Accumulator starts from the fused bias of all five branches.
            acc_ref[...] = jnp.broadcast_to(bias_ref[...], acc_ref.shape)

        # Land the current Cin chunk in the interior of the flat scratch.
        xpad_ref[Ptop:Ptop + HW, :] = x_ref[0]

        if resident:
            koff = pl.multiple_of(k * ck, ck)

            def w(t):
                return wt_ref[t, pl.ds(koff, ck), :]
        else:
            def w(t):
                return wt_ref[t]

        # Conv taps (final 1x1 folded in), grouped by horizontal shift dx so
        # the row-wrap mask is applied once per distinct dx.  Each tap reads a
        # contiguous (HW, ck) slice of the scratch at a static offset.
        for mask_col, taps in groups:
            part = None
            for start, t in taps:
                p = jnp.dot(xpad_ref[start:start + HW, :], w(t),
                            preferred_element_type=jnp.float32)
                part = p if part is None else part + p
            if mask_col is not None:
                part = part * mask_ref[:, mask_col:mask_col + 1]
            acc_ref[...] += part

        # Global-average-pool branch (1/(H*W) and the final 1x1 are folded
        # into its weight): per-chunk pixel sum -> tiny matmul -> broadcast add.
        pooled = jnp.sum(xpad_ref[Ptop:Ptop + HW, :].astype(jnp.float32),
                         axis=0, keepdims=True)
        acc_ref[...] += jnp.dot(pooled.astype(xpad_ref.dtype), w(pool_idx),
                                preferred_element_type=jnp.float32)

        @pl.when(k == pl.num_programs(1) - 1)
        def _finish():
            # Flat lane-dense (HW, Cout) store; the spatial reshape happens in
            # the wrapper where it is free.
            o_ref[0] = acc_ref[...].astype(o_ref.dtype)

    return kernel


# --------------------------- wrapper-side precompute --------------------------
def _fold_weights(params, H, W):
    """Fold conv_5trans into every branch (f32), merge all centre taps into one,
    and drop taps that only ever read zero padding."""
    f32 = jnp.float32
    Cout = params['w_final'].shape[1]
    wf = params['w_final'].astype(f32)                          # (5*Cout, Cout)
    wf_pool, wf1, wf6, wf12, wf18 = (wf[i * Cout:(i + 1) * Cout]
                                     for i in range(5))

    w_pool_f = params['w_pool'].astype(f32) @ wf_pool           # (Cin, Cout)
    w1_f = params['w1'].astype(f32) @ wf1
    w6_f = jnp.einsum('yxio,oc->yxic', params['w6'].astype(f32), wf6)
    w12_f = jnp.einsum('yxio,oc->yxic', params['w12'].astype(f32), wf12)
    w18_f = jnp.einsum('yxio,oc->yxic', params['w18'].astype(f32), wf18)

    b_fused = (params['b_final'].astype(f32)
               + params['b_pool'].astype(f32) @ wf_pool
               + params['b1'].astype(f32) @ wf1
               + params['b6'].astype(f32) @ wf6
               + params['b12'].astype(f32) @ wf12
               + params['b18'].astype(f32) @ wf18)              # (1, Cout)

    taps = [w1_f + w6_f[1, 1] + w12_f[1, 1] + w18_f[1, 1]]      # merged centre
    offsets = [(0, 0)]
    for d, w_d in zip(DILATIONS, (w6_f, w12_f, w18_f)):
        for ky in range(3):
            for kx in range(3):
                if ky == 1 and kx == 1:
                    continue
                dy, dx = (ky - 1) * d, (kx - 1) * d
                if abs(dy) >= H or abs(dx) >= W:
                    continue              # tap only ever reads zero padding
                offsets.append((dy, dx))
                taps.append(w_d[ky, kx])
    return taps, w_pool_f, b_fused, offsets


# --------------------------------- forward -----------------------------------
def aspp_forward(x_nchw, params, *, compute_dtype=jnp.bfloat16, k_chunk=None):
    """x_nchw: (N, Cin, H, W) -> (N, Cout, H, W) in the input dtype."""
    N, Cin, H, W = x_nchw.shape
    Cout = params['w_final'].shape[1]
    out_dtype = x_nchw.dtype
    HW = H * W

    # ---- weight folding (f32 precompute) + static tap schedule ----
    taps_f, w_pool_f, b_fused, offsets = _fold_weights(params, H, W)
    T = len(taps_f)
    T1 = T + 1                                       # + folded pool weight

    # ---- flat padded-scratch geometry ----
    Pv = max(abs(dy) for dy, _ in offsets)
    Pd = max(abs(dx) for _, dx in offsets)
    Ptop = _round_up(Pv * W + Pd, 8)                 # aligned interior start
    Pbot = Pv * W + Pd
    pad_rows = Ptop + HW + Pbot

    # Group taps by horizontal shift dx (one wrap mask per distinct dx).
    group_map = {}
    for t, (dy, dx) in enumerate(offsets):
        group_map.setdefault(dx, []).append((Ptop + dy * W + dx, t))
    groups, mask_cols = [], []
    for dx in sorted(group_map, key=lambda v: (v != 0, v)):
        if dx == 0:
            groups.append((None, tuple(group_map[dx])))
        else:
            col = np.arange(W)
            valid = ((col + dx >= 0) & (col + dx < W)).astype(np.float32)
            mask_cols.append(np.tile(valid, H))      # (HW,)
            groups.append((len(mask_cols) - 1, tuple(group_map[dx])))
    Gm = max(len(mask_cols), 1)
    masks = jnp.asarray(np.stack(mask_cols, axis=1) if mask_cols
                        else np.ones((HW, 1), np.float32))      # (HW, Gm)

    # ---- per-generation chunk size / VMEM budget ----
    try:
        phys_vmem = int(pltpu.get_tpu_info().vmem_capacity_bytes)
    except Exception:
        phys_vmem = 64 * 2 ** 20
    cap = int(0.85 * phys_vmem)                      # leave compiler headroom
    target = 256 if phys_vmem <= 64 * 2 ** 20 else 512

    Cout_p = _round_up(Cout, 128)
    bc = np.dtype(compute_dtype).itemsize
    bo = np.dtype(out_dtype).itemsize

    def _geom(ck):
        cin_p = _round_up(Cin, ck)
        common = (2 * HW * ck * bc                   # double-buffered x blocks
                  + 2 * HW * Cout_p * bo             # double-buffered out blocks
                  + pad_rows * ck * bc               # flat padded scratch
                  + HW * Cout_p * 4                  # f32 accumulator
                  + HW * Gm * 4 + Cout_p * 4)        # masks + bias
        w_blocked = 2 * T1 * ck * Cout_p * bc
        w_full = 2 * T1 * cin_p * Cout_p * bc
        return cin_p, common, w_blocked, w_full

    ck = int(k_chunk) if k_chunk is not None else min(_round_up(Cin, 128), target)
    cin_p, common, w_blk, w_full = _geom(ck)
    if k_chunk is None:                              # shrink ck until it fits
        while common + w_blk > cap and ck > 128:
            ck = max(128, _round_up(ck // 2, 128))
            cin_p, common, w_blk, w_full = _geom(ck)
    nk = cin_p // ck
    assert ck % 128 == 0 or nk == 1, (Cin, ck)
    # Keep the folded weights fully VMEM-resident (fetched once) when they fit.
    resident = nk > 1 and (common + w_full) <= int(0.8 * cap)

    # ---- operand packing (flat NHWC, channels padded to the chunk grid) ----
    x_flat = jnp.transpose(x_nchw, (0, 2, 3, 1)).astype(compute_dtype)
    x_flat = x_flat.reshape(N, HW, Cin)
    if cin_p != Cin:
        x_flat = jnp.pad(x_flat, ((0, 0), (0, 0), (0, cin_p - Cin)))

    w_all_f = jnp.stack(list(taps_f) + [w_pool_f / float(HW)], axis=0)
    w_all = jnp.zeros((T1, cin_p, Cout_p), jnp.float32)
    w_all = w_all.at[:, :Cin, :Cout].set(w_all_f).astype(compute_dtype)
    bias = jnp.zeros((1, Cout_p), jnp.float32).at[:, :Cout].set(b_fused)

    if resident:
        w_spec = pl.BlockSpec((T1, cin_p, Cout_p), lambda n, k: (0, 0, 0))
    else:
        w_spec = pl.BlockSpec((T1, ck, Cout_p), lambda n, k: (0, k, 0))

    kernel = _build_kernel(HW, Ptop, Pbot, tuple(groups), T, ck, resident)

    out_flat = pl.pallas_call(
        kernel,
        out_shape=jax.ShapeDtypeStruct((N, HW, Cout_p), out_dtype),
        grid_spec=pltpu.PrefetchScalarGridSpec(
            num_scalar_prefetch=0,
            grid=(N, nk),                            # batch, Cin-chunks
            in_specs=[
                pl.BlockSpec((1, HW, ck), lambda n, k: (n, 0, k)),
                w_spec,
                pl.BlockSpec((1, Cout_p), lambda n, k: (0, 0)),
                pl.BlockSpec((HW, Gm), lambda n, k: (0, 0)),
            ],
            out_specs=pl.BlockSpec((1, HW, Cout_p), lambda n, k: (n, 0, 0)),
            scratch_shapes=[
                pltpu.VMEM((pad_rows, ck), compute_dtype),
                pltpu.VMEM((HW, Cout_p), jnp.float32),
            ],
        ),
        compiler_params=pltpu.CompilerParams(
            dimension_semantics=("parallel", "arbitrary"),
            vmem_limit_bytes=cap,
        ),
    )(x_flat, w_all, bias, masks)

    out = out_flat[:, :, :Cout].reshape(N, H, W, Cout)
    return jnp.transpose(out, (0, 3, 1, 2))


# ----------------------------- parameter init --------------------------------
def init_params(key, cin, cout):
    ks = jax.random.split(key, 12)
    s = 0.1
    return {
        'w_pool':  s * jax.random.normal(ks[0],  (cin, cout), jnp.float32),
        'b_pool':  s * jax.random.normal(ks[1],  (1, cout), jnp.float32),
        'w1':      s * jax.random.normal(ks[2],  (cin, cout), jnp.float32),
        'b1':      s * jax.random.normal(ks[3],  (1, cout), jnp.float32),
        'w6':      s * jax.random.normal(ks[4],  (3, 3, cin, cout), jnp.float32),
        'b6':      s * jax.random.normal(ks[5],  (1, cout), jnp.float32),
        'w12':     s * jax.random.normal(ks[6],  (3, 3, cin, cout), jnp.float32),
        'b12':     s * jax.random.normal(ks[7],  (1, cout), jnp.float32),
        'w18':     s * jax.random.normal(ks[8],  (3, 3, cin, cout), jnp.float32),
        'b18':     s * jax.random.normal(ks[9],  (1, cout), jnp.float32),
        'w_final': s * jax.random.normal(ks[10], (5 * cout, cout), jnp.float32),
        'b_final': s * jax.random.normal(ks[11], (1, cout), jnp.float32),
    }


# ------------------------- pure-JAX reference (NCHW) --------------------------
def _conv_ref(x_nchw, w_hwio, b, dilation=1, padding=0):
    w_oihw = jnp.transpose(w_hwio, (3, 2, 0, 1))
    out = lax.conv_general_dilated(
        x_nchw, w_oihw, window_strides=(1, 1),
        padding=((padding, padding), (padding, padding)),
        rhs_dilation=(dilation, dilation),
        dimension_numbers=('NCHW', 'OIHW', 'NCHW'))
    return out + b.reshape(1, -1, 1, 1)


def aspp_reference(x, p):
    N, Cin, H, W = x.shape
    pooled = jnp.mean(x, axis=(2, 3), keepdims=True)
    img = _conv_ref(pooled, p['w_pool'][None, None], p['b_pool'])
    img = jnp.broadcast_to(img, (N, img.shape[1], H, W))  # bilinear of 1x1 == broadcast
    a1 = _conv_ref(x, p['w1'][None, None], p['b1'])
    a6 = _conv_ref(x, p['w6'], p['b6'], dilation=6, padding=6)
    a12 = _conv_ref(x, p['w12'], p['b12'], dilation=12, padding=12)
    a18 = _conv_ref(x, p['w18'], p['b18'], dilation=18, padding=18)
    cat = jnp.concatenate([img, a1, a6, a12, a18], axis=1)
    return _conv_ref(cat, p['w_final'][None, None], p['b_final'])


if __name__ == "__main__":
    key = jax.random.PRNGKey(0)
    kx, kp = jax.random.split(key)

    N, Cin, Cout, H, W = 2, 4, 4, 16, 16
    x = jax.random.normal(kx, (N, Cin, H, W), jnp.float32)
    params = init_params(kp, Cin, Cout)

    ref = aspp_reference(x, params)

    # f32 compute path
    out_f32 = jax.block_until_ready(
        aspp_forward(x, params, compute_dtype=jnp.float32))
    assert out_f32.shape == ref.shape == (N, Cout, H, W), (out_f32.shape, ref.shape)
    if not jnp.allclose(out_f32, ref, rtol=1e-2, atol=1e-2):
        max_err = float(jnp.max(jnp.abs(out_f32 - ref)))
        raise AssertionError(f"Pallas ASPP (f32) mismatch vs reference, max abs err={max_err}")

    # default (bf16 compute, f32 accumulation) path
    out_bf16 = jax.block_until_ready(aspp_forward(x, params))
    if not jnp.allclose(out_bf16, ref, rtol=5e-2, atol=5e-2):
        max_err = float(jnp.max(jnp.abs(out_bf16 - ref)))
        raise AssertionError(f"Pallas ASPP (bf16) mismatch vs reference, max abs err={max_err}")

    print("KERNEL_OK")
</pallas_src>

<mosaic_0001>
module attributes {stable_mosaic.version = 11 : i64} {
  func.func @kernel(%arg0: i32, %arg1: i32, %arg2: memref<1x256x128xf32, #tpu.memory_space<vmem>>, %arg3: memref<18x128x128xf32, #tpu.memory_space<vmem>>, %arg4: memref<1x128xf32, #tpu.memory_space<vmem>>, %arg5: memref<256x4xf32, #tpu.memory_space<vmem>>, %arg6: memref<1x256x128xf32, #tpu.memory_space<vmem>>, %arg7: memref<668x128xf32, #tpu.memory_space<vmem>>, %arg8: memref<256x128xf32, #tpu.memory_space<vmem>>) attributes {dimension_semantics = [#tpu.dimension_semantics<parallel>, #tpu.dimension_semantics<arbitrary>], iteration_bounds = array<i64: 2, 1>, scalar_prefetch = 0 : i64, scratch_operands = 2 : i64, tpu.core_type = #tpu.core_type<tc>, window_params = [{transform_indices = @transform_0, window_bounds = array<i64: 1, 256, 128>}, {transform_indices = @transform_1, window_bounds = array<i64: 18, 128, 128>}, {pipeline_mode = #tpu.pipeline_mode<synchronous>, transform_indices = @transform_2, window_bounds = array<i64: 1, 128>}, {pipeline_mode = #tpu.pipeline_mode<synchronous>, transform_indices = @transform_3, window_bounds = array<i64: 256, 4>}, {transform_indices = @transform_4, window_bounds = array<i64: 1, 256, 128>}]} {
    %c0_i32 = arith.constant 0 : i32
    %0 = arith.cmpi eq, %arg1, %c0_i32 : i32
    %1 = arith.extui %0 : i1 to i32
    %c0_i32_0 = arith.constant 0 : i32
    %2 = arith.cmpi ne, %1, %c0_i32_0 : i32
    scf.if %2 {
      %cst_115 = arith.constant 0.000000e+00 : f32
      %126 = vector.broadcast %cst_115 : f32 to vector<208x128xf32>
      %c0_116 = arith.constant 0 : index
      %c0_117 = arith.constant 0 : index
      %127 = vector.load %arg7[%c0_116, %c0_117] : memref<668x128xf32, #tpu.memory_space<vmem>>, vector<208x128xf32>
      tpu.vector_store %arg7[%c0_116, %c0_117], %126 {strides = array<i32>} : memref<668x128xf32, #tpu.memory_space<vmem>>, vector<208x128xf32>,
      %cst_118 = arith.constant 0.000000e+00 : f32
      %128 = vector.broadcast %cst_118 : f32 to vector<204x128xf32>
      %c464 = arith.constant 464 : index
      %c0_119 = arith.constant 0 : index
      %129 = vector.load %arg7[%c464, %c0_119] : memref<668x128xf32, #tpu.memory_space<vmem>>, vector<204x128xf32>
      tpu.vector_store %arg7[%c464, %c0_119], %128 {strides = array<i32>} : memref<668x128xf32, #tpu.memory_space<vmem>>, vector<204x128xf32>,
      %c0_120 = arith.constant 0 : index
      %c0_121 = arith.constant 0 : index
      %130 = vector.load %arg4[%c0_120, %c0_121] : memref<1x128xf32, #tpu.memory_space<vmem>>, vector<1x128xf32>
      %131 = vector.shape_cast %130 : vector<1x128xf32> to vector<1x128xf32>
      %132 = vector.broadcast %131 : vector<1x128xf32> to vector<256x128xf32>
      %c0_122 = arith.constant 0 : index
      %c0_123 = arith.constant 0 : index
      %133 = vector.load %arg8[%c0_122, %c0_123] : memref<256x128xf32, #tpu.memory_space<vmem>>, vector<256x128xf32>
      tpu.vector_store %arg8[%c0_122, %c0_123], %132 {strides = array<i32>} : memref<256x128xf32, #tpu.memory_space<vmem>>, vector<256x128xf32>,
    } else {
    }
    %c0 = arith.constant 0 : index
    %c0_1 = arith.constant 0 : index
    %c0_2 = arith.constant 0 : index
    %3 = vector.load %arg2[%c0, %c0_1, %c0_2] : memref<1x256x128xf32, #tpu.memory_space<vmem>>, vector<1x256x128xf32>
    %4 = vector.shape_cast %3 : vector<1x256x128xf32> to vector<256x128xf32>
    %c208 = arith.constant 208 : index
    %c0_3 = arith.constant 0 : index
    %5 = vector.load %arg7[%c208, %c0_3] : memref<668x128xf32, #tpu.memory_space<vmem>>, vector<256x128xf32>
    tpu.vector_store %arg7[%c208, %c0_3], %4 {strides = array<i32>} : memref<668x128xf32, #tpu.memory_space<vmem>>, vector<256x128xf32>,
    %c208_4 = arith.constant 208 : index
    %c0_5 = arith.constant 0 : index
    %6 = vector.load %arg7[%c208_4, %c0_5] : memref<668x128xf32, #tpu.memory_space<vmem>>, vector<256x128xf32>
    %c0_6 = arith.constant 0 : index
    %c0_7 = arith.constant 0 : index
    %c0_8 = arith.constant 0 : index
    %7 = vector.load %arg3[%c0_6, %c0_7, %c0_8] : memref<18x128x128xf32, #tpu.memory_space<vmem>>, vector<1x128x128xf32>
    %8 = vector.shape_cast %7 : vector<1x128x128xf32> to vector<128x128xf32>
    %cst = arith.constant dense<0.000000e+00> : vector<256x128xf32>
    %9 = tpu.matmul %6, %8, %cst {dimension_numbers = #tpu.dot_dimension_numbers<[1], [0], [0], [1], [0, 0, 1, 1], [], []>} : vector<256x128xf32>, vector<128x128xf32>, vector<256x128xf32> -> vector<256x128xf32>
    %c112 = arith.constant 112 : index
    %c0_9 = arith.constant 0 : index
    %10 = vector.load %arg7[%c112, %c0_9] : memref<668x128xf32, #tpu.memory_space<vmem>>, vector<256x128xf32>
    %c2 = arith.constant 2 : index
    %c0_10 = arith.constant 0 : index
    %c0_11 = arith.constant 0 : index
    %11 = vector.load %arg3[%c2, %c0_10, %c0_11] : memref<18x128x128xf32, #tpu.memory_space<vmem>>, vector<1x128x128xf32>
    %12 = vector.shape_cast %11 : vector<1x128x128xf32> to vector<128x128xf32>
    %cst_12 = arith.constant dense<0.000000e+00> : vector<256x128xf32>
    %13 = tpu.matmul %10, %12, %cst_12 {dimension_numbers = #tpu.dot_dimension_numbers<[1], [0], [0], [1], [0, 0, 1, 1], [], []>} : vector<256x128xf32>, vector<128x128xf32>, vector<256x128xf32> -> vector<256x128xf32>
    %14 = arith.addf %9, %13 : vector<256x128xf32>
    %c304 = arith.constant 304 : index
    %c0_13 = arith.constant 0 : index
    %15 = vector.load %arg7[%c304, %c0_13] : memref<668x128xf32, #tpu.memory_space<vmem>>, vector<256x128xf32>
    %c7 = arith.constant 7 : index
    %c0_14 = arith.constant 0 : index
    %c0_15 = arith.constant 0 : index
    %16 = vector.load %arg3[%c7, %c0_14, %c0_15] : memref<18x128x128xf32, #tpu.memory_space<vmem>>, vector<1x128x128xf32>
    %17 = vector.shape_cast %16 : vector<1x128x128xf32> to vector<128x128xf32>
    %cst_16 = arith.constant dense<0.000000e+00> : vector<256x128xf32>
    %18 = tpu.matmul %15, %17, %cst_16 {dimension_numbers = #tpu.dot_dimension_numbers<[1], [0], [0], [1], [0, 0, 1, 1], [], []>} : vector<256x128xf32>, vector<128x128xf32>, vector<256x128xf32> -> vector<256x128xf32>
    %19 = arith.addf %14, %18 : vector<256x128xf32>
    %c16 = arith.constant 16 : index
    %c0_17 = arith.constant 0 : index
    %20 = vector.load %arg7[%c16, %c0_17] : memref<668x128xf32, #tpu.memory_space<vmem>>, vector<256x128xf32>
    %c10 = arith.constant 10 : index
    %c0_18 = arith.constant 0 : index
    %c0_19 = arith.constant 0 : index
    %21 = vector.load %arg3[%c10, %c0_18, %c0_19] : memref<18x128x128xf32, #tpu.memory_space<vmem>>, vector<1x128x128xf32>
    %22 = vector.shape_cast %21 : vector<1x128x128xf32> to vector<128x128xf32>
    %cst_20 = arith.constant dense<0.000000e+00> : vector<256x128xf32>
    %23 = tpu.matmul %20, %22, %cst_20 {dimension_numbers = #tpu.dot_dimension_numbers<[1], [0], [0], [1], [0, 0, 1, 1], [], []>} : vector<256x128xf32>, vector<128x128xf32>, vector<256x128xf32> -> vector<256x128xf32>
    %24 = arith.addf %19, %23 : vector<256x128xf32>
    %c400 = arith.constant 400 : index
    %c0_21 = arith.constant 0 : index
    %25 = vector.load %arg7[%c400, %c0_21] : memref<668x128xf32, #tpu.memory_space<vmem>>, vector<256x128xf32>
    %c15 = arith.constant 15 : index
    %c0_22 = arith.constant 0 : index
    %c0_23 = arith.constant 0 : index
    %26 = vector.load %arg3[%c15, %c0_22, %c0_23] : memref<18x128x128xf32, #tpu.memory_space<vmem>>, vector<1x128x128xf32>
    %27 = vector.shape_cast %26 : vector<1x128x128xf32> to vector<128x128xf32>
    %cst_24 = arith.constant dense<0.000000e+00> : vector<256x128xf32>
    %28 = tpu.matmul %25, %27, %cst_24 {dimension_numbers = #tpu.dot_dimension_numbers<[1], [0], [0], [1], [0, 0, 1, 1], [], []>} : vector<256x128xf32>, vector<128x128xf32>, vector<256x128xf32> -> vector<256x128xf32>
    %29 = arith.addf %24, %28 : vector<256x128xf32>
    %c0_25 = arith.constant 0 : index
    %c0_26 = arith.constant 0 : index
    %30 = vector.load %arg8[%c0_25, %c0_26] : memref<256x128xf32, #tpu.memory_space<vmem>>, vector<256x128xf32>
    %31 = arith.addf %30, %29 : vector<256x128xf32>
    %c0_27 = arith.constant 0 : index
    %c0_28 = arith.constant 0 : index
    %32 = vector.load %arg8[%c0_27, %c0_28] : memref<256x128xf32, #tpu.memory_space<vmem>>, vector<256x128xf32>
    tpu.vector_store %arg8[%c0_27, %c0_28], %31 {strides = array<i32>} : memref<256x128xf32, #tpu.memory_space<vmem>>, vector<256x128xf32>,
    %c4 = arith.constant 4 : index
    %c0_29 = arith.constant 0 : index
    %33 = vector.load %arg7[%c4, %c0_29] : memref<668x128xf32, #tpu.memory_space<vmem>>, vector<256x128xf32>
    %c9 = arith.constant 9 : index
    %c0_30 = arith.constant 0 : index
    %c0_31 = arith.constant 0 : index
    %34 = vector.load %arg3[%c9, %c0_30, %c0_31] : memref<18x128x128xf32, #tpu.memory_space<vmem>>, vector<1x128x128xf32>
    %35 = vector.shape_cast %34 : vector<1x128x128xf32> to vector<128x128xf32>
    %cst_32 = arith.constant dense<0.000000e+00> : vector<256x128xf32>
    %36 = tpu.matmul %33, %35, %cst_32 {dimension_numbers = #tpu.dot_dimension_numbers<[1], [0], [0], [1], [0, 0, 1, 1], [], []>} : vector<256x128xf32>, vector<128x128xf32>, vector<256x128xf32> -> vector<256x128xf32>
    %c196 = arith.constant 196 : index
    %c0_33 = arith.constant 0 : index
    %37 = vector.load %arg7[%c196, %c0_33] : memref<668x128xf32, #tpu.memory_space<vmem>>, vector<256x128xf32>
    %c12 = arith.constant 12 : index
    %c0_34 = arith.constant 0 : index
    %c0_35 = arith.constant 0 : index
    %38 = vector.load %arg3[%c12, %c0_34, %c0_35] : memref<18x128x128xf32, #tpu.memory_space<vmem>>, vector<1x128x128xf32>
    %39 = vector.shape_cast %38 : vector<1x128x128xf32> to vector<128x128xf32>
    %cst_36 = arith.constant dense<0.000000e+00> : vector<256x128xf32>
    %40 = tpu.matmul %37, %39, %cst_36 {dimension_numbers = #tpu.dot_dimension_numbers<[1], [0], [0], [1], [0, 0, 1, 1], [], []>} : vector<256x128xf32>, vector<128x128xf32>, vector<256x128xf32> -> vector<256x128xf32>
    %41 = arith.addf %36, %40 : vector<256x128xf32>
    %c388 = arith.constant 388 : index
    %c0_37 = arith.constant 0 : index
    %42 = vector.load %arg7[%c388, %c0_37] : memref<668x128xf32, #tpu.memory_space<vmem>>, vector<256x128xf32>
    %c14 = arith.constant 14 : index
    %c0_38 = arith.constant 0 : index
    %c0_39 = arith.constant 0 : index
    %43 = vector.load %arg3[%c14, %c0_38, %c0_39] : memref<18x128x128xf32, #tpu.memory_space<vmem>>, vector<1x128x128xf32>
    %44 = vector.shape_cast %43 : vector<1x128x128xf32> to vector<128x128xf32>
    %cst_40 = arith.constant dense<0.000000e+00> : vector<256x128xf32>
    %45 = tpu.matmul %42, %44, %cst_40 {dimension_numbers = #tpu.dot_dimension_numbers<[1], [0], [0], [1], [0, 0, 1, 1], [], []>} : vector<256x128xf32>, vector<128x128xf32>, vector<256x128xf32> -> vector<256x128xf32>
    %46 = arith.addf %41, %45 : vector<256x128xf32>
    %c0_41 = arith.constant 0 : index
    %c0_42 = arith.constant 0 : index
    %47 = vector.load %arg5[%c0_41, %c0_42] : memref<256x4xf32, #tpu.memory_space<vmem>>, vector<256x1xf32>
    %48 = vector.broadcast %47 : vector<256x1xf32> to vector<256x128xf32>
    %49 = arith.mulf %46, %48 : vector<256x128xf32>
    %c0_43 = arith.constant 0 : index
    %c0_44 = arith.constant 0 : index
    %50 = vector.load %arg8[%c0_43, %c0_44] : memref<256x128xf32, #tpu.memory_space<vmem>>, vector<256x128xf32>
    %51 = arith.addf %50, %49 : vector<256x128xf32>
    %c0_45 = arith.constant 0 : index
    %c0_46 = arith.constant 0 : index
    %52 = vector.load %arg8[%c0_45, %c0_46] : memref<256x128xf32, #tpu.memory_space<vmem>>, vector<256x128xf32>
    tpu.vector_store %arg8[%c0_45, %c0_46], %51 {strides = array<i32>} : memref<256x128xf32, #tpu.memory_space<vmem>>, vector<256x128xf32>,
    %c106 = arith.constant 106 : index
    %c0_47 = arith.constant 0 : index
    %53 = vector.load %arg7[%c106, %c0_47] : memref<668x128xf32, #tpu.memory_space<vmem>>, vector<256x128xf32>
    %c1 = arith.constant 1 : index
    %c0_48 = arith.constant 0 : index
    %c0_49 = arith.constant 0 : index
    %54 = vector.load %arg3[%c1, %c0_48, %c0_49] : memref<18x128x128xf32, #tpu.memory_space<vmem>>, vector<1x128x128xf32>
    %55 = vector.shape_cast %54 : vector<1x128x128xf32> to vector<128x128xf32>
    %cst_50 = arith.constant dense<0.000000e+00> : vector<256x128xf32>
    %56 = tpu.matmul %53, %55, %cst_50 {dimension_numbers = #tpu.dot_dimension_numbers<[1], [0], [0], [1], [0, 0, 1, 1], [], []>} : vector<256x128xf32>, vector<128x128xf32>, vector<256x128xf32> -> vector<256x128xf32>
    %c202 = arith.constant 202 : index
    %c0_51 = arith.constant 0 : index
    %57 = vector.load %arg7[%c202, %c0_51] : memref<668x128xf32, #tpu.memory_space<vmem>>, vector<256x128xf32>
    %c4_52 = arith.constant 4 : index
    %c0_53 = arith.constant 0 : index
    %c0_54 = arith.constant 0 : index
    %58 = vector.load %arg3[%c4_52, %c0_53, %c0_54] : memref<18x128x128xf32, #tpu.memory_space<vmem>>, vector<1x128x128xf32>
    %59 = vector.shape_cast %58 : vector<1x128x128xf32> to vector<128x128xf32>
    %cst_55 = arith.constant dense<0.000000e+00> : vector<256x128xf32>
    %60 = tpu.matmul %57, %59, %cst_55 {dimension_numbers = #tpu.dot_dimension_numbers<[1], [0], [0], [1], [0, 0, 1, 1], [], []>} : vector<256x128xf32>, vector<128x128xf32>, vector<256x128xf32> -> vector<256x128xf32>
    %61 = arith.addf %56, %60 : vector<256x128xf32>
    %c298 = arith.constant 298 : index
    %c0_56 = arith.constant 0 : index
    %62 = vector.load %arg7[%c298, %c0_56] : memref<668x128xf32, #tpu.memory_space<vmem>>, vector<256x128xf32>
    %c6 = arith.constant 6 : index
    %c0_57 = arith.constant 0 : index
    %c0_58 = arith.constant 0 : index
    %63 = vector.load %arg3[%c6, %c0_57, %c0_58] : memref<18x128x128xf32, #tpu.memory_space<vmem>>, vector<1x128x128xf32>
    %64 = vector.shape_cast %63 : vector<1x128x128xf32> to vector<128x128xf32>
    %cst_59 = arith.constant dense<0.000000e+00> : vector<256x128xf32>
    %65 = tpu.matmul %62, %64, %cst_59 {dimension_numbers = #tpu.dot_dimension_numbers<[1], [0], [0], [1], [0, 0, 1, 1], [], []>} : vector<256x128xf32>, vector<128x128xf32>, vector<256x128xf32> -> vector<256x128xf32>
    %66 = arith.addf %61, %65 : vector<256x128xf32>
    %c0_60 = arith.constant 0 : index
    %c1_61 = arith.constant 1 : index
    %67 = vector.load %arg5[%c0_60, %c1_61] : memref<256x4xf32, #tpu.memory_space<vmem>>, vector<256x1xf32>
    %68 = vector.broadcast %67 : vector<256x1xf32> to vector<256x128xf32>
    %69 = arith.mulf %66, %68 : vector<256x128xf32>
    %c0_62 = arith.constant 0 : index
    %c0_63 = arith.constant 0 : index
    %70 = vector.load %arg8[%c0_62, %c0_63] : memref<256x128xf32, #tpu.memory_space<vmem>>, vector<256x128xf32>
    %71 = arith.addf %70, %69 : vector<256x128xf32>
    %c0_64 = arith.constant 0 : index
    %c0_65 = arith.constant 0 : index
    %72 = vector.load %arg8[%c0_64, %c0_65] : memref<256x128xf32, #tpu.memory_space<vmem>>, vector<256x128xf32>
    tpu.vector_store %arg8[%c0_64, %c0_65], %71 {strides = array<i32>} : memref<256x128xf32, #tpu.memory_space<vmem>>, vector<256x128xf32>,
    %c118 = arith.constant 118 : index
    %c0_66 = arith.constant 0 : index
    %73 = vector.load %arg7[%c118, %c0_66] : memref<668x128xf32, #tpu.memory_space<vmem>>, vector<256x128xf32>
    %c3 = arith.constant 3 : index
    %c0_67 = arith.constant 0 : index
    %c0_68 = arith.constant 0 : index
    %74 = vector.load %arg3[%c3, %c0_67, %c0_68] : memref<18x128x128xf32, #tpu.memory_space<vmem>>, vector<1x128x128xf32>
    %75 = vector.shape_cast %74 : vector<1x128x128xf32> to vector<128x128xf32>
    %cst_69 = arith.constant dense<0.000000e+00> : vector<256x128xf32>
    %76 = tpu.matmul %73, %75, %cst_69 {dimension_numbers = #tpu.dot_dimension_numbers<[1], [0], [0], [1], [0, 0, 1, 1], [], []>} : vector<256x128xf32>, vector<128x128xf32>, vector<256x128xf32> -> vector<256x128xf32>
    %c214 = arith.constant 214 : index
    %c0_70 = arith.constant 0 : index
    %77 = vector.load %arg7[%c214, %c0_70] : memref<668x128xf32, #tpu.memory_space<vmem>>, vector<256x128xf32>
    %c5 = arith.constant 5 : index
    %c0_71 = arith.constant 0 : index
    %c0_72 = arith.constant 0 : index
    %78 = vector.load %arg3[%c5, %c0_71, %c0_72] : memref<18x128x128xf32, #tpu.memory_space<vmem>>, vector<1x128x128xf32>
    %79 = vector.shape_cast %78 : vector<1x128x128xf32> to vector<128x128xf32>
    %cst_73 = arith.constant dense<0.000000e+00> : vector<256x128xf32>
    %80 = tpu.matmul %77, %79, %cst_73 {dimension_numbers = #tpu.dot_dimension_numbers<[1], [0], [0], [1], [0, 0, 1, 1], [], []>} : vector<256x128xf32>, vector<128x128xf32>, vector<256x128xf32> -> vector<256x128xf32>
    %81 = arith.addf %76, %80 : vector<256x128xf32>
    %c310 = arith.constant 310 : index
    %c0_74 = arith.constant 0 : index
    %82 = vector.load %arg7[%c310, %c0_74] : memref<668x128xf32, #tpu.memory_space<vmem>>, vector<256x128xf32>
    %c8 = arith.constant 8 : index
    %c0_75 = arith.constant 0 : index
    %c0_76 = arith.constant 0 : index
    %83 = vector.load %arg3[%c8, %c0_75, %c0_76] : memref<18x128x128xf32, #tpu.memory_space<vmem>>, vector<1x128x128xf32>
    %84 = vector.shape_cast %83 : vector<1x128x128xf32> to vector<128x128xf32>
    %cst_77 = arith.constant dense<0.000000e+00> : vector<256x128xf32>
    %85 = tpu.matmul %82, %84, %cst_77 {dimension_numbers = #tpu.dot_dimension_numbers<[1], [0], [0], [1], [0, 0, 1, 1], [], []>} : vector<256x128xf32>, vector<128x128xf32>, vector<256x128xf32> -> vector<256x128xf32>
    %86 = arith.addf %81, %85 : vector<256x128xf32>
    %c0_78 = arith.constant 0 : index
    %c2_79 = arith.constant 2 : index
    %87 = vector.load %arg5[%c0_78, %c2_79] : memref<256x4xf32, #tpu.memory_space<vmem>>, vector<256x1xf32>
    %88 = vector.broadcast %87 : vector<256x1xf32> to vector<256x128xf32>
    %89 = arith.mulf %86, %88 : vector<256x128xf32>
    %c0_80 = arith.constant 0 : index
    %c0_81 = arith.constant 0 : index
    %90 = vector.load %arg8[%c0_80, %c0_81] : memref<256x128xf32, #tpu.memory_space<vmem>>, vector<256x128xf32>
    %91 = arith.addf %90, %89 : vector<256x128xf32>
    %c0_82 = arith.constant 0 : index
    %c0_83 = arith.constant 0 : index
    %92 = vector.load %arg8[%c0_82, %c0_83] : memref<256x128xf32, #tpu.memory_space<vmem>>, vector<256x128xf32>
    tpu.vector_store %arg8[%c0_82, %c0_83], %91 {strides = array<i32>} : memref<256x128xf32, #tpu.memory_space<vmem>>, vector<256x128xf32>,
    %c28 = arith.constant 28 : index
    %c0_84 = arith.constant 0 : index
    %93 = vector.load %arg7[%c28, %c0_84] : memref<668x128xf32, #tpu.memory_space<vmem>>, vector<256x128xf32>
    %c11 = arith.constant 11 : index
    %c0_85 = arith.constant 0 : index
    %c0_86 = arith.constant 0 : index
    %94 = vector.load %arg3[%c11, %c0_85, %c0_86] : memref<18x128x128xf32, #tpu.memory_space<vmem>>, vector<1x128x128xf32>
    %95 = vector.shape_cast %94 : vector<1x128x128xf32> to vector<128x128xf32>
    %cst_87 = arith.constant dense<0.000000e+00> : vector<256x128xf32>
    %96 = tpu.matmul %93, %95, %cst_87 {dimension_numbers = #tpu.dot_dimension_numbers<[1], [0], [0], [1], [0, 0, 1, 1], [], []>} : vector<256x128xf32>, vector<128x128xf32>, vector<256x128xf32> -> vector<256x128xf32>
    %c220 = arith.constant 220 : index
    %c0_88 = arith.constant 0 : index
    %97 = vector.load %arg7[%c220, %c0_88] : memref<668x128xf32, #tpu.memory_space<vmem>>, vector<256x128xf32>
    %c13 = arith.constant 13 : index
    %c0_89 = arith.constant 0 : index
    %c0_90 = arith.constant 0 : index
    %98 = vector.load %arg3[%c13, %c0_89, %c0_90] : memref<18x128x128xf32, #tpu.memory_space<vmem>>, vector<1x128x128xf32>
    %99 = vector.shape_cast %98 : vector<1x128x128xf32> to vector<128x128xf32>
    %cst_91 = arith.constant dense<0.000000e+00> : vector<256x128xf32>
    %100 = tpu.matmul %97, %99, %cst_91 {dimension_numbers = #tpu.dot_dimension_numbers<[1], [0], [0], [1], [0, 0, 1, 1], [], []>} : vector<256x128xf32>, vector<128x128xf32>, vector<256x128xf32> -> vector<256x128xf32>
    %101 = arith.addf %96, %100 : vector<256x128xf32>
    %c412 = arith.constant 412 : index
    %c0_92 = arith.constant 0 : index
    %102 = vector.load %arg7[%c412, %c0_92] : memref<668x128xf32, #tpu.memory_space<vmem>>, vector<256x128xf32>
    %c16_93 = arith.constant 16 : index
    %c0_94 = arith.constant 0 : index
    %c0_95 = arith.constant 0 : index
    %103 = vector.load %arg3[%c16_93, %c0_94, %c0_95] : memref<18x128x128xf32, #tpu.memory_space<vmem>>, vector<1x128x128xf32>
    %104 = vector.shape_cast %103 : vector<1x128x128xf32> to vector<128x128xf32>
    %cst_96 = arith.constant dense<0.000000e+00> : vector<256x128xf32>
    %105 = tpu.matmul %102, %104, %cst_96 {dimension_numbers = #tpu.dot_dimension_numbers<[1], [0], [0], [1], [0, 0, 1, 1], [], []>} : vector<256x128xf32>, vector<128x128xf32>, vector<256x128xf32> -> vector<256x128xf32>
    %106 = arith.addf %101, %105 : vector<256x128xf32>
    %c0_97 = arith.constant 0 : index
    %c3_98 = arith.constant 3 : index
    %107 = vector.load %arg5[%c0_97, %c3_98] : memref<256x4xf32, #tpu.memory_space<vmem>>, vector<256x1xf32>
    %108 = vector.broadcast %107 : vector<256x1xf32> to vector<256x128xf32>
    %109 = arith.mulf %106, %108 : vector<256x128xf32>
    %c0_99 = arith.constant 0 : index
    %c0_100 = arith.constant 0 : index
    %110 = vector.load %arg8[%c0_99, %c0_100] : memref<256x128xf32, #tpu.memory_space<vmem>>, vector<256x128xf32>
    %111 = arith.addf %110, %109 : vector<256x128xf32>
    %c0_101 = arith.constant 0 : index
    %c0_102 = arith.constant 0 : index
    %112 = vector.load %arg8[%c0_101, %c0_102] : memref<256x128xf32, #tpu.memory_space<vmem>>, vector<256x128xf32>
    tpu.vector_store %arg8[%c0_101, %c0_102], %111 {strides = array<i32>} : memref<256x128xf32, #tpu.memory_space<vmem>>, vector<256x128xf32>,
    %c208_103 = arith.constant 208 : index
    %c0_104 = arith.constant 0 : index
    %113 = vector.load %arg7[%c208_103, %c0_104] : memref<668x128xf32, #tpu.memory_space<vmem>>, vector<256x128xf32>
    %cst_105 = arith.constant dense<0.000000e+00> : vector<128xf32>
    %114 = vector.multi_reduction <add>, %113, %cst_105 [0] : vector<256x128xf32> to vector<128xf32>
    %115 = vector.shape_cast %114 : vector<128xf32> to vector<1x128xf32>
    %c0_106 = arith.constant 0 : index
    %c0_107 = arith.constant 0 : index
    %116 = vector.load %arg8[%c0_106, %c0_107] : memref<256x128xf32, #tpu.memory_space<vmem>>, vector<256x128xf32>
    %c17 = arith.constant 17 : index
    %c0_108 = arith.constant 0 : index
    %c0_109 = arith.constant 0 : index
    %117 = vector.load %arg3[%c17, %c0_108, %c0_109] : memref<18x128x128xf32, #tpu.memory_space<vmem>>, vector<1x128x128xf32>
    %118 = vector.shape_cast %117 : vector<1x128x128xf32> to vector<128x128xf32>
    %cst_110 = arith.constant dense<0.000000e+00> : vector<1x128xf32>
    %119 = tpu.matmul %115, %118, %cst_110 {dimension_numbers = #tpu.dot_dimension_numbers<[1], [0], [0], [1], [0, 0, 1, 1], [], []>} : vector<1x128xf32>, vector<128x128xf32>, vector<1x128xf32> -> vector<1x128xf32>
    %120 = vector.broadcast %119 : vector<1x128xf32> to vector<256x128xf32>
    %121 = arith.addf %116, %120 : vector<256x128xf32>
    %c0_111 = arith.constant 0 : index
    %c0_112 = arith.constant 0 : index
    %122 = vector.load %arg8[%c0_111, %c0_112] : memref<256x128xf32, #tpu.memory_space<vmem>>, vector<256x128xf32>
    tpu.vector_store %arg8[%c0_111, %c0_112], %121 {strides = array<i32>} : memref<256x128xf32, #tpu.memory_space<vmem>>, vector<256x128xf32>,
    %c0_i32_113 = arith.constant 0 : i32
    %123 = arith.cmpi eq, %arg1, %c0_i32_113 : i32
    %124 = arith.extui %123 : i1 to i32
    %c0_i32_114 = arith.constant 0 : i32
    %125 = arith.cmpi ne, %124, %c0_i32_114 : i32
    scf.if %125 {
      %c0_115 = arith.constant 0 : index
      %c0_116 = arith.constant 0 : index
      %126 = vector.load %arg8[%c0_115, %c0_116] : memref<256x128xf32, #tpu.memory_space<vmem>>, vector<256x128xf32>
      %c0_117 = arith.constant 0 : index
      %c0_118 = arith.constant 0 : index
      %c0_119 = arith.constant 0 : index
      %127 = vector.load %arg6[%c0_117, %c0_118, %c0_119] : memref<1x256x128xf32, #tpu.memory_space<vmem>>, vector<1x256x128xf32>
      %128 = vector.shape_cast %127 : vector<1x256x128xf32> to vector<256x128xf32>
      %129 = vector.shape_cast %126 : vector<256x128xf32> to vector<1x256x128xf32>
      tpu.vector_store %arg6[%c0_117, %c0_118, %c0_119], %129 {strides = array<i32>} : memref<1x256x128xf32, #tpu.memory_space<vmem>>, vector<1x256x128xf32>,
    } else {
    }
    return
  }
  func.func @transform_0(%arg0: i32, %arg1: i32) -> (i32, i32, i32) {
    %c0_i32 = arith.constant 0 : i32
    %c0_i32_0 = arith.constant 0 : i32
    return %arg0, %c0_i32, %arg1 : i32, i32, i32
  }
  func.func @transform_1(%arg0: i32, %arg1: i32) -> (i32, i32, i32) {
    %c0_i32 = arith.constant 0 : i32
    %c0_i32_0 = arith.constant 0 : i32
    %c0_i32_1 = arith.constant 0 : i32
    return %c0_i32, %arg1, %c0_i32_0 : i32, i32, i32
  }
  func.func @transform_2(%arg0: i32, %arg1: i32) -> (i32, i32) {
    %c0_i32 = arith.constant 0 : i32
    %c0_i32_0 = arith.constant 0 : i32
    %c0_i32_1 = arith.constant 0 : i32
    return %c0_i32, %c0_i32_0 : i32, i32
  }
  func.func @transform_3(%arg0: i32, %arg1: i32) -> (i32, i32) {
    %c0_i32 = arith.constant 0 : i32
    %c0_i32_0 = arith.constant 0 : i32
    %c0_i32_1 = arith.constant 0 : i32
    return %c0_i32, %c0_i32_0 : i32, i32
  }
  func.func @transform_4(%arg0: i32, %arg1: i32) -> (i32, i32, i32) {
    %c0_i32 = arith.constant 0 : i32
    %c0_i32_0 = arith.constant 0 : i32
    %c0_i32_1 = arith.constant 0 : i32
    return %arg0, %c0_i32, %c0_i32_0 : i32, i32, i32
  }
}

</mosaic_0001>

<bundles_post_ra>
// kernel: tpu_custom_call.1
= control target key start
LH: loop header
LB: loop body
LE: loop exit
PB: predicated region body
PF: predicated region fallthrough
CT: control target
= control target key end

     0   :  { %s7958_s0 = inlined_call_operand.hbm [shape: f32[2,256,128], index: 0, kind: input, shape index: {}]   ;;  %s7959_s1 = inlined_call_operand.hbm [shape: f32[18,128,128], index: 1, kind: input, shape index: {}]   ;;  %s7960_s2 = inlined_call_operand.hbm [shape: f32[1,128], index: 2, kind: input, shape index: {}]   ;;  %s7961_s3 = inlined_call_operand.vmem [shape: f32[256,4], index: 3, kind: input, shape index: {}]   ;;  %s7962_s4 = inlined_call_operand.hbm [shape: f32[2,256,128], index: 4, kind: output, shape index: {}]  }
   0x1   :  { %7970 = sst [smem:[#allocation78_spill]] %s7959_s1 }
   0x2   :  { %9 = vsyncpa [#allocation5], 0 }
   0x3   :  { %11 = vsyncpa [#allocation5 + $0x1], 0 }
   0x4   :  { %12 = vsyncpa [#allocation8], 0 }
   0x5   :  { %13 = vsyncpa [#allocation6], 0 }
   0x6   :  { %15 = vsyncpa [#allocation6 + $0x1], 0  ;;  %s5527_s15 = smov 0   ;;  %s5529_s16 = smov 0  }
   0x7   :  { %s5531_s17 = smov 0   ;;  %s5533_s18 = smov 0  }
   0x8   :  { %s5535_s19 = smov 0   ;;  %s5537_s20 = smov 0  }
   0x9 LB: > { %s5096_s21 = sadd.s32 4294967295, %s5489_s20   ;;  %s5097_s22 = sadd.s32 4294967294, %s5489_s20   ;;  %s5489_s20 = sphi %s5537_s20, %s21_s20   ;;  %s5485_s19 = sphi %s5535_s19, %s8214_s19   ;;  %s5481_s18 = sphi %s5533_s18, %s8213_s18   ;;  %s5477_s17 = sphi %s5531_s17, %s8212_s17   ;;  %s5473_s16 = sphi %s5529_s16, %s8211_s16   ;;  %s5469_s15 = sphi %s5527_s15, %s8210_s15  }
   0xa   : > { %p55_p0 = scmp.ne.s32.totalorder %s5473_s16, %s5469_s15  ;;  %p5561_p1 = scmp.eq.s32.totalorder %s5096_s21, 0 }
   0xb   : > { %p153_p2 = scmp.eq.s32.totalorder %s5097_s22, 1  ;;  %p5098_p4 = scmp.ge.s32.totalorder %s5489_s20, 1 }
   0xc   : > { %p5567_p3 = por %p5561_p1, %p55_p0  ;;  %p160_p6 = scmp.lt.s32.totalorder %s5489_s20, 3 }
   0xd   : > { %p5572_p5 = por %p153_p2, %p55_p0  ;;  %s7974_s1 = sld [smem:[#allocation78_spill]] }
   0xe   : > { %p5580_p7 = pnand %p5098_p4, %p160_p6  ;;  %s5491_s30 = smov [#allocation7]  }
   0xf   : > { %s176_s5 = sshll.u32 %s5491_s30, 4  ;;  %p5101_p10 = scmp.ge.s32.totalorder %s5489_s20, 2  ;;  %s177_s5 = int_to_ptr.vmem [resolvable:$true] %s176_s5 }
  0x10   : > { %p5177_p8 = pneg %p5580_p7  ;;  %s189_s8 = sshll.u32 %s7960_s2, 4  ;;  %s190_s8 = int_to_ptr.hbm [resolvable:$true] %s189_s8 }
  0x11   : > { %s7963_s9 = smov 128   ;;  %s5493_s10 = smov 8  }
  0x12   : > { %p5178_p9 = pnand %p5177_p8, %p5561_p1  ;;  %s5494_s11 = smov [#allocation9]  }
  0x13   : > { %s174_s28 = sshll.u32 %s7974_s1, 4  ;;  %s191_s12 = sshll.u32 %s5494_s11, 4  ;;  %s175_s28 = int_to_ptr.hbm [resolvable:$true] %s174_s28  ;;  %s192_s12 = int_to_ptr.vmem [resolvable:$true] %s191_s12 }
  0x14   : > { %5180 = dma.hbm_to_vmem [thread:$0]  (!%p5178_p9), %s175_s28, 36864, %s177_s5, [#allocation8], %s7963_s9, %s7963_s9, %s5493_s10  }
  0x15   : > { %5183 = dma.hbm_to_vmem [thread:$0]  (!%p5178_p9), %s190_s8, 16, %s192_s12, [#allocation8]  }
  0x16   : > { %p147_p11 = scmp.eq.s32.totalorder %s5096_s21, 1  ;;  %s33_s13 = sadd.s32 1, %s5485_s19 }
  0x17   : > { %p35_p12 = scmp.ge.s32.totalorder %s33_s13, 2  ;;  %s42_s14 = sadd.s32 1, %s5477_s17 }
  0x18   : > { %p49_p13 = scmp.ne.s32.totalorder %s5477_s17, %s5473_s16  ;;  %p50_p0 = scmp.eq.s32.totalorder %s5489_s20, 0 }
  0x19   : > { %s8216_s13 = smov (%p35_p12, %s33_s13), 0  ;;  %p5194_p4 = scmp.lt.s32.totalorder %s5489_s20, 2 }
  0x1a   : > { %p5602_p2 = por %p147_p11, %p49_p13  ;;  %s37_s26 = ssub.s32 %s5485_s19, %s8216_s13 }
  0x1b   : > { %s205_s27 = sand.u32 1, %s5477_s17   ;;  %p40_p6 = scmp.eq.s32.totalorder %s37_s26, 0 }
  0x1c   : > { %p51_p8 = por %p50_p0, %p49_p13  ;;  %s5102_s28 = sshll.u32 %s205_s27, 8 }
  0x1d   : > { %s5115_s21 = sshll.u32 %s5485_s19, 8  ;;  %s209_s11 = scalar_lea.vmem [#allocation4], %s5102_s28 }
  0x1e   : > { %s5612_s30 = scalar_select %p40_p6, %s5477_s17, %s42_s14  }
  0x1f   : > { %s215_s7 = scalar_lea.hbm %s7958_s0, %s5115_s21  ;;  %s218_s12 = sshll.u32 %s209_s11, 4  ;;  %s219_s12 = int_to_ptr.vmem [resolvable:$true] %s218_s12 }
  0x20   : > { %s216_s8 = sshll.u32 %s215_s7, 4  ;;  %p5185_p9 = pnand %p5194_p4, %p51_p8  ;;  %s217_s8 = int_to_ptr.hbm [resolvable:$true] %s216_s8 }
  0x21   : > { %s206_s9 = scalar_lea.sflag [#allocation5], %s205_s27  ;;  %s7977_s1 = smov 128  }
  0x22   : > { %5187 = dma.hbm_to_vmem [thread:$0]  (!%p5185_p9), %s217_s8, 4096, %s219_s12, %s206_s9, %s7977_s1, %s7977_s1, %s5493_s10  }
  0x23   : > { %230 = sbr.rel (%p5580_p7) target bundleno = 1313 (0x521), region = 36 }
  0x28   : > { %s5625_s14 = sand.u32 1, %s5473_s16  }
  0x29   : > { %s5106_s26 = sshll.u32 %s5625_s14, 8  ;;  %s233_s28 = scalar_lea.sflag [#allocation5], %s5625_s14 }
  0x2a   : > { %s5631_s21 = scalar_lea.vmem [#allocation4], %s5106_s26 }
  0x2b   : > { %5456 = dma.done.wait (%p5567_p3), %s233_s28, 4096  }
  0x2c   : > { %5458 = vsyncadd (%p5567_p3), %s233_s28, 4294963200 }
  0x2d   : > { %5460 = dma.done.wait (%p5561_p1), [#allocation8], 36880  }
  0x2e   : > { %5462 = vsyncadd (%p5561_p1), [#allocation8], 4294930416  ;;  %v505_v0 = vld [vmem:[#allocation7 + $0x178] sm:$0xff]  ;;  %v504_v1 = vld [vmem:[#allocation7 + $0x170] sm:$0xff]  ;;  %v5495_v2 = vmov 0.0   ;;  %s7826_s12 = scalar_lea.vmem [#allocation10], %s5106_s26 }
  0x2f   : > { %5117 = vmatpush.msra.mxu1 %v505_v0  ;;  %5118 = vmatpush.msra.mxu2 %v505_v0  ;;  %300 = vst [vmem:[#allocation2 + $0xb8] sm:$0xff] %v5495_v2  ;;  %v503_v3 = vld [vmem:[#allocation7 + $0x168] sm:$0xff]  ;;  %v502_v4 = vld [vmem:[#allocation7 + $0x160] sm:$0xff]  ;;  %v501_v5 = vld [vmem:[#allocation7 + $0x158] sm:$0xff]  ;;  %s5116_s26 = sshll.u32 %s5481_s18, 8  ;;  %s4989_s1 = sshll.u32 %s7826_s12, 4  ;;  %s4990_s1 = int_to_ptr.vmem [resolvable:$true] %s4989_s1 }
  0x30   : > { %5119 = vmatpush.msra.mxu3 %v505_v0  ;;  %506 = vmatpush.msra.mxu0 %v505_v0  ;;  %277 = vst [vmem:[#allocation2] sm:$0xff] %v5495_v2  ;;  %v500_v6 = vld [vmem:[#allocation7 + $0x150] sm:$0xff]  ;;  %v499_v7 = vld [vmem:[#allocation7 + $0x148] sm:$0xff]  ;;  %v498_v8 = vld [vmem:[#allocation7 + $0x140] sm:$0xff]  ;;  %s4988_s18 = scalar_lea.hbm %s7962_s4, %s5116_s26  ;;  %s4977_s24 = scalar_lea.sflag [#allocation6], %s5625_s14 }
  0x31   : > { %5120 = vmatpush.msra.mxu1 %v504_v1  ;;  %5121 = vmatpush.msra.mxu2 %v504_v1  ;;  %278 = vst [vmem:[#allocation2 + $0x8] sm:$0xff] %v5495_v2  ;;  %v497_v9 = vld [vmem:[#allocation7 + $0x138] sm:$0xff]  ;;  %v496_v10 = vld [vmem:[#allocation7 + $0x130] sm:$0xff]  ;;  %v495_v11 = vld [vmem:[#allocation7 + $0x128] sm:$0xff]  ;;  %s4991_s23 = sshll.u32 %s4988_s18, 4  ;;  %s5423_s5 = scalar_lea.hbm %s7962_s4, 512  ;;  %s4992_s23 = int_to_ptr.hbm [resolvable:$true] %s4991_s23 }
  0x32   : > { %5122 = vmatpush.msra.mxu3 %v504_v1  ;;  %507 = vmatpush.msra.mxu0 %v504_v1  ;;  %279 = vst [vmem:[#allocation2 + $0x10] sm:$0xff] %v5495_v2  ;;  %v494_v12 = vld [vmem:[#allocation7 + $0x120] sm:$0xff]  ;;  %v493_v13 = vld [vmem:[#allocation7 + $0x118] sm:$0xff]  ;;  %v492_v14 = vld [vmem:[#allocation7 + $0x110] sm:$0xff]  ;;  %s5417_s29 = sshra.s32 %s4992_s23, 4  ;;  %s5418_s29 = int_to_ptr.hbm [resolvable:$true] %s5417_s29 }
  0x33   : > { %5123 = vmatpush.msra.mxu1 %v503_v3  ;;  %5124 = vmatpush.msra.mxu2 %v503_v3  ;;  %280 = vst [vmem:[#allocation2 + $0x18] sm:$0xff] %v5495_v2  ;;  %v491_v15 = vld [vmem:[#allocation7 + $0x108] sm:$0xff]  ;;  %v490_v16 = vld [vmem:[#allocation7 + $0x100] sm:$0xff]  ;;  %v5672_v17 = vld [vmem:[%s5631_s21 + $0x10] sm:$0xff]  ;;  %s5419_s9 = scalar_lea.hbm %s5418_s29, 256  ;;  %p5424_p11 = scmp.lt.s32.totalorder %s5418_s29, %s7962_s4 }
  0x34   : > { %5125 = vmatpush.msra.mxu3 %v503_v3  ;;  %508 = vmatpush.msra.mxu0 %v503_v3  ;;  %281 = vst [vmem:[#allocation2 + $0x20] sm:$0xff] %v5495_v2  ;;  %v5675_v18 = vld [vmem:[%s5631_s21 + $0x58] sm:$0xff]  ;;  %v5679_v21 = vld [vmem:[%s5631_s21] sm:$0xff]  ;;  %v5682_v22 = vld [vmem:[%s5631_s21 + $0x8] sm:$0xff]  ;;  %p5420_p1 = scmp.ne.s32.totalorder %s5418_s29, %s5419_s9  ;;  %p5425_p12 = scmp.lt.s32.totalorder %s5423_s5, %s5419_s9 }
  0x35   : > { %5126 = vmatpush.msra.mxu1 %v502_v4  ;;  %5127 = vmatpush.msra.mxu2 %v502_v4  ;;  %282 = vst [vmem:[#allocation2 + $0x28] sm:$0xff] %v5495_v2  ;;  %v780_v19 = vld [vmem:[#allocation7 + $0x3f8] sm:$0xff]  ;;  %v4738_v24 = vadd.f32 %v5682_v22, %v5679_v21  ;;  %v779_v25 = vld [vmem:[#allocation7 + $0x3f0] sm:$0xff]  ;;  %v778_v31 = vld [vmem:[#allocation7 + $0x3e8] sm:$0xff] }
  0x36   : > { %5128 = vmatpush.msra.mxu3 %v502_v4  ;;  %509 = vmatpush.msra.mxu0 %v502_v4  ;;  %283 = vst [vmem:[#allocation2 + $0x30] sm:$0xff] %v5495_v2  ;;  %v974_v20 = vld [vmem:[#allocation7 + $0x578] sm:$0xff]  ;;  %v973_v26 = vld [vmem:[#allocation7 + $0x570] sm:$0xff]  ;;  %v972_v32 = vld [vmem:[#allocation7 + $0x568] sm:$0xff]  ;;  %p5421_p3 = pnand %p5420_p1, %p5602_p2  ;;  %p5426_p13 = por %p5425_p12, %p5424_p11 }
  0x37   : > { %5129 = vmatpush.msra.mxu1 %v501_v5  ;;  %5130 = vmatpush.msra.mxu2 %v501_v5  ;;  %284 = vst [vmem:[#allocation2 + $0x38] sm:$0xff] %v5495_v2  ;;  %v476_v23 = vld [vmem:[#allocation7 + $0x78] sm:$0xff]  ;;  %v475_v27 = vld [vmem:[#allocation7 + $0x70] sm:$0xff]  ;;  %v4739_v28 = vadd.f32 %v4738_v24, %v5672_v17  ;;  %v474_v33 = vld [vmem:[#allocation7 + $0x68] sm:$0xff] }
  0x38   : > { %5131 = vmatpush.msra.mxu3 %v501_v5  ;;  %510 = vmatpush.msra.mxu0 %v501_v5  ;;  %285 = vst [vmem:[#allocation2 + $0x40] sm:$0xff] %v5495_v2  ;;  %v5695_v29 = vld [vmem:[%s5631_s21 + $0x18] sm:$0xff]  ;;  %v1167_v35 = vld [vmem:[#allocation7 + $0x7f0] sm:$0xff]  ;;  %v5705_v36 = vld [vmem:[%s5631_s21 + $0x60] sm:$0xff]  ;;  %p5422_p7 = pneg %p5421_p3 }
  0x39   : > { %5132 = vmatpush.msra.mxu1 %v500_v6  ;;  %5133 = vmatpush.msra.mxu2 %v500_v6  ;;  %286 = vst [vmem:[#allocation2 + $0x48] sm:$0xff] %v5495_v2  ;;  %v1168_v30 = vld [vmem:[#allocation7 + $0x7f8] sm:$0xff]  ;;  %v5699_v34 = vadd.f32 %v4739_v28, %v5695_v29  ;;  %v777_v37 = vld [vmem:[#allocation7 + $0x3e0] sm:$0xff]  ;;  %v1166_v40 = vld [vmem:[#allocation7 + $0x7e8] sm:$0xff] }
  0x3a   : > { %5134 = vmatpush.msra.mxu3 %v500_v6  ;;  %511 = vmatpush.msra.mxu0 %v500_v6  ;;  %287 = vst [vmem:[#allocation2 + $0x50] sm:$0xff] %v5495_v2  ;;  %v971_v38 = vld [vmem:[#allocation7 + $0x560] sm:$0xff]  ;;  %v776_v41 = vld [vmem:[#allocation7 + $0x3d8] sm:$0xff]  ;;  %v775_v45 = vld [vmem:[#allocation7 + $0x3d0] sm:$0xff]  ;;  %p5427_p0 = pnand %p5426_p13, %p5422_p7 }
  0x3b   : > { %5135 = vmatpush.msra.mxu1 %v499_v7  ;;  %5136 = vmatpush.msra.mxu2 %v499_v7  ;;  %288 = vst [vmem:[#allocation2 + $0x58] sm:$0xff] %v5495_v2  ;;  %v473_v39 = vld [vmem:[#allocation7 + $0x60] sm:$0xff]  ;;  %v970_v42 = vld [vmem:[#allocation7 + $0x558] sm:$0xff]  ;;  %v471_v46 = vld [vmem:[#allocation7 + $0x50] sm:$0xff] }
  0x3c   : > { %5137 = vmatpush.msra.mxu3 %v499_v7  ;;  %512 = vmatpush.msra.mxu0 %v499_v7  ;;  %289 = vst [vmem:[#allocation2 + $0x60] sm:$0xff] %v5495_v2  ;;  %v472_v43 = vld [vmem:[#allocation7 + $0x58] sm:$0xff]  ;;  %v1165_v44 = vld [vmem:[#allocation7 + $0x7e0] sm:$0xff]  ;;  %v969_v47 = vld [vmem:[#allocation7 + $0x550] sm:$0xff] }
  0x3d   : > { %5138 = vmatpush.msra.mxu1 %v498_v8  ;;  %5139 = vmatpush.msra.mxu2 %v498_v8  ;;  %290 = vst [vmem:[#allocation2 + $0x68] sm:$0xff] %v5495_v2  ;;  %v1164_v48 = vld [vmem:[#allocation7 + $0x7d8] sm:$0xff]  ;;  %v5720_v49 = vld [vmem:[%s5631_s21 + $0x20] sm:$0xff]  ;;  %v5723_v50 = vld [vmem:[%s5631_s21 + $0x68] sm:$0xff] }
  0x3e   : > { %5140 = vmatpush.msra.mxu3 %v498_v8  ;;  %513 = vmatpush.msra.mxu0 %v498_v8  ;;  %291 = vst [vmem:[#allocation2 + $0x70] sm:$0xff] %v5495_v2  ;;  %v470_v51 = vld [vmem:[#allocation7 + $0x48] sm:$0xff]  ;;  %v1163_v54 = vld [vmem:[#allocation7 + $0x7d0] sm:$0xff]  ;;  %v469_v55 = vld [vmem:[#allocation7 + $0x40] sm:$0xff] }
  0x3f   : > { %5141 = vmatpush.msra.mxu1 %v497_v9  ;;  %5142 = vmatpush.msra.mxu2 %v497_v9  ;;  %292 = vst [vmem:[#allocation2 + $0x78] sm:$0xff] %v5495_v2  ;;  %v774_v52 = vld [vmem:[#allocation7 + $0x3c8] sm:$0xff]  ;;  %v773_v56 = vld [vmem:[#allocation7 + $0x3c0] sm:$0xff]  ;;  %v468_v58 = vld [vmem:[#allocation7 + $0x38] sm:$0xff] }
  0x40   : > { %5143 = vmatpush.msra.mxu3 %v497_v9  ;;  %514 = vmatpush.msra.mxu0 %v497_v9  ;;  %293 = vst [vmem:[#allocation2 + $0x80] sm:$0xff] %v5495_v2  ;;  %v968_v53 = vld [vmem:[#allocation7 + $0x548] sm:$0xff]  ;;  %v967_v57 = vld [vmem:[#allocation7 + $0x540] sm:$0xff]  ;;  %v772_v60 = vld [vmem:[#allocation7 + $0x3b8] sm:$0xff] }
  0x41   : > { %5144 = vmatpush.msra.mxu1 %v496_v10  ;;  %5145 = vmatpush.msra.mxu2 %v496_v10  ;;  %294 = vst [vmem:[#allocation2 + $0x88] sm:$0xff] %v5495_v2  ;;  %v1162_v59 = vld [vmem:[#allocation7 + $0x7c8] sm:$0xff]  ;;  %v966_v61 = vld [vmem:[#allocation7 + $0x538] sm:$0xff]  ;;  %v1161_v62 = vld [vmem:[#allocation7 + $0x7c0] sm:$0xff] }
  0x42   : > { %5146 = vmatpush.msra.mxu3 %v496_v10  ;;  %515 = vmatpush.msra.mxu0 %v496_v10  ;;  %295 = vst [vmem:[#allocation2 + $0x90] sm:$0xff] %v5495_v2  ;;  %v5738_v63 = vld [vmem:[%s5631_s21 + $0x28] sm:$0xff]  ;;  %v5741_v0 = vld [vmem:[%s5631_s21 + $0x70] sm:$0xff]  ;;  %v1160_v5 = vld [vmem:[#allocation7 + $0x7b8] sm:$0xff] }
  0x43   : > { %5147 = vmatpush.msra.mxu1 %v495_v11  ;;  %5148 = vmatpush.msra.mxu2 %v495_v11  ;;  %296 = vst [vmem:[#allocation2 + $0x98] sm:$0xff] %v5495_v2  ;;  %v467_v1 = vld [vmem:[#allocation7 + $0x30] sm:$0xff]  ;;  %v466_v6 = vld [vmem:[#allocation7 + $0x28] sm:$0xff]  ;;  %v465_v9 = vld [vmem:[#allocation7 + $0x20] sm:$0xff] }
  0x44   : > { %5149 = vmatpush.msra.mxu3 %v495_v11  ;;  %516 = vmatpush.msra.mxu0 %v495_v11  ;;  %297 = vst [vmem:[#allocation2 + $0xa0] sm:$0xff] %v5495_v2  ;;  %v771_v3 = vld [vmem:[#allocation7 + $0x3b0] sm:$0xff]  ;;  %v770_v7 = vld [vmem:[#allocation7 + $0x3a8] sm:$0xff]  ;;  %v769_v11 = vld [vmem:[#allocation7 + $0x3a0] sm:$0xff] }
  0x45   : > { %5150 = vmatpush.msra.mxu1 %v494_v12  ;;  %5151 = vmatpush.msra.mxu2 %v494_v12  ;;  %298 = vst [vmem:[#allocation2 + $0xa8] sm:$0xff] %v5495_v2  ;;  %v965_v4 = vld [vmem:[#allocation7 + $0x530] sm:$0xff]  ;;  %v964_v8 = vld [vmem:[#allocation7 + $0x528] sm:$0xff]  ;;  %v1157_v24 = vld [vmem:[#allocation7 + $0x7a0] sm:$0xff] }
  0x46   : > { %5152 = vmatpush.msra.mxu3 %v494_v12  ;;  %517 = vmatpush.msra.mxu0 %v494_v12  ;;  %299 = vst [vmem:[#allocation2 + $0xb0] sm:$0xff] %v5495_v2  ;;  %v1159_v10 = vld [vmem:[#allocation7 + $0x7b0] sm:$0xff]  ;;  %v963_v12 = vld [vmem:[#allocation7 + $0x520] sm:$0xff] }
  0x47   : > { %5153 = vmatpush.msra.mxu1 %v493_v13  ;;  %5154 = vmatpush.msra.mxu2 %v493_v13  ;;  %301 = vst [vmem:[#allocation2 + $0xc0] sm:$0xff] %v5495_v2  ;;  %v5775_v28 = vld [vmem:[%s5631_s21 + $0x40] sm:$0xff] }
  0x48   : > { %5155 = vmatpush.msra.mxu3 %v493_v13  ;;  %518 = vmatpush.msra.mxu0 %v493_v13  ;;  %302 = vst [vmem:[#allocation2 + $0xc8] sm:$0xff] %v5495_v2  ;;  %v1158_v13 = vld [vmem:[#allocation7 + $0x7a8] sm:$0xff] }
  0x49   : > { %5156 = vmatpush.msra.mxu1 %v492_v14  ;;  %5157 = vmatpush.msra.mxu2 %v492_v14  ;;  %303 = vst [vmem:[#allocation2 + $0x1d0] sm:$0xff] %v5495_v2 }
  0x4a   : > { %5158 = vmatpush.msra.mxu3 %v492_v14  ;;  %304 = vst [vmem:[#allocation2 + $0x1d8] sm:$0xff] %v5495_v2  ;;  %519 = vmatpush.msra.mxu0 %v492_v14  ;;  %v5756_v14 = vld [vmem:[%s5631_s21 + $0x30] sm:$0xff] }
  0x4b   : > { %5159 = vmatpush.msra.mxu1 %v491_v15  ;;  %5160 = vmatpush.msra.mxu2 %v491_v15  ;;  %305 = vst [vmem:[#allocation2 + $0x1e0] sm:$0xff] %v5495_v2 }
  0x4c   : > { %5161 = vmatpush.msra.mxu3 %v491_v15  ;;  %306 = vst [vmem:[#allocation2 + $0x1e8] sm:$0xff] %v5495_v2  ;;  %520 = vmatpush.msra.mxu0 %v491_v15  ;;  %v5759_v15 = vld [vmem:[%s5631_s21 + $0x78] sm:$0xff] }
  0x4d   : > { %5162 = vmatpush.msra.mxu1 %v490_v16  ;;  %5163 = vmatpush.msra.mxu2 %v490_v16  ;;  %307 = vst [vmem:[#allocation2 + $0x1f0] sm:$0xff] %v5495_v2 }
  0x4e   : > { %5164 = vmatpush.msra.mxu3 %v490_v16  ;;  %549 = vmatmul.f32.vlgmr.msra.gmra.mxu1 %v5495_v2  ;;  %308 = vst [vmem:[#allocation2 + $0x1f8] sm:$0xff] %v5495_v2 }
  0x4f   : > { %309 = vst [vmem:[#allocation2 + $0x200] sm:$0xff] %v5495_v2  ;;  %564 = vmatmul.f32.vlgmr.msra.gmra.mxu2 %v5672_v17  ;;  %591 = vmatmul.f32.vlgmr.msra.gmra.mxu3 %v5675_v18 }
  0x50   : > { %310 = vst [vmem:[#allocation2 + $0x208] sm:$0xff] %v5495_v2  ;;  %781 = vmatpush.msrb.mxu2 %v780_v19  ;;  %975 = vmatpush.msrb.mxu3 %v974_v20  ;;  %v768_v19 = vld [vmem:[#allocation7 + $0x398] sm:$0xff] }
  0x51   : > { %311 = vst [vmem:[#allocation2 + $0x210] sm:$0xff] %v5495_v2  ;;  %521 = vmatpush.msra.mxu0 %v490_v16  ;;  %619 = vmatpush.msrb.mxu1 %v476_v23  ;;  %v464_v16 = vld [vmem:[#allocation7 + $0x18] sm:$0xff] }
  0x52   : > { %312 = vst [vmem:[#allocation2 + $0x218] sm:$0xff] %v5495_v2  ;;  %782 = vmatpush.msrb.mxu2 %v779_v25  ;;  %976 = vmatpush.msrb.mxu3 %v973_v26  ;;  %v5765_v20 = vld [vmem:[%s5631_s21 + $0x38] sm:$0xff]  ;;  %v463_v25 = vld [vmem:[#allocation7 + $0x10] sm:$0xff]  ;;  %v5771_v26 = vld [vmem:[%s5631_s21 + $0x80] sm:$0xff] }
  0x53   : > { %7978 = vst [vmem:[#allocation14_spill] sm:$0xff] %v5699_v34  ;;  %522 = vmatmul.f32.vlgmr.msra.gmra.mxu0 %v5495_v2  ;;  %620 = vmatpush.msrb.mxu1 %v475_v27  ;;  %v962_v23 = vld [vmem:[#allocation7 + $0x518] sm:$0xff]  ;;  %v767_v27 = vld [vmem:[#allocation7 + $0x390] sm:$0xff] }
  0x54   : > { %313 = vst [vmem:[#allocation2 + $0x220] sm:$0xff] %v5495_v2  ;;  %1169 = vmatpush.msrb.mxu0 %v1168_v30  ;;  %783 = vmatpush.msrb.mxu2 %v778_v31  ;;  %v961_v30 = vld [vmem:[#allocation7 + $0x510] sm:$0xff]  ;;  %v462_v31 = vld [vmem:[#allocation7 + $0x8] sm:$0xff] }
  0x55   : > { %314 = vst [vmem:[#allocation2 + $0x228] sm:$0xff] %v5495_v2  ;;  %977 = vmatpush.msrb.mxu3 %v972_v32  ;;  %621 = vmatpush.msrb.mxu1 %v474_v33  ;;  %v5779_v32 = vld [vmem:[%s5631_s21 + $0x88] sm:$0xff]  ;;  %v1156_v33 = vld [vmem:[#allocation7 + $0x798] sm:$0xff] }
  0x56   : > { %315 = vst [vmem:[#allocation2 + $0x230] sm:$0xff] %v5495_v2  ;;  %552 = vmatmul.f32.gmra.mxu1 %v5495_v2  ;;  %1170 = vmatpush.msrb.mxu0 %v1167_v35  ;;  %v5783_v35 = vld [vmem:[%s5631_s21 + $0x48] sm:$0xff] }
  0x57   : > { %316 = vst [vmem:[#allocation2 + $0x238] sm:$0xff] %v5495_v2  ;;  %567 = vmatmul.f32.gmra.mxu2 %v5695_v29  ;;  %594 = vmatmul.f32.gmra.mxu3 %v5705_v36 }
  0x58   : > { %317 = vst [vmem:[#allocation2 + $0x240] sm:$0xff] %v5495_v2  ;;  %784 = vmatpush.msrb.mxu2 %v777_v37  ;;  %978 = vmatpush.msrb.mxu3 %v971_v38  ;;  %v766_v37 = vld [vmem:[#allocation7 + $0x388] sm:$0xff] }
  0x59   : > { %318 = vst [vmem:[#allocation2 + $0x248] sm:$0xff] %v5495_v2  ;;  %622 = vmatpush.msrb.mxu1 %v473_v39  ;;  %1171 = vmatpush.msrb.mxu0 %v1166_v40  ;;  %v960_v38 = vld [vmem:[#allocation7 + $0x508] sm:$0xff]  ;;  %v461_v39 = vld [vmem:[#allocation7] sm:$0xff]  ;;  %v5788_v40 = vld [vmem:[%s5631_s21 + $0x90] sm:$0xff] }
  0x5a   : > { %319 = vst [vmem:[#allocation2 + $0x250] sm:$0xff] %v5495_v2  ;;  %785 = vmatpush.msrb.mxu2 %v776_v41  ;;  %979 = vmatpush.msrb.mxu3 %v970_v42  ;;  %v1155_v41 = vld [vmem:[#allocation7 + $0x790] sm:$0xff] }
  0x5b   : > { %320 = vst [vmem:[#allocation2 + $0x258] sm:$0xff] %v5495_v2  ;;  %525 = vmatmul.f32.gmra.mxu0 %v5495_v2  ;;  %623 = vmatpush.msrb.mxu1 %v472_v43  ;;  %v5792_v42 = vld [vmem:[%s5631_s21 + $0x50] sm:$0xff]  ;;  %v5796_v43 = vld [vmem:[%s5631_s21 + $0x98] sm:$0xff] }
  0x5c   : > { %321 = vst [vmem:[#allocation2 + $0x260] sm:$0xff] %v5495_v2  ;;  %1172 = vmatpush.msrb.mxu0 %v1165_v44  ;;  %786 = vmatpush.msrb.mxu2 %v775_v45  ;;  %v765_v44 = vld [vmem:[#allocation7 + $0x380] sm:$0xff] }
  0x5d   : > { %322 = vst [vmem:[#allocation2 + $0x268] sm:$0xff] %v5495_v2  ;;  %624 = vmatpush.msrb.mxu1 %v471_v46  ;;  %980 = vmatpush.msrb.mxu3 %v969_v47  ;;  %v959_v45 = vld [vmem:[#allocation7 + $0x500] sm:$0xff]  ;;  %v1154_v46 = vld [vmem:[#allocation7 + $0x788] sm:$0xff]  ;;  %v1458_v47 = vld [vmem:[#allocation7 + $0x4f8] sm:$0xff] }
  0x5e   : > { %323 = vst [vmem:[#allocation2 + $0x270] sm:$0xff] %v5495_v2  ;;  %555 = vmatmul.f32.gmra.mxu1 %v5495_v2  ;;  %1173 = vmatpush.msrb.mxu0 %v1164_v48  ;;  %v1774_v48 = vld [vmem:[#allocation7 + $0x778] sm:$0xff] }
  0x5f   : > { %324 = vst [vmem:[#allocation2 + $0x278] sm:$0xff] %v5495_v2  ;;  %570 = vmatmul.f32.gmra.mxu2 %v5720_v49  ;;  %597 = vmatmul.f32.gmra.mxu3 %v5723_v50 }
  0x60   : > { %325 = vst [vmem:[#allocation2 + $0x280] sm:$0xff] %v5495_v2  ;;  %625 = vmatpush.msrb.mxu1 %v470_v51  ;;  %787 = vmatpush.msrb.mxu2 %v774_v52  ;;  %v1153_v51 = vld [vmem:[#allocation7 + $0x780] sm:$0xff]  ;;  %v1499_v52 = vld [vmem:[#allocation7 + $0x678] sm:$0xff] }
  0x61   : > { %326 = vst [vmem:[#allocation2 + $0x288] sm:$0xff] %v5495_v2  ;;  %981 = vmatpush.msrb.mxu3 %v968_v53  ;;  %1174 = vmatpush.msrb.mxu0 %v1163_v54  ;;  %v5803_v53 = vld [vmem:[%s5631_s21 + $0xc0] sm:$0xff]  ;;  %v5811_v54 = vld [vmem:[%s5631_s21 + $0xc8] sm:$0xff] }
  0x62   : > { %327 = vst [vmem:[#allocation2 + $0x290] sm:$0xff] %v5495_v2  ;;  %626 = vmatpush.msrb.mxu1 %v469_v55  ;;  %788 = vmatpush.msrb.mxu2 %v773_v56  ;;  %v1457_v55 = vld [vmem:[#allocation7 + $0x4f0] sm:$0xff] }
  0x63   : > { %328 = vst [vmem:[#allocation2 + $0x298] sm:$0xf] %v5495_v2  ;;  %528 = vmatmul.f32.gmra.mxu0 %v5495_v2  ;;  %982 = vmatpush.msrb.mxu3 %v967_v57  ;;  %v1773_v56 = vld [vmem:[#allocation7 + $0x770] sm:$0xff] }
  0x64   : > { %399 = vst [vmem:[#allocation2 + $0xe0] sm:$0xff] %v5672_v17  ;;  %627 = vmatpush.msrb.mxu1 %v468_v58  ;;  %1175 = vmatpush.msrb.mxu0 %v1162_v59  ;;  %v1498_v57 = vld [vmem:[#allocation7 + $0x670] sm:$0xff]  ;;  %v5827_v58 = vld [vmem:[%s5631_s21 + $0xd8] sm:$0xff]  ;;  %v1456_v59 = vld [vmem:[#allocation7 + $0x4e8] sm:$0xff] }
  0x65   : > { %408 = vst [vmem:[#allocation2 + $0x128] sm:$0xff] %v5675_v18  ;;  %789 = vmatpush.msrb.mxu2 %v772_v60  ;;  %983 = vmatpush.msrb.mxu3 %v966_v61  ;;  %v1772_v60 = vld [vmem:[#allocation7 + $0x768] sm:$0xff] }
  0x66   : > { %400 = vst [vmem:[#allocation2 + $0xe8] sm:$0xff] %v5695_v29  ;;  %558 = vmatmul.f32.gmra.mxu1 %v5679_v21  ;;  %1176 = vmatpush.msrb.mxu0 %v1161_v62  ;;  %v1497_v61 = vld [vmem:[#allocation7 + $0x668] sm:$0xff] }
  0x67   : > { %409 = vst [vmem:[#allocation2 + $0x130] sm:$0xff] %v5705_v36  ;;  %573 = vmatmul.f32.gmra.mxu2 %v5738_v63  ;;  %600 = vmatmul.f32.gmra.mxu3 %v5741_v0  ;;  %v5843_v62 = vld [vmem:[%s5631_s21 + $0xe8] sm:$0xff] }
  0x68   : > { %401 = vst [vmem:[#allocation2 + $0xf0] sm:$0xff] %v5720_v49  ;;  %628 = vmatpush.msrb.mxu1 %v467_v1  ;;  %790 = vmatpush.msrb.mxu2 %v771_v3  ;;  %v1455_v1 = vld [vmem:[#allocation7 + $0x4e0] sm:$0xff] }
  0x69   : > { %410 = vst [vmem:[#allocation2 + $0x138] sm:$0xff] %v5723_v50  ;;  %984 = vmatpush.msrb.mxu3 %v965_v4  ;;  %1177 = vmatpush.msrb.mxu0 %v1160_v5  ;;  %v1771_v3 = vld [vmem:[#allocation7 + $0x760] sm:$0xff] }
  0x6a   : > { %397 = vst [vmem:[#allocation2 + $0xd0] sm:$0xff] %v5679_v21  ;;  %629 = vmatpush.msrb.mxu1 %v466_v6  ;;  %791 = vmatpush.msrb.mxu2 %v770_v7  ;;  %v1496_v4 = vld [vmem:[#allocation7 + $0x660] sm:$0xff]  ;;  %v5860_v6 = vld [vmem:[%s5631_s21 + $0xf8] sm:$0xff] }
  0x6b   : > { %402 = vst [vmem:[#allocation2 + $0xf8] sm:$0xff] %v5738_v63  ;;  %531 = vmatmul.f32.gmra.mxu0 %v5495_v2  ;;  %985 = vmatpush.msrb.mxu3 %v964_v8  ;;  %v2314_v5 = vld [vmem:[#allocation7 + $0x260] sm:$0xff]  ;;  %v1454_v8 = vld [vmem:[#allocation7 + $0x4d8] sm:$0xff] }
  0x6c   : > { %411 = vst [vmem:[#allocation2 + $0x140] sm:$0xff] %v5741_v0  ;;  %630 = vmatpush.msrb.mxu1 %v465_v9  ;;  %1178 = vmatpush.msrb.mxu0 %v1159_v10  ;;  %v5866_v7 = vld [vmem:[%s5631_s21 + $0xa0] sm:$0xff]  ;;  %v1770_v9 = vld [vmem:[#allocation7 + $0x758] sm:$0xff] }
  0x6d   : > { %398 = vst [vmem:[#allocation2 + $0xd8] sm:$0xff] %v5682_v22  ;;  %792 = vmatpush.msrb.mxu2 %v769_v11  ;;  %986 = vmatpush.msrb.mxu3 %v963_v12  ;;  %v1495_v10 = vld [vmem:[#allocation7 + $0x658] sm:$0xff]  ;;  %v5874_v11 = vld [vmem:[%s5631_s21 + $0xa8] sm:$0xff] }
  0x6e   : > { %403 = vst [vmem:[#allocation2 + $0x100] sm:$0xff] %v5756_v14  ;;  %561 = vmatmul.f32.gmra.mxu1 %v5682_v22  ;;  %1179 = vmatpush.msrb.mxu0 %v1158_v13  ;;  %v2313_v12 = vld [vmem:[#allocation7 + $0x258] sm:$0xff]  ;;  %v5882_v13 = vld [vmem:[%s5631_s21 + $0xb0] sm:$0xff] }
  0x6f   : > { %412 = vst [vmem:[#allocation2 + $0x148] sm:$0xff] %v5759_v15  ;;  %576 = vmatmul.f32.gmra.mxu2 %v5756_v14  ;;  %603 = vmatmul.f32.gmra.mxu3 %v5759_v15 }
  0x70   : > { %404 = vst [vmem:[#allocation2 + $0x108] sm:$0xff] %v5765_v20  ;;  %631 = vmatpush.msrb.mxu1 %v464_v16  ;;  %793 = vmatpush.msrb.mxu2 %v768_v19  ;;  %v1769_v16 = vld [vmem:[#allocation7 + $0x750] sm:$0xff] }
  0x71   : > { %413 = vst [vmem:[#allocation2 + $0x150] sm:$0xff] %v5771_v26  ;;  %987 = vmatpush.msrb.mxu3 %v962_v23  ;;  %1180 = vmatpush.msrb.mxu0 %v1157_v24  ;;  %v1494_v19 = vld [vmem:[#allocation7 + $0x650] sm:$0xff]  ;;  %v5892_v23 = vld [vmem:[%s5631_s21 + $0xb8] sm:$0xff] }
  0x72   : > { %405 = vst [vmem:[#allocation2 + $0x110] sm:$0xff] %v5775_v28  ;;  %632 = vmatpush.msrb.mxu1 %v463_v25  ;;  %794 = vmatpush.msrb.mxu2 %v767_v27  ;;  %v2312_v25 = vld [vmem:[#allocation7 + $0x250] sm:$0xff] }
  0x73   : > { %414 = vst [vmem:[#allocation2 + $0x158] sm:$0xff] %v5779_v32  ;;  %534 = vmatmul.f32.gmra.mxu0 %v5495_v2  ;;  %988 = vmatpush.msrb.mxu3 %v961_v30 }
  0x74   : > { %406 = vst [vmem:[#allocation2 + $0x118] sm:$0xff] %v5783_v35  ;;  %633 = vmatpush.msrb.mxu1 %v462_v31  ;;  %1181 = vmatpush.msrb.mxu0 %v1156_v33  ;;  %v1452_v31 = vld [vmem:[#allocation7 + $0x4c8] sm:$0xff] }
  0x75   : > { %415 = vst [vmem:[#allocation2 + $0x160] sm:$0xff] %v5788_v40  ;;  %795 = vmatpush.msrb.mxu2 %v766_v37  ;;  %989 = vmatpush.msrb.mxu3 %v960_v38  ;;  %v1768_v33 = vld [vmem:[#allocation7 + $0x748] sm:$0xff] }
  0x76   : > { %407 = vst [vmem:[#allocation2 + $0x120] sm:$0xff] %v5792_v42  ;;  %634 = vmatpush.msrb.mxu1 %v461_v39  ;;  %1182 = vmatpush.msrb.mxu0 %v1155_v41  ;;  %v1493_v38 = vld [vmem:[#allocation7 + $0x648] sm:$0xff] }
  0x77   : > { %416 = vst [vmem:[#allocation2 + $0x168] sm:$0xff] %v5796_v43  ;;  %579 = vmatmul.f32.gmra.mxu2 %v5765_v20  ;;  %606 = vmatmul.f32.gmra.mxu3 %v5771_v26  ;;  %v2311_v41 = vld [vmem:[#allocation7 + $0x248] sm:$0xff] }
  0x78   : > { %635 = vmatmul.f32.vlgmr.msrb.gmra.mxu1 %v5679_v21  ;;  %796 = vmatpush.msrb.mxu2 %v765_v44  ;;  %421 = vst [vmem:[#allocation2 + $0x190] sm:$0xff] %v5803_v53  ;;  %v2317_v21 = vld [vmem:[#allocation7 + $0x278] sm:$0xff] }
  0x79   : > { %990 = vmatpush.msrb.mxu3 %v959_v45  ;;  %1183 = vmatpush.msrb.mxu0 %v1154_v46  ;;  %422 = vst [vmem:[#allocation2 + $0x198] sm:$0xff] %v5811_v54 }
  0x7a   : > { %1613 = vmatpush.msra.mxu2 %v1458_v47  ;;  %1500 = vmatpush.msra.mxu1 %v1499_v52  ;;  %424 = vst [vmem:[#allocation2 + $0x1a8] sm:$0xff] %v5827_v58  ;;  %v1767_v47 = vld [vmem:[#allocation7 + $0x740] sm:$0xff] }
  0x7b   : > { %1775 = vmatpush.msra.mxu3 %v1774_v48  ;;  %537 = vmatmul.f32.gmra.mxu0 %v5495_v2  ;;  %426 = vst [vmem:[#allocation2 + $0x1b8] sm:$0xff] %v5843_v62  ;;  %v1492_v52 = vld [vmem:[#allocation7 + $0x640] sm:$0xff] }
  0x7c   : > { %1184 = vmatpush.msrb.mxu0 %v1153_v51  ;;  %1614 = vmatpush.msra.mxu2 %v1457_v55  ;;  %428 = vst [vmem:[#allocation2 + $0x1c8] sm:$0xff] %v5860_v6  ;;  %v2310_v55 = vld [vmem:[#allocation7 + $0x240] sm:$0xff] }
  0x7d   : > { %1776 = vmatpush.msra.mxu3 %v1773_v56  ;;  %1501 = vmatpush.msra.mxu1 %v1498_v57  ;;  %417 = vst [vmem:[#allocation2 + $0x170] sm:$0xff] %v5866_v7 }
  0x7e   : > { %2318 = vmatpush.msra.mxu0 %v2317_v21  ;;  %1615 = vmatpush.msra.mxu2 %v1456_v59  ;;  %418 = vst [vmem:[#allocation2 + $0x178] sm:$0xff] %v5874_v11 }
  0x7f   : > { %582 = vmatmul.f32.gmra.mxu2 %v5775_v28  ;;  %609 = vmatmul.f32.gmra.mxu3 %v5779_v32  ;;  %419 = vst [vmem:[#allocation2 + $0x180] sm:$0xff] %v5882_v13 }
  0x80   : > { %638 = vmatmul.f32.gmra.mxu1 %v5682_v22  ;;  %v5819_v22 = vld [vmem:[%s5631_s21 + $0xd0] sm:$0xff]  ;;  %1777 = vmatpush.msra.mxu3 %v1772_v60  ;;  %420 = vst [vmem:[#allocation2 + $0x188] sm:$0xff] %v5892_v23  ;;  %v1766_v60 = vld [vmem:[#allocation7 + $0x738] sm:$0xff] }
  0x81   : > { %423 = vst [vmem:[#allocation2 + $0x1a0] sm:$0xff] %v5819_v22  ;;  %1502 = vmatpush.msra.mxu1 %v1497_v61  ;;  %1616 = vmatpush.msra.mxu2 %v1455_v1 }
  0x82   : > { %1778 = vmatpush.msra.mxu3 %v1771_v3  ;;  %v1491_v3 = vld [vmem:[#allocation7 + $0x638] sm:$0xff] }
  0x83   : > { %540 = vmatmul.f32.gmra.mxu0 %v5495_v2  ;;  %1503 = vmatpush.msra.mxu1 %v1496_v4  ;;  %v2309_v4 = vld [vmem:[#allocation7 + $0x238] sm:$0xff] }
  0x84   : > { %1617 = vmatpush.msra.mxu2 %v1454_v8  ;;  %1779 = vmatpush.msra.mxu3 %v1770_v9  ;;  %v5970_v9 = vld [vmem:[#allocation2 + $0xb8] sm:$0xff] }
  0x85   : > { %1504 = vmatpush.msra.mxu1 %v1495_v10 }
  0x86   : > { %1780 = vmatpush.msra.mxu3 %v1769_v16 }
  0x87   : > { %585 = vmatmul.f32.gmra.mxu2 %v5783_v35  ;;  %612 = vmatmul.f32.gmra.mxu3 %v5788_v40 }
  0x88   : > { %641 = vmatmul.f32.gmra.mxu1 %v5672_v17  ;;  %v2316_v17 = vld [vmem:[#allocation7 + $0x270] sm:$0xff]  ;;  %1781 = vmatpush.msra.mxu3 %v1768_v33 }
  0x89   : > { %2319 = vmatpush.msra.mxu0 %v2316_v17  ;;  %1505 = vmatpush.msra.mxu1 %v1494_v19 }
  0x8a   : > { %1782 = vmatpush.msra.mxu3 %v1767_v47  ;;  %v1448_v47 = vld [vmem:[#allocation7 + $0x4a8] sm:$0xff] }
  0x8b   : > { %543 = vmatmul.f32.gmra.mxu0 %v5495_v2  ;;  %1506 = vmatpush.msra.mxu1 %v1493_v38 }
  0x8c   : > { %1783 = vmatpush.msra.mxu3 %v1766_v60 }
  0x8d   : > { %1507 = vmatpush.msra.mxu1 %v1492_v52  ;;  %v1764_v52 = vld [vmem:[#allocation7 + $0x728] sm:$0xff] }
  0x8f   : > { %588 = vmatmul.f32.gmra.mxu2 %v5792_v42  ;;  %615 = vmatmul.f32.gmra.mxu3 %v5796_v43 }
  0x90   : > { %644 = vmatmul.f32.gmra.mxu1 %v5695_v29  ;;  %v5835_v29 = vld [vmem:[%s5631_s21 + $0xe0] sm:$0xff] }
  0x91   : > { %425 = vst [vmem:[#allocation2 + $0x1b0] sm:$0xff] %v5835_v29  ;;  %1508 = vmatpush.msra.mxu1 %v1491_v3 }
  0x93   : > { %546 = vmatmul.f32.gmra.mxu0 %v5495_v2 }
  0x97   : > { %797 = vmatmul.f32.vlgmr.msrb.gmra.mxu2 %v5705_v36  ;;  %991 = vmatmul.f32.vlgmr.msrb.gmra.mxu3 %v5495_v2 }
  0x98   : > { %647 = vmatmul.f32.gmra.mxu1 %v5720_v49  ;;  %v2315_v49 = vld [vmem:[#allocation7 + $0x268] sm:$0xff] }
  0x99   : > { %2320 = vmatpush.msra.mxu0 %v2315_v49 }
  0x9b   : > { %1185 = vmatmul.f32.vlgmr.msrb.gmra.mxu0 %v5803_v53 }
  0x9c   : > { %2321 = vmatpush.msra.mxu0 %v2314_v5 }
  0x9e   : > { %2322 = vmatpush.msra.mxu0 %v2313_v12  ;;  %v1765_v12 = vld [vmem:[#allocation7 + $0x730] sm:$0xff] }
  0x9f   : > { %800 = vmatmul.f32.gmra.mxu2 %v5723_v50  ;;  %994 = vmatmul.f32.gmra.mxu3 %v5495_v2 }
  0xa0   : > { %650 = vmatmul.f32.gmra.mxu1 %v5738_v63  ;;  %v5852_v63 = vld [vmem:[%s5631_s21 + $0xf0] sm:$0xff]  ;;  %2323 = vmatpush.msra.mxu0 %v2312_v25 }
  0xa1   : > { %427 = vst [vmem:[#allocation2 + $0x1c0] sm:$0xff] %v5852_v63  ;;  %1784 = vmatpush.msra.mxu3 %v1765_v12  ;;  %v1490_v25 = vld [vmem:[#allocation7 + $0x630] sm:$0xff]  ;;  %v2307_v12 = vld [vmem:[#allocation7 + $0x228] sm:$0xff] }
  0xa2   : > { %2324 = vmatpush.msra.mxu0 %v2311_v41  ;;  %1509 = vmatpush.msra.mxu1 %v1490_v25 }
  0xa3   : > { %1188 = vmatmul.f32.gmra.mxu0 %v5811_v54  ;;  %1785 = vmatpush.msra.mxu3 %v1764_v52 }
  0xa4   : > { %2325 = vmatpush.msra.mxu0 %v2310_v55 }
  0xa6   : > { %2326 = vmatpush.msra.mxu0 %v2309_v4 }
  0xa7   : > { %803 = vmatmul.f32.gmra.mxu2 %v5741_v0  ;;  %997 = vmatmul.f32.gmra.mxu3 %v5495_v2 }
  0xa8   : > { %653 = vmatmul.f32.gmra.mxu1 %v5756_v14  ;;  %v1453_v14 = vld [vmem:[#allocation7 + $0x4d0] sm:$0xff] }
  0xa9   : > { %1618 = vmatpush.msra.mxu2 %v1453_v14 }
  0xab   : > { %1191 = vmatmul.f32.gmra.mxu0 %v5819_v22  ;;  %1619 = vmatpush.msra.mxu2 %v1452_v31  ;;  %v2308_v31 = vld [vmem:[#allocation7 + $0x230] sm:$0xff] }
  0xac   : > { %2327 = vmatpush.msra.mxu0 %v2308_v31 }
  0xae   : > { %2328 = vmatpush.msra.mxu0 %v2307_v12  ;;  %v2306_v12 = vld [vmem:[#allocation7 + $0x220] sm:$0xff] }
  0xaf   : > { %806 = vmatmul.f32.gmra.mxu2 %v5759_v15  ;;  %1000 = vmatmul.f32.gmra.mxu3 %v5495_v2 }
  0xb0   : > { %656 = vmatmul.f32.gmra.mxu1 %v5765_v20  ;;  %2329 = vmatpush.msra.mxu0 %v2306_v12 }
  0xb3   : > { %1194 = vmatmul.f32.gmra.mxu0 %v5827_v58 }
  0xb7   : > { %809 = vmatmul.f32.gmra.mxu2 %v5771_v26  ;;  %1003 = vmatmul.f32.gmra.mxu3 %v5495_v2 }
  0xb8   : > { %659 = vmatmul.f32.gmra.mxu1 %v5775_v28 }
  0xbb   : > { %1197 = vmatmul.f32.gmra.mxu0 %v5835_v29 }
  0xbf   : > { %812 = vmatmul.f32.gmra.mxu2 %v5779_v32  ;;  %1006 = vmatmul.f32.gmra.mxu3 %v5495_v2 }
  0xc0   : > { %662 = vmatmul.f32.gmra.mxu1 %v5783_v35 }
  0xc3   : > { %1200 = vmatmul.f32.gmra.mxu0 %v5843_v62 }
  0xc7   : > { %815 = vmatmul.f32.gmra.mxu2 %v5788_v40  ;;  %1009 = vmatmul.f32.gmra.mxu3 %v5495_v2 }
  0xc8   : > { %665 = vmatmul.f32.gmra.mxu1 %v5792_v42 }
  0xcb   : > { %v5886_v20 = vpop.f32.mrf.mxu1  ;;  %1203 = vmatmul.f32.gmra.mxu0 %v5852_v63 }
  0xcf   : > { %818 = vmatmul.f32.gmra.mxu2 %v5796_v43  ;;  %1012 = vmatmul.f32.gmra.mxu3 %v5495_v2 }
  0xd0   : > { %668 = vmatmul.f32.gmra.mxu1 %v5675_v18  ;;  %v5895_v24 = vpop.f32.mrf.mxu0 }
  0xd2   : > { %v5898_v27 = vpop.f32.mrf.mxu2  ;;  %v5900_v28 = vpop.f32.mrf.mxu3 }
  0xd3   : > { %v5902_v30 = vpop.f32.mrf.mxu1  ;;  %1206 = vmatmul.f32.gmra.mxu0 %v5860_v6 }
  0xd7   : > { %821 = vmatmul.f32.gmra.mxu2 %v5866_v7  ;;  %1015 = vmatmul.f32.gmra.mxu3 %v5495_v2 }
  0xd8   : > { %671 = vmatmul.f32.gmra.mxu1 %v5705_v36  ;;  %v5908_v18 = vpop.f32.mrf.mxu0 }
  0xda   : > { %v5910_v35 = vpop.f32.mrf.mxu2  ;;  %v5912_v37 = vpop.f32.mrf.mxu3 }
  0xdb   : > { %v5914_v39 = vpop.f32.mrf.mxu1  ;;  %1209 = vmatmul.f32.gmra.mxu0 %v5495_v2 }
  0xdf   : > { %824 = vmatmul.f32.gmra.mxu2 %v5874_v11  ;;  %1018 = vmatmul.f32.gmra.mxu3 %v5495_v2 }
  0xe0   : > { %674 = vmatmul.f32.gmra.mxu1 %v5723_v50  ;;  %v5920_v36 = vpop.f32.mrf.mxu0  ;;  %v1451_v50 = vld [vmem:[#allocation7 + $0x4c0] sm:$0xff] }
  0xe1   : > { %1620 = vmatpush.msra.mxu2 %v1451_v50 }
  0xe2   : > { %v5922_v42 = vpop.f32.mrf.mxu2  ;;  %v5924_v44 = vpop.f32.mrf.mxu3 }
  0xe3   : > { %v5926_v45 = vpop.f32.mrf.mxu1  ;;  %1212 = vmatmul.f32.gmra.mxu0 %v5495_v2 }
  0xe7   : > { %827 = vmatmul.f32.gmra.mxu2 %v5882_v13  ;;  %1021 = vmatmul.f32.gmra.mxu3 %v5495_v2 }
  0xe8   : > { %677 = vmatmul.f32.gmra.mxu1 %v5741_v0  ;;  %v5932_v46 = vpop.f32.mrf.mxu0 }
  0xea   : > { %v5934_v48 = vpop.f32.mrf.mxu2  ;;  %v5936_v51 = vpop.f32.mrf.mxu3 }
  0xeb   : > { %v5938_v21 = vpop.f32.mrf.mxu1  ;;  %1215 = vmatmul.f32.gmra.mxu0 %v5495_v2 }
  0xef   : > { %830 = vmatmul.f32.gmra.mxu2 %v5892_v23  ;;  %1024 = vmatmul.f32.gmra.mxu3 %v5495_v2 }
  0xf0   : > { %680 = vmatmul.f32.gmra.mxu1 %v5759_v15  ;;  %v5944_v0 = vpop.f32.mrf.mxu0  ;;  %v1450_v15 = vld [vmem:[#allocation7 + $0x4b8] sm:$0xff] }
  0xf1   : > { %1621 = vmatpush.msra.mxu2 %v1450_v15 }
  0xf2   : > { %v5946_v56 = vpop.f32.mrf.mxu2  ;;  %v5948_v57 = vpop.f32.mrf.mxu3 }
  0xf3   : > { %1218 = vmatmul.f32.gmra.mxu0 %v5495_v2 }
  0xf5   : > { %v636_v17 = vpop.f32.mrf.mxu1 }
  0xf6   : > { %v637_v50 = vadd.f32 %v636_v17, %v5895_v24  ;;  %v1489_v17 = vld [vmem:[#allocation7 + $0x628] sm:$0xff] }
  0xf7   : > { %833 = vmatmul.f32.gmra.mxu2 %v5803_v53  ;;  %1027 = vmatmul.f32.gmra.mxu3 %v5495_v2 }
  0xf8   : > { %683 = vmatmul.f32.gmra.mxu1 %v5771_v26  ;;  %v5954_v59 = vpop.f32.mrf.mxu0 }
  0xf9   : > { %1510 = vmatpush.msra.mxu1 %v1489_v17 }
  0xfa   : > { %v5956_v61 = vpop.f32.mrf.mxu2  ;;  %v5958_v49 = vpop.f32.mrf.mxu3 }
  0xfb   : > { %1221 = vmatmul.f32.gmra.mxu0 %v5495_v2 }
  0xfd   : > { %v639_v1 = vpop.f32.mrf.mxu1 }
  0xfe   : > { %v640_v24 = vadd.f32 %v639_v1, %v5908_v18  ;;  %v1447_v1 = vld [vmem:[#allocation7 + $0x4a0] sm:$0xff] }
  0xff   : > { %836 = vmatmul.f32.gmra.mxu2 %v5811_v54  ;;  %1030 = vmatmul.f32.gmra.mxu3 %v5495_v2 }
 0x100   : > { %686 = vmatmul.f32.gmra.mxu1 %v5779_v32  ;;  %v5964_v26 = vpop.f32.mrf.mxu0  ;;  %v1449_v32 = vld [vmem:[#allocation7 + $0x4b0] sm:$0xff] }
 0x101   : > { %1622 = vmatpush.msra.mxu2 %v1449_v32 }
 0x102   : > { %v5966_v5 = vpop.f32.mrf.mxu2  ;;  %v5968_v8 = vpop.f32.mrf.mxu3 }
 0x103   : > { %1224 = vmatmul.f32.gmra.mxu0 %v5970_v9  ;;  %1623 = vmatpush.msra.mxu2 %v1448_v47 }
 0x105   : > { %v642_v10 = vpop.f32.mrf.mxu1  ;;  %1624 = vmatpush.msra.mxu2 %v1447_v1  ;;  %v1762_v1 = vld [vmem:[#allocation7 + $0x718] sm:$0xff] }
 0x106   : > { %v643_v18 = vadd.f32 %v642_v10, %v5920_v36  ;;  %v1488_v10 = vld [vmem:[#allocation7 + $0x620] sm:$0xff] }
 0x107   : > { %839 = vmatmul.f32.gmra.mxu2 %v5819_v22  ;;  %1033 = vmatmul.f32.gmra.mxu3 %v5970_v9 }
 0x108   : > { %689 = vmatmul.f32.gmra.mxu1 %v5788_v40  ;;  %v5976_v2 = vpop.f32.mrf.mxu0 }
 0x109   : > { %1511 = vmatpush.msra.mxu1 %v1488_v10 }
 0x10a   : > { %v5978_v14 = vpop.f32.mrf.mxu2  ;;  %v5980_v16 = vpop.f32.mrf.mxu3 }
 0x10b   : > { %1227 = vmatmul.f32.gmra.mxu0 %v5970_v9 }
 0x10d   : > { %v5983_v19 = vpop.f32.mrf.mxu1 }
 0x10e   : > { %v646_v36 = vadd.f32 %v5983_v19, %v5932_v46  ;;  %v1446_v19 = vld [vmem:[#allocation7 + $0x498] sm:$0xff] }
 0x10f   : > { %842 = vmatmul.f32.gmra.mxu2 %v5827_v58  ;;  %1036 = vmatmul.f32.gmra.mxu3 %v5970_v9 }
 0x110   : > { %692 = vmatmul.f32.gmra.mxu1 %v5796_v43  ;;  %v5988_v40 = vpop.f32.mrf.mxu0  ;;  %1625 = vmatpush.msra.mxu2 %v1446_v19 }
 0x112   : > { %v5990_v33 = vpop.f32.mrf.mxu2  ;;  %v5992_v38 = vpop.f32.mrf.mxu3 }
 0x113   : > { %1230 = vmatmul.f32.gmra.mxu0 %v5970_v9 }
 0x115   : > { %v5995_v41 = vpop.f32.mrf.mxu1 }
 0x116   : > { %v649_v46 = vadd.f32 %v5995_v41, %v5944_v0  ;;  %v1487_v41 = vld [vmem:[#allocation7 + $0x618] sm:$0xff] }
 0x117   : > { %845 = vmatmul.f32.gmra.mxu2 %v5835_v29  ;;  %1039 = vmatmul.f32.gmra.mxu3 %v5970_v9 }
 0x118   : > { %695 = vmatmul.f32.gmra.mxu1 %v5866_v7  ;;  %v1186_v43 = vpop.f32.mrf.mxu0 }
 0x119   : > { %1512 = vmatpush.msra.mxu1 %v1487_v41 }
 0x11a   : > { %v798_v55 = vpop.f32.mrf.mxu2  ;;  %v992_v15 = vpop.f32.mrf.mxu3 }
 0x11b   : > { %v894_v60 = vadd.f32 %v798_v55, %v637_v50  ;;  %1233 = vmatmul.f32.gmra.mxu0 %v5970_v9  ;;  %v1763_v55 = vld [vmem:[#allocation7 + $0x720] sm:$0xff] }
 0x11c   : > { %1786 = vmatpush.msra.mxu3 %v1763_v55 }
 0x11d   : > { %v1088_v3 = vadd.f32 %v992_v15, %v894_v60  ;;  %v6002_v4 = vpop.f32.mrf.mxu1 }
 0x11e   : > { %1787 = vmatpush.msra.mxu3 %v1762_v1  ;;  %v652_v0 = vadd.f32 %v6002_v4, %v5954_v59  ;;  %v1445_v4 = vld [vmem:[#allocation7 + $0x490] sm:$0xff] }
 0x11f   : > { %v6004_v32 = vadd.f32 %v1186_v43, %v1088_v3  ;;  %848 = vmatmul.f32.gmra.mxu2 %v5843_v62  ;;  %1042 = vmatmul.f32.gmra.mxu3 %v5970_v9 }
 0x120   : > { %698 = vmatmul.f32.gmra.mxu1 %v5874_v11  ;;  %v1189_v7 = vpop.f32.mrf.mxu0  ;;  %1626 = vmatpush.msra.mxu2 %v1445_v4 }
 0x122   : > { %v801_v25 = vpop.f32.mrf.mxu2  ;;  %v995_v31 = vpop.f32.mrf.mxu3 }
 0x123   : > { %v895_v50 = vadd.f32 %v801_v25, %v640_v24  ;;  %1236 = vmatmul.f32.gmra.mxu0 %v5970_v9 }
 0x125   : > { %v1089_v43 = vadd.f32 %v995_v31, %v895_v50  ;;  %v6011_v47 = vpop.f32.mrf.mxu1 }
 0x126   : > { %v655_v59 = vadd.f32 %v6011_v47, %v5964_v26  ;;  %v1486_v47 = vld [vmem:[#allocation7 + $0x610] sm:$0xff] }
 0x127   : > { %v6013_v52 = vadd.f32 %v1189_v7, %v1089_v43  ;;  %851 = vmatmul.f32.gmra.mxu2 %v5852_v63  ;;  %1045 = vmatmul.f32.gmra.mxu3 %v5970_v9 }
 0x128   : > { %701 = vmatmul.f32.gmra.mxu1 %v5882_v13  ;;  %v1192_v11 = vpop.f32.mrf.mxu0 }
 0x129   : > { %1513 = vmatpush.msra.mxu1 %v1486_v47 }
 0x12a   : > { %v804_v15 = vpop.f32.mrf.mxu2  ;;  %v998_v60 = vpop.f32.mrf.mxu3 }
 0x12b   : > { %v896_v3 = vadd.f32 %v804_v15, %v643_v18  ;;  %1239 = vmatmul.f32.gmra.mxu0 %v5970_v9 }
 0x12d   : > { %v1090_v7 = vadd.f32 %v998_v60, %v896_v3  ;;  %v6020_v24 = vpop.f32.mrf.mxu1 }
 0x12e   : > { %v658_v26 = vadd.f32 %v6020_v24, %v5976_v2 }
 0x12f   : > { %v6022_v17 = vadd.f32 %v1192_v11, %v1090_v7  ;;  %854 = vmatmul.f32.gmra.mxu2 %v5860_v6  ;;  %1048 = vmatmul.f32.gmra.mxu3 %v5970_v9 }
 0x130   : > { %704 = vmatmul.f32.gmra.mxu1 %v5892_v23  ;;  %v1195_v13 = vpop.f32.mrf.mxu0 }
 0x132   : > { %v807_v25 = vpop.f32.mrf.mxu2  ;;  %v1001_v31 = vpop.f32.mrf.mxu3 }
 0x133   : > { %v897_v50 = vadd.f32 %v807_v25, %v646_v36  ;;  %1242 = vmatmul.f32.gmra.mxu0 %v5970_v9  ;;  %v2305_v36 = vld [vmem:[#allocation7 + $0x218] sm:$0xff] }
 0x134   : > { %2330 = vmatpush.msra.mxu0 %v2305_v36  ;;  %v950_v36 = vld [vmem:[#allocation2 + $0xd0] sm:$0xff] }
 0x135   : > { %v1091_v43 = vadd.f32 %v1001_v31, %v897_v50  ;;  %v6030_v11 = vpop.f32.mrf.mxu1 }
 0x136   : > { %v661_v24 = vadd.f32 %v6030_v11, %v5988_v40  ;;  %v2303_v11 = vld [vmem:[#allocation7 + $0x208] sm:$0xff] }
 0x137   : > { %v6032_v18 = vadd.f32 %v1195_v13, %v1091_v43  ;;  %857 = vmatmul.f32.gmra.mxu2 %v5970_v9  ;;  %1051 = vmatmul.f32.gmra.mxu3 %v5970_v9 }
 0x138   : > { %707 = vmatmul.f32.gmra.mxu1 %v5803_v53  ;;  %v1198_v23 = vpop.f32.mrf.mxu0 }
 0x13a   : > { %v810_v55 = vpop.f32.mrf.mxu2  ;;  %v1004_v15 = vpop.f32.mrf.mxu3 }
 0x13b   : > { %v898_v60 = vadd.f32 %v810_v55, %v649_v46  ;;  %1245 = vmatmul.f32.gmra.mxu0 %v5970_v9 }
 0x13d   : > { %v1092_v3 = vadd.f32 %v1004_v15, %v898_v60  ;;  %v6040_v7 = vpop.f32.mrf.mxu1 }
 0x13e   : > { %v664_v40 = vadd.f32 %v6040_v7, %v5886_v20  ;;  %v1443_v7 = vld [vmem:[#allocation7 + $0x480] sm:$0xff] }
 0x13f   : > { %v6042_v13 = vadd.f32 %v1198_v23, %v1092_v3  ;;  %860 = vmatmul.f32.gmra.mxu2 %v5970_v9  ;;  %1054 = vmatmul.f32.gmra.mxu3 %v5970_v9  ;;  %v1761_v23 = vld [vmem:[#allocation7 + $0x710] sm:$0xff] }
 0x140   : > { %710 = vmatmul.f32.gmra.mxu1 %v5811_v54  ;;  %v1201_v53 = vpop.f32.mrf.mxu0  ;;  %1788 = vmatpush.msra.mxu3 %v1761_v23  ;;  %v2304_v3 = vld [vmem:[#allocation7 + $0x210] sm:$0xff] }
 0x141   : > { %2331 = vmatpush.msra.mxu0 %v2304_v3 }
 0x142   : > { %v813_v10 = vpop.f32.mrf.mxu2  ;;  %v1007_v12 = vpop.f32.mrf.mxu3 }
 0x143   : > { %v899_v25 = vadd.f32 %v813_v10, %v652_v0  ;;  %1248 = vmatmul.f32.gmra.mxu0 %v5970_v9  ;;  %v1485_v10 = vld [vmem:[#allocation7 + $0x608] sm:$0xff] }
 0x144   : > { %1514 = vmatpush.msra.mxu1 %v1485_v10  ;;  %2332 = vmatpush.msra.mxu0 %v2303_v11  ;;  %v1759_v10 = vld [vmem:[#allocation7 + $0x700] sm:$0xff] }
 0x145   : > { %v1093_v31 = vadd.f32 %v1007_v12, %v899_v25  ;;  %v6050_v50 = vpop.f32.mrf.mxu1  ;;  %v1434_v11 = vld [vmem:[#allocation2 + $0xc4] sm:$0xff] }
 0x146   : > { %v667_v20 = vadd.f32 %v6050_v50, %v5902_v30  ;;  %v2302_v50 = vld [vmem:[#allocation7 + $0x200] sm:$0xff] }
 0x147   : > { %v6052_v43 = vadd.f32 %v1201_v53, %v1093_v31  ;;  %863 = vmatmul.f32.gmra.mxu2 %v5970_v9  ;;  %1057 = vmatmul.f32.gmra.mxu3 %v5970_v9 }
 0x148   : > { %713 = vmatmul.f32.gmra.mxu1 %v5819_v22  ;;  %v1204_v54 = vpop.f32.mrf.mxu0  ;;  %2333 = vmatpush.msra.mxu0 %v2302_v50 }
 0x14a   : > { %v816_v46 = vpop.f32.mrf.mxu2  ;;  %v1010_v19 = vpop.f32.mrf.mxu3 }
 0x14b   : > { %v900_v1 = vadd.f32 %v816_v46, %v655_v59  ;;  %1251 = vmatmul.f32.gmra.mxu0 %v5970_v9  ;;  %v1760_v59 = vld [vmem:[#allocation7 + $0x708] sm:$0xff] }
 0x14c   : > { %1789 = vmatpush.msra.mxu3 %v1760_v59 }
 0x14d   : > { %v1094_v55 = vadd.f32 %v1010_v19, %v900_v1  ;;  %v6060_v15 = vpop.f32.mrf.mxu1  ;;  %v951_v19 = vld [vmem:[#allocation2 + $0xd8] sm:$0xff] }
 0x14e   : > { %1790 = vmatpush.msra.mxu3 %v1759_v10  ;;  %v670_v30 = vadd.f32 %v6060_v15, %v5914_v39  ;;  %v2592_v15 = vld [vmem:[#allocation7 + $0x378] sm:$0xff]  ;;  %v1435_v10 = vld [vmem:[#allocation2 + $0xcc] sm:$0xff] }
 0x14f   : > { %v6062_v60 = vadd.f32 %v1204_v54, %v1094_v55  ;;  %866 = vmatmul.f32.gmra.mxu2 %v5970_v9  ;;  %1060 = vmatmul.f32.gmra.mxu3 %v5970_v9  ;;  %v1444_v54 = vld [vmem:[#allocation7 + $0x488] sm:$0xff] }
 0x150   : > { %716 = vmatmul.f32.gmra.mxu1 %v5827_v58  ;;  %v1207_v22 = vpop.f32.mrf.mxu0  ;;  %v1484_v58 = vld [vmem:[#allocation7 + $0x600] sm:$0xff]  ;;  %1627 = vmatpush.msra.mxu2 %v1444_v54 }
 0x151   : > { %1515 = vmatpush.msra.mxu1 %v1484_v58 }
 0x152   : > { %v819_v53 = vpop.f32.mrf.mxu2  ;;  %v1013_v0 = vpop.f32.mrf.mxu3  ;;  %1628 = vmatpush.msra.mxu2 %v1443_v7 }
 0x153   : > { %v901_v41 = vadd.f32 %v819_v53, %v658_v26  ;;  %1254 = vmatmul.f32.gmra.mxu0 %v5970_v9  ;;  %v952_v53 = vld [vmem:[#allocation2 + $0xe0] sm:$0xff] }
 0x154   : > { %2593 = vmatpush.msrb.mxu2 %v2592_v15  ;;  %v957_v15 = vld [vmem:[#allocation2 + $0x108] sm:$0xff] }
 0x155   : > { %v1095_v12 = vadd.f32 %v1013_v0, %v901_v41  ;;  %v6070_v25 = vpop.f32.mrf.mxu1 }
 0x156   : > { %v673_v39 = vadd.f32 %v6070_v25, %v5926_v45 }
 0x157   : > { %v6072_v31 = vadd.f32 %v1207_v22, %v1095_v12  ;;  %869 = vmatmul.f32.gmra.mxu2 %v5970_v9  ;;  %1063 = vmatmul.f32.gmra.mxu3 %v950_v36 }
 0x158   : > { %719 = vmatmul.f32.gmra.mxu1 %v5835_v29  ;;  %v1210_v2 = vpop.f32.mrf.mxu0 }
 0x15a   : > { %v822_v4 = vpop.f32.mrf.mxu2  ;;  %v1016_v23 = vpop.f32.mrf.mxu3 }
 0x15b   : > { %v902_v46 = vadd.f32 %v822_v4, %v661_v24  ;;  %1257 = vmatmul.f32.gmra.mxu0 %v5970_v9  ;;  %v953_v24 = vld [vmem:[#allocation2 + $0xe8] sm:$0xff] }
 0x15d   : > { %v1096_v1 = vadd.f32 %v1016_v23, %v902_v46  ;;  %v6079_v55 = vpop.f32.mrf.mxu1 }
 0x15e   : > { %v676_v25 = vadd.f32 %v6079_v55, %v5938_v21 }
 0x15f   : > { %v6081_v22 = vadd.f32 %v1210_v2, %v1096_v1  ;;  %872 = vmatmul.f32.gmra.mxu2 %v5970_v9  ;;  %1066 = vmatmul.f32.gmra.mxu3 %v951_v19  ;;  %v954_v1 = vld [vmem:[#allocation2 + $0xf0] sm:$0xff] }
 0x160   : > { %722 = vmatmul.f32.gmra.mxu1 %v5843_v62  ;;  %v1213_v29 = vpop.f32.mrf.mxu0 }
 0x162   : > { %v825_v26 = vpop.f32.mrf.mxu2  ;;  %v1019_v47 = vpop.f32.mrf.mxu3 }
 0x163   : > { %v903_v3 = vadd.f32 %v825_v26, %v664_v40  ;;  %1260 = vmatmul.f32.gmra.mxu0 %v5970_v9 }
 0x165   : > { %v1097_v0 = vadd.f32 %v1019_v47, %v903_v3  ;;  %v6088_v41 = vpop.f32.mrf.mxu1  ;;  %v3135_v47 = vld [vmem:[#allocation7 + $0x2f8] sm:$0xff] }
 0x166   : > { %3136 = vmatpush.msrb.mxu3 %v3135_v47  ;;  %v679_v55 = vadd.f32 %v6088_v41, %v5898_v27  ;;  %v5496_v47 = vmov 0   ;;  %v1437_v27 = vld [vmem:[#allocation2 + $0xdc] sm:$0xff] }
 0x167   : > { %v6090_v36 = vadd.f32 %v1213_v29, %v1097_v0  ;;  %875 = vmatmul.f32.gmra.mxu2 %v5970_v9  ;;  %1069 = vmatmul.f32.gmra.mxu3 %v952_v53 }
 0x168   : > { %725 = vmatmul.f32.gmra.mxu1 %v5852_v63  ;;  %v1216_v62 = vpop.f32.mrf.mxu0  ;;  %5257 = vset.pattern.permute.xlu0 %v5496_v47 }
 0x169   : > { %5258 = vset.pattern.permute.xlu1 %v5496_v47  ;;  %5259 = vset.pattern.permute.xlu2 %v5496_v47  ;;  %v1922_v47 = vld [vmem:[%s7961_s3 + $0x10] sm:$0xff] }
 0x16a   : > { %v828_v12 = vpop.f32.mrf.mxu2  ;;  %v1022_v58 = vpop.f32.mrf.mxu3  ;;  %1964 = vperm.xlu1 %5258, %v1922_v47   ;;  %v1413_v47 = vld [vmem:[#allocation2 + $0x1c] sm:$0xff] }
 0x16b   : > { %v904_v2 = vadd.f32 %v828_v12, %v667_v20  ;;  %1263 = vmatmul.f32.gmra.mxu0 %v5970_v9 }
 0x16d   : > { %v1098_v54 = vadd.f32 %v1022_v58, %v904_v2  ;;  %v6097_v59 = vpop.f32.mrf.mxu1  ;;  %v2288_v58 = vld [vmem:[#allocation7 + $0xf8] sm:$0xff] }
 0x16e   : > { %v3106_v2 = vld [vmem:[#allocation7 + $0x1f8] sm:$0xff]  ;;  %2431 = vmatpush.msrb.mxu1 %v2288_v58 }
 0x16f   : > { %v6099_v4 = vadd.f32 %v1216_v62, %v1098_v54  ;;  %878 = vmatmul.f32.gmra.mxu2 %v5970_v9  ;;  %1072 = vmatmul.f32.gmra.mxu3 %v953_v24  ;;  %v955_v62 = vld [vmem:[#allocation2 + $0xf8] sm:$0xff] }
 0x170   : > { %728 = vmatmul.f32.gmra.mxu1 %v5860_v6  ;;  %v1219_v63 = vpop.f32.mrf.mxu0  ;;  %3249 = vmatpush.msrb.mxu0 %v3106_v2 }
 0x172   : > { %v831_v23 = vpop.f32.mrf.mxu2  ;;  %v1025_v46 = vpop.f32.mrf.mxu3 }
 0x173   : > { %v905_v19 = vadd.f32 %v831_v23, %v670_v30  ;;  %1266 = vmatmul.f32.gmra.mxu0 %v5970_v9  ;;  %v956_v30 = vld [vmem:[#allocation2 + $0x100] sm:$0xff] }
 0x175   : > { %v1099_v29 = vadd.f32 %v1025_v46, %v905_v19  ;;  %v6106_v40 = vpop.f32.mrf.mxu1  ;;  %v1436_v46 = vld [vmem:[#allocation2 + $0xd4] sm:$0xff] }
 0x177   : > { %v6108_v26 = vadd.f32 %v1219_v63, %v1099_v29  ;;  %881 = vmatmul.f32.gmra.mxu2 %v5970_v9  ;;  %1075 = vmatmul.f32.gmra.mxu3 %v954_v1  ;;  %v2591_v1 = vld [vmem:[#allocation7 + $0x370] sm:$0xff] }
 0x178   : > { %1516 = vmatmul.f32.vlgmr.msra.gmra.mxu1 %v1434_v11  ;;  %v1222_v6 = vpop.f32.mrf.mxu0  ;;  %v3134_v29 = vld [vmem:[#allocation7 + $0x2f0] sm:$0xff]  ;;  %2594 = vmatpush.msrb.mxu2 %v2591_v1  ;;  %v3133_v1 = vld [vmem:[#allocation7 + $0x2e8] sm:$0xff] }
 0x179   : > { %3137 = vmatpush.msrb.mxu3 %v3134_v29 }
 0x17a   : > { %v834_v3 = vpop.f32.mrf.mxu2  ;;  %v1028_v53 = vpop.f32.mrf.mxu3 }
 0x17b   : > { %v906_v0 = vadd.f32 %v834_v3, %v673_v39  ;;  %1269 = vmatmul.f32.gmra.mxu0 %v5970_v9  ;;  %v1920_v3 = vld [vmem:[%s7961_s3] sm:$0xff]  ;;  %3138 = vmatpush.msrb.mxu3 %v3133_v1 }
 0x17c   : > { %1954 = vperm.xlu0 %5257, %v1920_v3   ;;  %v2589_v1 = vld [vmem:[#allocation7 + $0x360] sm:$0xff] }
 0x17d   : > { %v1100_v20 = vadd.f32 %v1028_v53, %v906_v0  ;;  %v6114_v7 = vpop.f32.mrf.mxu1 }
 0x17f   : > { %v6116_v12 = vadd.f32 %v1222_v6, %v1100_v20  ;;  %884 = vmatmul.f32.gmra.mxu2 %v5970_v9  ;;  %1078 = vmatmul.f32.gmra.mxu3 %v955_v62  ;;  %v682_v20 = vadd.f32 %v6097_v59, %v5910_v35  ;;  %v1438_v35 = vld [vmem:[#allocation2 + $0xe4] sm:$0xff] }
 0x180   : > { %1519 = vmatmul.f32.gmra.mxu1 %v1435_v10  ;;  %v1225_v45 = vpop.f32.mrf.mxu0  ;;  %v2287_v10 = vld [vmem:[#allocation7 + $0xf0] sm:$0xff] }
 0x181   : > { %2432 = vmatpush.msrb.mxu1 %v2287_v10  ;;  %v2286_v10 = vld [vmem:[#allocation7 + $0xe8] sm:$0xff] }
 0x182   : > { %v837_v24 = vpop.f32.mrf.mxu2  ;;  %v1031_v54 = vpop.f32.mrf.mxu3 }
 0x183   : > { %v907_v63 = vadd.f32 %v837_v24, %v676_v25  ;;  %1272 = vmatmul.f32.gmra.mxu0 %v5970_v9  ;;  %v1410_v24 = vld [vmem:[#allocation2 + $0x4] sm:$0xff]  ;;  %2433 = vmatpush.msrb.mxu1 %v2286_v10 }
 0x185   : > { %v1101_v50 = vadd.f32 %v1031_v54, %v907_v63  ;;  %v6122_v23 = vpop.f32.mrf.mxu1  ;;  %v6141_v54 = vld [vmem:[#allocation2 + $0x184] sm:$0xff] }
 0x186   : > { %v1921_v63 = vld [vmem:[%s7961_s3 + $0x8] sm:$0xff] }
 0x187   : > { %v6124_v19 = vadd.f32 %v1225_v45, %v1101_v50  ;;  %887 = vmatmul.f32.gmra.mxu2 %v5970_v9  ;;  %1081 = vmatmul.f32.gmra.mxu3 %v956_v30  ;;  %v3105_v45 = vld [vmem:[#allocation7 + $0x1f0] sm:$0xff] }
 0x188   : > { %1522 = vmatmul.f32.gmra.mxu1 %v1436_v46  ;;  %v1228_v21 = vpop.f32.mrf.mxu0  ;;  %3250 = vmatpush.msrb.mxu0 %v3105_v45  ;;  %v3104_v45 = vld [vmem:[#allocation7 + $0x1e8] sm:$0xff] }
 0x189   : > { %1959 = vperm.xlu0 %5257, %v1921_v63   ;;  %v6165_v63 = vld [vmem:[#allocation2 + $0x194] sm:$0xff] }
 0x18a   : > { %v840_v11 = vpop.f32.mrf.mxu2  ;;  %v1034_v6 = vpop.f32.mrf.mxu3  ;;  %3251 = vmatpush.msrb.mxu0 %v3104_v45  ;;  %v2285_v45 = vld [vmem:[#allocation7 + $0xe0] sm:$0xff] }
 0x18b   : > { %v908_v39 = vadd.f32 %v840_v11, %v679_v55  ;;  %1275 = vmatmul.f32.gmra.mxu0 %v5970_v9  ;;  %v2590_v55 = vld [vmem:[#allocation7 + $0x368] sm:$0xff]  ;;  %2434 = vmatpush.msrb.mxu1 %v2285_v45 }
 0x18c   : > { %2595 = vmatpush.msrb.mxu2 %v2590_v55  ;;  %v691_v55 = vadd.f32 %v6122_v23, %v5946_v56  ;;  %v2255_v23 = vld [vmem:[#allocation2 + $0xe2] sm:$0xff]  ;;  %v1460_v45 = vld [vmem:[#allocation2 + $0x10c] sm:$0xff] }
 0x18d   : > { %v1102_v53 = vadd.f32 %v1034_v6, %v908_v39  ;;  %v6133_v0 = vpop.f32.mrf.mxu1  ;;  %v1411_v39 = vld [vmem:[#allocation2 + $0xc] sm:$0xff] }
 0x18e   : > { %2596 = vmatpush.msrb.mxu2 %v2589_v1  ;;  %v694_v10 = vadd.f32 %v6133_v0, %v5956_v61  ;;  %v2256_v0 = vld [vmem:[#allocation2 + $0xea] sm:$0xff] }
 0x18f   : > { %v6135_v41 = vadd.f32 %v1228_v21, %v1102_v53  ;;  %890 = vmatmul.f32.gmra.mxu2 %v5970_v9  ;;  %1084 = vmatmul.f32.gmra.mxu3 %v957_v15  ;;  %v685_v21 = vadd.f32 %v6106_v40, %v5922_v42  ;;  %v6153_v15 = vld [vmem:[#allocation2 + $0x18c] sm:$0xff] }
 0x190   : > { %1525 = vmatmul.f32.gmra.mxu1 %v1437_v27  ;;  %v1231_v62 = vpop.f32.mrf.mxu0  ;;  %v1439_v27 = vld [vmem:[#allocation2 + $0xec] sm:$0xff] }
 0x192   : > { %v843_v25 = vpop.f32.mrf.mxu2  ;;  %v1037_v58 = vpop.f32.mrf.mxu3 }
 0x193   : > { %v909_v2 = vadd.f32 %v843_v25, %v682_v20  ;;  %1278 = vmatmul.f32.gmra.mxu0 %v5970_v9  ;;  %v2252_v9 = vld [vmem:[#allocation2 + $0xca] sm:$0xff]  ;;  %v688_v20 = vadd.f32 %v6114_v7, %v5934_v48 }
 0x195   : > { %v1103_v30 = vadd.f32 %v1037_v58, %v909_v2  ;;  %v6146_v50 = vpop.f32.mrf.mxu1 }
 0x196   : > { %v697_v1 = vadd.f32 %v6146_v50, %v5966_v5 }
 0x197   : > { %v6148_v59 = vadd.f32 %v1231_v62, %v1103_v30  ;;  %1629 = vmatmul.f32.vlgmr.msra.gmra.mxu2 %v1410_v24  ;;  %1791 = vmatmul.f32.vlgmr.msra.gmra.mxu3 %v6141_v54  ;;  %v2253_v62 = vld [vmem:[#allocation2 + $0xd2] sm:$0xff] }
 0x198   : > { %1528 = vmatmul.f32.gmra.mxu1 %v1438_v35  ;;  %v1234_v46 = vpop.f32.mrf.mxu0  ;;  %v1412_v24 = vld [vmem:[#allocation2 + $0x14] sm:$0xff] }
 0x199   : > { %v1923_v30 = vld [vmem:[%s7961_s3 + $0x18] sm:$0xff] }
 0x19a   : > { %v846_v29 = vpop.f32.mrf.mxu2  ;;  %v1040_v11 = vpop.f32.mrf.mxu3  ;;  %1969 = vperm.xlu1 %5258, %v1923_v30   ;;  %v1414_v30 = vld [vmem:[#allocation2 + $0x24] sm:$0xff] }
 0x19b   : > { %v910_v6 = vadd.f32 %v846_v29, %v685_v21  ;;  %2334 = vmatmul.f32.vlgmr.msra.gmra.mxu0 %v2252_v9  ;;  %v1440_v9 = vld [vmem:[#allocation2 + $0xf4] sm:$0xff]  ;;  %v3132_v29 = vld [vmem:[#allocation7 + $0x2e0] sm:$0xff] }
 0x19c   : > { %v2254_v21 = vld [vmem:[#allocation2 + $0xda] sm:$0xff]  ;;  %3139 = vmatpush.msrb.mxu3 %v3132_v29 }
 0x19d   : > { %v1104_v3 = vadd.f32 %v1040_v11, %v910_v6  ;;  %v6158_v53 = vpop.f32.mrf.mxu1  ;;  %v2588_v29 = vld [vmem:[#allocation7 + $0x358] sm:$0xff] }
 0x19e   : > { %2597 = vmatpush.msrb.mxu2 %v2588_v29  ;;  %v1927_v29 = vld [vmem:[%s7961_s3 + $0x38] sm:$0xff] }
 0x19f   : > { %v6160_v42 = vadd.f32 %v1234_v46, %v1104_v3  ;;  %1632 = vmatmul.f32.gmra.mxu2 %v1411_v39  ;;  %1794 = vmatmul.f32.gmra.mxu3 %v6153_v15  ;;  %v6177_v3 = vld [vmem:[#allocation2 + $0x19c] sm:$0xff] }
 0x1a0   : > { %1531 = vmatmul.f32.gmra.mxu1 %v1439_v27  ;;  %v1237_v40 = vpop.f32.mrf.mxu0 }
 0x1a2   : > { %v849_v25 = vpop.f32.mrf.mxu2  ;;  %v1043_v58 = vpop.f32.mrf.mxu3  ;;  %1989 = vperm.xlu1 %5258, %v1927_v29   ;;  %v2283_v29 = vld [vmem:[#allocation7 + $0xd0] sm:$0xff] }
 0x1a3   : > { %v911_v2 = vadd.f32 %v849_v25, %v688_v20  ;;  %2337 = vmatmul.f32.gmra.mxu0 %v2253_v62  ;;  %v1441_v62 = vld [vmem:[#allocation2 + $0xfc] sm:$0xff] }
 0x1a4   : > { %v3103_v25 = vld [vmem:[#allocation7 + $0x1e0] sm:$0xff] }
 0x1a5   : > { %v1105_v35 = vadd.f32 %v1043_v58, %v911_v2  ;;  %v6170_v46 = vpop.f32.mrf.mxu1  ;;  %3252 = vmatpush.msrb.mxu0 %v3103_v25  ;;  %v2257_v25 = vld [vmem:[#allocation2 + $0xf2] sm:$0xff] }
 0x1a7   : > { %v6172_v48 = vadd.f32 %v1237_v40, %v1105_v35  ;;  %1635 = vmatmul.f32.gmra.mxu2 %v1412_v24  ;;  %1797 = vmatmul.f32.gmra.mxu3 %v6165_v63  ;;  %v6186_v35 = vld [vmem:[#allocation2 + $0x1a4] sm:$0xff] }
 0x1a8   : > { %1534 = vmatmul.f32.gmra.mxu1 %v1440_v9  ;;  %v1240_v7 = vpop.f32.mrf.mxu0 }
 0x1aa   : > { %v852_v11 = vpop.f32.mrf.mxu2  ;;  %v1046_v6 = vpop.f32.mrf.mxu3 }
 0x1ab   : > { %v912_v39 = vadd.f32 %v852_v11, %v691_v55  ;;  %2340 = vmatmul.f32.gmra.mxu0 %v2254_v21  ;;  %v1459_v21 = vld [vmem:[#allocation2 + $0x104] sm:$0xff]  ;;  %v3131_v11 = vld [vmem:[#allocation7 + $0x2d8] sm:$0xff] }
 0x1ac   : > { %3140 = vmatpush.msrb.mxu3 %v3131_v11  ;;  %v1461_v11 = vld [vmem:[#allocation2 + $0x114] sm:$0xff] }
 0x1ad   : > { %v1106_v27 = vadd.f32 %v1046_v6, %v912_v39  ;;  %v6179_v40 = vpop.f32.mrf.mxu1 }
 0x1af   : > { %v6181_v20 = vadd.f32 %v1240_v7, %v1106_v27  ;;  %1638 = vmatmul.f32.gmra.mxu2 %v1413_v47  ;;  %1800 = vmatmul.f32.gmra.mxu3 %v6177_v3  ;;  %v1415_v27 = vld [vmem:[#allocation2 + $0x2c] sm:$0xff] }
 0x1b0   : > { %1537 = vmatmul.f32.gmra.mxu1 %v1441_v62  ;;  %v1243_v56 = vpop.f32.mrf.mxu0  ;;  %v6195_v62 = vld [vmem:[#allocation2 + $0x1ac] sm:$0xff] }
 0x1b2   : > { %v855_v58 = vpop.f32.mrf.mxu2  ;;  %v1049_v2 = vpop.f32.mrf.mxu3 }
 0x1b3   : > { %v913_v24 = vadd.f32 %v855_v58, %v694_v10  ;;  %2343 = vmatmul.f32.gmra.mxu0 %v2255_v23  ;;  %v700_v58 = vadd.f32 %v6158_v53, %v5978_v14 }
 0x1b5   : > { %v1107_v9 = vadd.f32 %v1049_v2, %v913_v24  ;;  %v6188_v7 = vpop.f32.mrf.mxu1  ;;  %v2284_v2 = vld [vmem:[#allocation7 + $0xd8] sm:$0xff] }
 0x1b6   : > { %v3102_v24 = vld [vmem:[#allocation7 + $0x1d8] sm:$0xff]  ;;  %2435 = vmatpush.msrb.mxu1 %v2284_v2 }
 0x1b7   : > { %v6190_v55 = vadd.f32 %v1243_v56, %v1107_v9  ;;  %1641 = vmatmul.f32.gmra.mxu2 %v1414_v30  ;;  %1803 = vmatmul.f32.gmra.mxu3 %v6186_v35  ;;  %v1926_v56 = vld [vmem:[%s7961_s3 + $0x30] sm:$0xff]  ;;  %v1417_v2 = vld [vmem:[#allocation2 + $0x3c] sm:$0xff] }
 0x1b8   : > { %1540 = vmatmul.f32.gmra.mxu1 %v1459_v21  ;;  %v1246_v61 = vpop.f32.mrf.mxu0  ;;  %1984 = vperm.xlu0 %5257, %v1926_v56   ;;  %v2587_v56 = vld [vmem:[#allocation7 + $0x350] sm:$0xff] }
 0x1b9   : > { %3253 = vmatpush.msrb.mxu0 %v3102_v24  ;;  %2598 = vmatpush.msrb.mxu2 %v2587_v56  ;;  %v1925_v24 = vld [vmem:[%s7961_s3 + $0x28] sm:$0xff] }
 0x1ba   : > { %v858_v6 = vpop.f32.mrf.mxu2  ;;  %v1052_v39 = vpop.f32.mrf.mxu3  ;;  %2436 = vmatpush.msrb.mxu1 %v2283_v29  ;;  %v1418_v56 = vld [vmem:[#allocation2 + $0x44] sm:$0xff] }
 0x1bb   : > { %v914_v47 = vadd.f32 %v858_v6, %v697_v1  ;;  %2346 = vmatmul.f32.gmra.mxu0 %v2256_v0  ;;  %v1416_v0 = vld [vmem:[#allocation2 + $0x34] sm:$0xff]  ;;  %v1924_v1 = vld [vmem:[%s7961_s3 + $0x20] sm:$0xff] }
 0x1bc   : > { %1974 = vperm.xlu2 %5259, %v1924_v1   ;;  %v706_v1 = vadd.f32 %v6179_v40, %v5900_v28 }
 0x1bd   : > { %v1108_v23 = vadd.f32 %v1052_v39, %v914_v47  ;;  %v6200_v10 = vpop.f32.mrf.mxu1  ;;  %v2258_v47 = vld [vmem:[#allocation2 + $0xfa] sm:$0xff] }
 0x1bf   : > { %v6202_v5 = vadd.f32 %v1246_v61, %v1108_v23  ;;  %1644 = vmatmul.f32.gmra.mxu2 %v1415_v27  ;;  %1806 = vmatmul.f32.gmra.mxu3 %v6195_v62  ;;  %v6207_v61 = vld [vmem:[#allocation2 + $0x1b4] sm:$0xff]  ;;  %v703_v27 = vadd.f32 %v6170_v46, %v5990_v33 }
 0x1c0   : > { %1543 = vmatmul.f32.gmra.mxu1 %v1460_v45  ;;  %v1249_v50 = vpop.f32.mrf.mxu0  ;;  %v3130_v23 = vld [vmem:[#allocation7 + $0x2d0] sm:$0xff] }
 0x1c1   : > { %3141 = vmatpush.msrb.mxu3 %v3130_v23  ;;  %v1929_v23 = vld [vmem:[%s7961_s3 + $0x48] sm:$0xff] }
 0x1c2   : > { %v861_v30 = vpop.f32.mrf.mxu2  ;;  %v1055_v9 = vpop.f32.mrf.mxu3  ;;  %1999 = vperm.xlu0 %5257, %v1929_v23   ;;  %v712_v23 = vadd.f32 %v6200_v10, %v5924_v44 }
 0x1c3   : > { %v915_v21 = vadd.f32 %v861_v30, %v700_v58  ;;  %2349 = vmatmul.f32.gmra.mxu0 %v2257_v25 }
 0x1c4   : > { %1979 = vperm.xlu2 %5259, %v1925_v24   ;;  %v709_v24 = vadd.f32 %v6188_v7, %v5912_v37 }
 0x1c5   : > { %v1109_v14 = vadd.f32 %v1055_v9, %v915_v21  ;;  %v6215_v53 = vpop.f32.mrf.mxu1  ;;  %v1462_v21 = vld [vmem:[#allocation2 + $0x11c] sm:$0xff] }
 0x1c7   : > { %v6217_v6 = vadd.f32 %v1249_v50, %v1109_v14  ;;  %1647 = vmatmul.f32.gmra.mxu2 %v1416_v0  ;;  %1809 = vmatmul.f32.gmra.mxu3 %v6207_v61  ;;  %v6222_v50 = vld [vmem:[#allocation2 + $0x1bc] sm:$0xff]  ;;  %v3101_v14 = vld [vmem:[#allocation7 + $0x1d0] sm:$0xff] }
 0x1c8   : > { %1546 = vmatmul.f32.gmra.mxu1 %v1461_v11  ;;  %v1252_v39 = vpop.f32.mrf.mxu0  ;;  %v2259_v0 = vld [vmem:[#allocation2 + $0x102] sm:$0xff]  ;;  %3254 = vmatpush.msrb.mxu0 %v3101_v14  ;;  %v1419_v14 = vld [vmem:[#allocation2 + $0x4c] sm:$0xff] }
 0x1ca   : > { %v864_v45 = vpop.f32.mrf.mxu2  ;;  %v1058_v25 = vpop.f32.mrf.mxu3 }
 0x1cb   : > { %v916_v58 = vadd.f32 %v864_v45, %v703_v27  ;;  %2352 = vmatmul.f32.gmra.mxu0 %v2258_v47 }
 0x1cd   : > { %v1110_v30 = vadd.f32 %v1058_v25, %v916_v58  ;;  %v6227_v9 = vpop.f32.mrf.mxu1  ;;  %v1463_v58 = vld [vmem:[#allocation2 + $0x124] sm:$0xff] }
 0x1cf   : > { %v6229_v33 = vadd.f32 %v1252_v39, %v1110_v30  ;;  %1650 = vmatmul.f32.gmra.mxu2 %v1417_v2  ;;  %1812 = vmatmul.f32.gmra.mxu3 %v6222_v50  ;;  %v1734_v39 = vld [vmem:[#allocation2 + $0x1c4] sm:$0xff] }
 0x1d0   : > { %1549 = vmatmul.f32.gmra.mxu1 %v1462_v21  ;;  %v1255_v46 = vpop.f32.mrf.mxu0  ;;  %v2260_v2 = vld [vmem:[#allocation2 + $0x10a] sm:$0xff] }
 0x1d1   : > { %v2586_v30 = vld [vmem:[#allocation7 + $0x348] sm:$0xff] }
 0x1d2   : > { %v867_v11 = vpop.f32.mrf.mxu2  ;;  %v1061_v47 = vpop.f32.mrf.mxu3  ;;  %v3129_v21 = vld [vmem:[#allocation7 + $0x2c8] sm:$0xff]  ;;  %2599 = vmatpush.msrb.mxu2 %v2586_v30 }
 0x1d3   : > { %v917_v27 = vadd.f32 %v867_v11, %v706_v1  ;;  %2355 = vmatmul.f32.gmra.mxu0 %v2259_v0  ;;  %3142 = vmatpush.msrb.mxu3 %v3129_v21  ;;  %v1735_v11 = vld [vmem:[#allocation2 + $0x1cc] sm:$0xff]  ;;  %v1420_v21 = vld [vmem:[#allocation2 + $0x54] sm:$0xff] }
 0x1d5   : > { %v1111_v45 = vadd.f32 %v1061_v47, %v917_v27  ;;  %v6237_v25 = vpop.f32.mrf.mxu1 }
 0x1d7   : > { %v6239_v28 = vadd.f32 %v1255_v46, %v1111_v45  ;;  %1653 = vmatmul.f32.gmra.mxu2 %v1418_v56  ;;  %1815 = vmatmul.f32.gmra.mxu3 %v1734_v39  ;;  %v1930_v46 = vld [vmem:[%s7961_s3 + $0x50] sm:$0xff]  ;;  %v2282_v45 = vld [vmem:[#allocation7 + $0xc8] sm:$0xff] }
 0x1d8   : > { %1552 = vmatmul.f32.gmra.mxu1 %v1463_v58  ;;  %v1258_v40 = vpop.f32.mrf.mxu0  ;;  %v1464_v56 = vld [vmem:[#allocation2 + $0x12c] sm:$0xff]  ;;  %2004 = vperm.xlu1 %5258, %v1930_v46   ;;  %v715_v46 = vadd.f32 %v6215_v53, %v5936_v51 }
 0x1d9   : > { %v2261_v39 = vld [vmem:[#allocation2 + $0x112] sm:$0xff]  ;;  %v3100_v58 = vld [vmem:[#allocation7 + $0x1c8] sm:$0xff]  ;;  %2437 = vmatpush.msrb.mxu1 %v2282_v45 }
 0x1da   : > { %v870_v0 = vpop.f32.mrf.mxu2  ;;  %v1064_v1 = vpop.f32.mrf.mxu3  ;;  %3255 = vmatpush.msrb.mxu0 %v3100_v58  ;;  %v1421_v58 = vld [vmem:[#allocation2 + $0x5c] sm:$0xff] }
 0x1db   : > { %v918_v29 = vadd.f32 %v870_v0, %v709_v24  ;;  %2358 = vmatmul.f32.gmra.mxu0 %v2260_v2  ;;  %v1736_v0 = vld [vmem:[#allocation2 + $0x1d4] sm:$0xff] }
 0x1dd   : > { %v1112_v47 = vadd.f32 %v1064_v1, %v918_v29  ;;  %v6246_v27 = vpop.f32.mrf.mxu1 }
 0x1df   : > { %v6248_v37 = vadd.f32 %v1258_v40, %v1112_v47  ;;  %1656 = vmatmul.f32.gmra.mxu2 %v1419_v14  ;;  %1818 = vmatmul.f32.gmra.mxu3 %v1735_v11  ;;  %v1928_v40 = vld [vmem:[%s7961_s3 + $0x40] sm:$0xff]  ;;  %v1465_v14 = vld [vmem:[#allocation2 + $0x134] sm:$0xff] }
 0x1e0   : > { %1555 = vmatmul.f32.gmra.mxu1 %v1464_v56  ;;  %v1261_v7 = vpop.f32.mrf.mxu0  ;;  %1994 = vperm.xlu2 %5259, %v1928_v40   ;;  %v2262_v11 = vld [vmem:[#allocation2 + $0x11a] sm:$0xff]  ;;  %v718_v40 = vadd.f32 %v6227_v9, %v5948_v57 }
 0x1e1   : > { %v2585_v47 = vld [vmem:[#allocation7 + $0x340] sm:$0xff] }
 0x1e2   : > { %v873_v2 = vpop.f32.mrf.mxu2  ;;  %v1067_v24 = vpop.f32.mrf.mxu3  ;;  %v3128_v56 = vld [vmem:[#allocation7 + $0x2c0] sm:$0xff]  ;;  %2600 = vmatpush.msrb.mxu2 %v2585_v47 }
 0x1e3   : > { %v919_v30 = vadd.f32 %v873_v2, %v712_v23  ;;  %2361 = vmatmul.f32.gmra.mxu0 %v2261_v39  ;;  %3143 = vmatpush.msrb.mxu3 %v3128_v56  ;;  %v1737_v2 = vld [vmem:[#allocation2 + $0x1dc] sm:$0xff]  ;;  %v1422_v56 = vld [vmem:[#allocation2 + $0x64] sm:$0xff] }
 0x1e5   : > { %v1113_v1 = vadd.f32 %v1067_v24, %v919_v30  ;;  %v6255_v29 = vpop.f32.mrf.mxu1 }
 0x1e7   : > { %v6257_v44 = vadd.f32 %v1261_v7, %v1113_v1  ;;  %1659 = vmatmul.f32.gmra.mxu2 %v1420_v21  ;;  %1821 = vmatmul.f32.gmra.mxu3 %v1736_v0  ;;  %v1932_v7 = vld [vmem:[%s7961_s3 + $0x60] sm:$0xff] }
 0x1e8   : > { %1558 = vmatmul.f32.gmra.mxu1 %v1465_v14  ;;  %v1264_v10 = vpop.f32.mrf.mxu0  ;;  %v1466_v21 = vld [vmem:[#allocation2 + $0x13c] sm:$0xff]  ;;  %2014 = vperm.xlu0 %5257, %v1932_v7   ;;  %v721_v7 = vadd.f32 %v6237_v25, %v5958_v49 }
 0x1e9   : > { %v2263_v0 = vld [vmem:[#allocation2 + $0x122] sm:$0xff]  ;;  %v2280_v49 = vld [vmem:[#allocation7 + $0xb8] sm:$0xff] }
 0x1ea   : > { %v876_v39 = vpop.f32.mrf.mxu2  ;;  %v1070_v23 = vpop.f32.mrf.mxu3  ;;  %v2281_v1 = vld [vmem:[#allocation7 + $0xc0] sm:$0xff] }
 0x1eb   : > { %v920_v45 = vadd.f32 %v876_v39, %v715_v46  ;;  %2364 = vmatmul.f32.gmra.mxu0 %v2262_v11  ;;  %v3099_v14 = vld [vmem:[#allocation7 + $0x1c0] sm:$0xff]  ;;  %2438 = vmatpush.msrb.mxu1 %v2281_v1 }
 0x1ec   : > { %3256 = vmatpush.msrb.mxu0 %v3099_v14  ;;  %v1738_v39 = vld [vmem:[#allocation2 + $0x1e4] sm:$0xff]  ;;  %v1739_v14 = vld [vmem:[#allocation2 + $0x1ec] sm:$0xff] }
 0x1ed   : > { %v1114_v24 = vadd.f32 %v1070_v23, %v920_v45  ;;  %v6264_v30 = vpop.f32.mrf.mxu1  ;;  %2439 = vmatpush.msrb.mxu1 %v2280_v49  ;;  %v3126_v49 = vld [vmem:[#allocation7 + $0x2b0] sm:$0xff] }
 0x1ef   : > { %v6266_v51 = vadd.f32 %v1264_v10, %v1114_v24  ;;  %1662 = vmatmul.f32.gmra.mxu2 %v1421_v58  ;;  %1824 = vmatmul.f32.gmra.mxu3 %v1737_v2  ;;  %v1933_v10 = vld [vmem:[%s7961_s3 + $0x68] sm:$0xff]  ;;  %v2584_v24 = vld [vmem:[#allocation7 + $0x338] sm:$0xff] }
 0x1f0   : > { %1561 = vmatmul.f32.gmra.mxu1 %v1466_v21  ;;  %v1267_v53 = vpop.f32.mrf.mxu0  ;;  %v1467_v58 = vld [vmem:[#allocation2 + $0x144] sm:$0xff]  ;;  %2019 = vperm.xlu1 %5258, %v1933_v10   ;;  %v3127_v21 = vld [vmem:[#allocation7 + $0x2b8] sm:$0xff] }
 0x1f1   : > { %v6277_v2 = vld [vmem:[#allocation2 + $0x12a] sm:$0xff]  ;;  %2601 = vmatpush.msrb.mxu2 %v2584_v24  ;;  %3144 = vmatpush.msrb.mxu3 %v3127_v21  ;;  %v6289_v10 = vld [vmem:[#allocation2 + $0x132] sm:$0xff] }
 0x1f2   : > { %v879_v11 = vpop.f32.mrf.mxu2  ;;  %v1073_v46 = vpop.f32.mrf.mxu3 }
 0x1f3   : > { %v921_v47 = vadd.f32 %v879_v11, %v718_v40  ;;  %2367 = vmatmul.f32.gmra.mxu0 %v2263_v0  ;;  %v1931_v11 = vld [vmem:[%s7961_s3 + $0x58] sm:$0xff]  ;;  %3145 = vmatpush.msrb.mxu3 %v3126_v49 }
 0x1f4   : > { %2009 = vperm.xlu2 %5259, %v1931_v11  }
 0x1f5   : > { %v1115_v23 = vadd.f32 %v1073_v46, %v921_v47  ;;  %v6273_v45 = vpop.f32.mrf.mxu1 }
 0x1f7   : > { %v6275_v57 = vadd.f32 %v1267_v53, %v1115_v23  ;;  %1665 = vmatmul.f32.gmra.mxu2 %v1422_v56  ;;  %1827 = vmatmul.f32.gmra.mxu3 %v1738_v39  ;;  %v1423_v53 = vld [vmem:[#allocation2 + $0x6c] sm:$0xff]  ;;  %v724_v23 = vadd.f32 %v6246_v27, %v5968_v8  ;;  %v6301_v27 = vld [vmem:[#allocation2 + $0x13a] sm:$0xff] }
 0x1f8   : > { %1564 = vmatmul.f32.gmra.mxu1 %v1467_v58  ;;  %v1270_v9 = vpop.f32.mrf.mxu0  ;;  %v1468_v56 = vld [vmem:[#allocation2 + $0x14c] sm:$0xff]  ;;  %v3098_v58 = vld [vmem:[#allocation7 + $0x1b8] sm:$0xff] }
 0x1f9   : > { %3257 = vmatpush.msrb.mxu0 %v3098_v58 }
 0x1fa   : > { %v882_v0 = vpop.f32.mrf.mxu2  ;;  %v1076_v40 = vpop.f32.mrf.mxu3 }
 0x1fb   : > { %v922_v1 = vadd.f32 %v882_v0, %v721_v7  ;;  %2370 = vmatmul.f32.gmra.mxu0 %v6277_v2  ;;  %v1424_v0 = vld [vmem:[#allocation2 + $0x74] sm:$0xff] }
 0x1fd   : > { %v1116_v46 = vadd.f32 %v1076_v40, %v922_v1  ;;  %v6285_v47 = vpop.f32.mrf.mxu1  ;;  %v1740_v40 = vld [vmem:[#allocation2 + $0x1f4] sm:$0xff] }
 0x1ff   : > { %v6287_v25 = vadd.f32 %v1270_v9, %v1116_v46  ;;  %1668 = vmatmul.f32.gmra.mxu2 %v1423_v53  ;;  %1830 = vmatmul.f32.gmra.mxu3 %v1739_v14  ;;  %v1935_v9 = vld [vmem:[%s7961_s3 + $0x78] sm:$0xff]  ;;  %v727_v46 = vadd.f32 %v6255_v29, %v5980_v16  ;;  %v2279_v16 = vld [vmem:[#allocation7 + $0xb0] sm:$0xff] }
 0x200   : > { %1567 = vmatmul.f32.gmra.mxu1 %v1468_v56  ;;  %v1273_v39 = vpop.f32.mrf.mxu0  ;;  %v1469_v14 = vld [vmem:[#allocation2 + $0x154] sm:$0xff]  ;;  %2029 = vperm.xlu0 %5257, %v1935_v9   ;;  %v1470_v9 = vld [vmem:[#allocation2 + $0x15c] sm:$0xff] }
 0x201   : > { %v2583_v56 = vld [vmem:[#allocation7 + $0x330] sm:$0xff]  ;;  %2440 = vmatpush.msrb.mxu1 %v2279_v16  ;;  %v1955_v16 = vpop.permute.xlu0 %1954 }
 0x202   : > { %v885_v7 = vpop.f32.mrf.mxu2  ;;  %v1079_v24 = vpop.f32.mrf.mxu3  ;;  %2602 = vmatpush.msrb.mxu2 %v2583_v56  ;;  %v3097_v56 = vld [vmem:[#allocation7 + $0x1b0] sm:$0xff] }
 0x203   : > { %v923_v21 = vadd.f32 %v885_v7, %v724_v23  ;;  %2373 = vmatmul.f32.gmra.mxu0 %v6289_v10 }
 0x204   : > { %3258 = vmatpush.msrb.mxu0 %v3097_v56  ;;  %v3125_v56 = vld [vmem:[#allocation7 + $0x2a8] sm:$0xff] }
 0x205   : > { %v1117_v1 = vadd.f32 %v1079_v24, %v923_v21  ;;  %v6297_v53 = vpop.f32.mrf.mxu1  ;;  %v1741_v24 = vld [vmem:[#allocation2 + $0x1fc] sm:$0xff]  ;;  %3146 = vmatpush.msrb.mxu3 %v3125_v56 }
 0x206   : > { %v1936_v21 = vld [vmem:[%s7961_s3 + $0x80] sm:$0xff] }
 0x207   : > { %v6299_v11 = vadd.f32 %v1273_v39, %v1117_v1  ;;  %1671 = vmatmul.f32.gmra.mxu2 %v1424_v0  ;;  %1833 = vmatmul.f32.gmra.mxu3 %v1740_v40  ;;  %v1425_v39 = vld [vmem:[#allocation2 + $0x7c] sm:$0xff] }
 0x208   : > { %1570 = vmatmul.f32.gmra.mxu1 %v1469_v14  ;;  %v1276_v8 = vpop.f32.mrf.mxu0  ;;  %2034 = vperm.xlu1 %5258, %v1936_v21   ;;  %v6313_v14 = vld [vmem:[#allocation2 + $0x142] sm:$0xff] }
 0x209   : > { %7979 = vst [vmem:[#allocation15_spill] sm:$0xff] %v6299_v11  ;;  %v1742_v21 = vld [vmem:[#allocation2 + $0x204] sm:$0xff] }
 0x20a   : > { %v888_v23 = vpop.f32.mrf.mxu2  ;;  %v1082_v58 = vpop.f32.mrf.mxu3 }
 0x20b   : > { %v924_v7 = vadd.f32 %v888_v23, %v727_v46  ;;  %2376 = vmatmul.f32.gmra.mxu0 %v6301_v27  ;;  %v730_v46 = vadd.f32 %v6264_v30, %v5992_v38  ;;  %v6327_v30 = vld [vmem:[#allocation2 + $0x14a] sm:$0xff] }
 0x20d   : > { %v1118_v0 = vadd.f32 %v1082_v58, %v924_v7  ;;  %v6309_v40 = vpop.f32.mrf.mxu1  ;;  %v1426_v7 = vld [vmem:[#allocation2 + $0x84] sm:$0xff] }
 0x20f   : > { %v6311_v29 = vadd.f32 %v1276_v8, %v1118_v0  ;;  %1674 = vmatmul.f32.gmra.mxu2 %v1425_v39  ;;  %1836 = vmatmul.f32.gmra.mxu3 %v1741_v24  ;;  %v1934_v8 = vld [vmem:[%s7961_s3 + $0x70] sm:$0xff]  ;;  %v1471_v0 = vld [vmem:[#allocation2 + $0x164] sm:$0xff] }
 0x210   : > { %1573 = vmatmul.f32.gmra.mxu1 %v1470_v9  ;;  %v1279_v1 = vpop.f32.mrf.mxu0  ;;  %2024 = vperm.xlu2 %5259, %v1934_v8  }
 0x211   : > { %7980 = vst [vmem:[#allocation16_spill] sm:$0xff] %v6311_v29 }
 0x212   : > { %v891_v49 = vpop.f32.mrf.mxu2  ;;  %v1085_v23 = vpop.f32.mrf.mxu3 }
 0x213   : > { %v925_v58 = vadd.f32 %v891_v49, %v730_v46  ;;  %2379 = vmatmul.f32.gmra.mxu0 %v6313_v14  ;;  %v2582_v46 = vld [vmem:[#allocation7 + $0x328] sm:$0xff] }
 0x214   : > { %2603 = vmatpush.msrb.mxu2 %v2582_v46 }
 0x215   : > { %v1119_v39 = vadd.f32 %v1085_v23, %v925_v58  ;;  %v6321_v24 = vpop.f32.mrf.mxu1  ;;  %v6329_v23 = vld [vmem:[#allocation9] ss:$0 sm:$0xff] }
 0x216   : > { %v1346_v46 = vadd.f32 %v6329_v23, %v6004_v32  ;;  %v1428_v32 = vld [vmem:[#allocation2 + $0x94] sm:$0xff] }
 0x217   : > { %v6323_v9 = vadd.f32 %v1279_v1, %v1119_v39  ;;  %1677 = vmatmul.f32.gmra.mxu2 %v1426_v7  ;;  %1839 = vmatmul.f32.gmra.mxu3 %v1742_v21  ;;  %v1427_v1 = vld [vmem:[#allocation2 + $0x8c] sm:$0xff] }
 0x218   : > { %1576 = vmatmul.f32.gmra.mxu1 %v1471_v0  ;;  %v6325_v38 = vpop.f32.mrf.mxu0  ;;  %v1743_v7 = vld [vmem:[#allocation2 + $0x20c] sm:$0xff] }
 0x219   : > { %7981 = vst [vmem:[#allocation17_spill] sm:$0xff] %v6323_v9  ;;  %v1938_v21 = vld [vmem:[%s7961_s3 + $0x90] sm:$0xff] }
 0x21a   : > { %7982 = vst [vmem:[#allocation18_spill] sm:$0xff] %v6325_v38  ;;  %v1630_v49 = vpop.f32.mrf.mxu2  ;;  %v1792_v34 = vpop.f32.mrf.mxu3  ;;  %v1472_v0 = vld [vmem:[#allocation2 + $0x16c] sm:$0xff]  ;;  %2044 = vperm.xlu0 %5257, %v1938_v21  }
 0x21b   : > { %v1631_v58 = vadd.f32 %v1630_v49, %v6273_v45  ;;  %2382 = vmatmul.f32.gmra.mxu0 %v6327_v30  ;;  %v2278_v38 = vld [vmem:[#allocation7 + $0xa8] sm:$0xff]  ;;  %v6342_v49 = vld [vmem:[#allocation2 + $0x152] sm:$0xff] }
 0x21c   : > { %2441 = vmatpush.msrb.mxu1 %v2278_v38  ;;  %v1960_v38 = vpop.permute.xlu0 %1959 }
 0x21d   : > { %v1888_v8 = vadd.f32 %v1792_v34, %v1631_v58  ;;  %v6336_v39 = vpop.f32.mrf.mxu1  ;;  %v3096_v34 = vld [vmem:[#allocation7 + $0x1a8] sm:$0xff] }
 0x21e   : > { %3259 = vmatpush.msrb.mxu0 %v3096_v34  ;;  %v6357_v34 = vld [vmem:[#allocation2 + $0x15a] sm:$0xff] }
 0x21f   : > { %v2112_v56 = vmul.f32 %v1955_v16, %v1888_v8  ;;  %1680 = vmatmul.f32.gmra.mxu2 %v1427_v1  ;;  %1842 = vmatmul.f32.gmra.mxu3 %v1743_v7  ;;  %v1744_v16 = vld [vmem:[#allocation2 + $0x214] sm:$0xff] }
 0x220   : > { %1579 = vmatmul.f32.gmra.mxu1 %v1472_v0  ;;  %v6340_v45 = vpop.f32.mrf.mxu0  ;;  %v1939_v1 = vld [vmem:[%s7961_s3 + $0x98] sm:$0xff] }
 0x221   : > { %7983 = vst [vmem:[#allocation19_spill] sm:$0xff] %v6340_v45  ;;  %v6344_v9 = vadd.f32 %v2112_v56, %v1346_v46  ;;  %v1473_v0 = vld [vmem:[#allocation2 + $0x174] sm:$0xff]  ;;  %2049 = vperm.xlu1 %5258, %v1939_v1   ;;  %v1347_v46 = vadd.f32 %v6329_v23, %v6013_v52  ;;  %v1965_v45 = vpop.permute.xlu1 %1964  ;;  %v1429_v52 = vld [vmem:[#allocation2 + $0x9c] sm:$0xff] }
 0x222   : > { %v1633_v58 = vpop.f32.mrf.mxu2  ;;  %v1795_v29 = vpop.f32.mrf.mxu3 }
 0x223   : > { %7984 = vst [vmem:[#allocation20_spill] sm:$0xff] %v6344_v9  ;;  %v1634_v21 = vadd.f32 %v1633_v58, %v6285_v47  ;;  %2385 = vmatmul.f32.gmra.mxu0 %v6342_v49  ;;  %v2581_v9 = vld [vmem:[#allocation7 + $0x320] sm:$0xff] }
 0x224   : > { %2604 = vmatpush.msrb.mxu2 %v2581_v9  ;;  %v1348_v9 = vadd.f32 %v6329_v23, %v6022_v17  ;;  %v1430_v17 = vld [vmem:[#allocation2 + $0xa4] sm:$0xff] }
 0x225   : > { %v1889_v7 = vadd.f32 %v1795_v29, %v1634_v21  ;;  %v6351_v8 = vpop.f32.mrf.mxu1  ;;  %v3124_v29 = vld [vmem:[#allocation7 + $0x2a0] sm:$0xff] }
 0x226   : > { %3147 = vmatpush.msrb.mxu3 %v3124_v29  ;;  %v6372_v29 = vld [vmem:[#allocation2 + $0x162] sm:$0xff] }
 0x227   : > { %v2113_v56 = vmul.f32 %v1960_v38, %v1889_v7  ;;  %1683 = vmatmul.f32.gmra.mxu2 %v1428_v32  ;;  %1845 = vmatmul.f32.gmra.mxu3 %v1744_v16  ;;  %v1745_v38 = vld [vmem:[#allocation2 + $0x21c] sm:$0xff]  ;;  %v1937_v32 = vld [vmem:[%s7961_s3 + $0x88] sm:$0xff] }
 0x228   : > { %1582 = vmatmul.f32.gmra.mxu1 %v1473_v0  ;;  %v6355_v47 = vpop.f32.mrf.mxu0  ;;  %v1474_v0 = vld [vmem:[#allocation2 + $0x17c] sm:$0xff]  ;;  %2039 = vperm.xlu2 %5259, %v1937_v32  }
 0x229   : > { %7985 = vst [vmem:[#allocation21_spill] sm:$0xff] %v6355_v47  ;;  %v6359_v58 = vadd.f32 %v2113_v56, %v1347_v46  ;;  %v2277_v46 = vld [vmem:[#allocation7 + $0xa0] sm:$0xff] }
 0x22a   : > { %v1636_v21 = vpop.f32.mrf.mxu2  ;;  %v1798_v11 = vpop.f32.mrf.mxu3  ;;  %2442 = vmatpush.msrb.mxu1 %v2277_v46 }
 0x22b   : > { %v1637_v1 = vadd.f32 %v1636_v21, %v6297_v53  ;;  %2388 = vmatmul.f32.gmra.mxu0 %v6357_v34  ;;  %v1970_v46 = vpop.permute.xlu1 %1969 }
 0x22d   : > { %v1890_v16 = vadd.f32 %v1798_v11, %v1637_v1  ;;  %v6366_v7 = vpop.f32.mrf.mxu1  ;;  %v3095_v11 = vld [vmem:[#allocation7 + $0x1a0] sm:$0xff] }
 0x22e   : > { %3260 = vmatpush.msrb.mxu0 %v3095_v11 }
 0x22f   : > { %v2114_v56 = vmul.f32 %v1965_v45, %v1890_v16  ;;  %1686 = vmatmul.f32.gmra.mxu2 %v1429_v52  ;;  %1848 = vmatmul.f32.gmra.mxu3 %v1745_v38  ;;  %v1746_v45 = vld [vmem:[#allocation2 + $0x224] sm:$0xff] }
 0x230   : > { %1585 = vmatmul.f32.gmra.mxu1 %v1474_v0  ;;  %v6370_v53 = vpop.f32.mrf.mxu0  ;;  %v1941_v52 = vld [vmem:[%s7961_s3 + $0xa8] sm:$0xff]  ;;  %v1349_v0 = vadd.f32 %v6329_v23, %v6032_v18 }
 0x231   : > { %7986 = vst [vmem:[#allocation22_spill] sm:$0xff] %v6370_v53  ;;  %v6374_v21 = vadd.f32 %v2114_v56, %v1348_v9  ;;  %2059 = vperm.xlu0 %5257, %v1941_v52   ;;  %v6388_v56 = vld [vmem:[#allocation2 + $0x16a] sm:$0xff]  ;;  %v2580_v53 = vld [vmem:[#allocation7 + $0x318] sm:$0xff] }
 0x232   : > { %v1639_v1 = vpop.f32.mrf.mxu2  ;;  %v1801_v47 = vpop.f32.mrf.mxu3  ;;  %2605 = vmatpush.msrb.mxu2 %v2580_v53  ;;  %v1350_v53 = vadd.f32 %v6329_v23, %v6042_v13 }
 0x233   : > { %7987 = vst [vmem:[#allocation23_spill] sm:$0xff] %v6374_v21  ;;  %v1640_v32 = vadd.f32 %v1639_v1, %v6309_v40  ;;  %2391 = vmatmul.f32.gmra.mxu0 %v6372_v29  ;;  %v1975_v1 = vpop.permute.xlu2 %1974 }
 0x235   : > { %v1891_v38 = vadd.f32 %v1801_v47, %v1640_v32  ;;  %v6381_v16 = vpop.f32.mrf.mxu1  ;;  %v3123_v47 = vld [vmem:[#allocation7 + $0x298] sm:$0xff] }
 0x236   : > { %3148 = vmatpush.msrb.mxu3 %v3123_v47 }
 0x237   : > { %v2115_v9 = vmul.f32 %v1970_v46, %v1891_v38  ;;  %1689 = vmatmul.f32.gmra.mxu2 %v1430_v17  ;;  %1851 = vmatmul.f32.gmra.mxu3 %v1746_v45  ;;  %v1431_v46 = vld [vmem:[#allocation2 + $0xac] sm:$0xff]  ;;  %v2276_v38 = vld [vmem:[#allocation7 + $0x98] sm:$0xff] }
 0x238   : > { %1588 = vmatmul.f32.gmra.mxu1 %v6141_v54  ;;  %v6386_v40 = vpop.f32.mrf.mxu0  ;;  %v1747_v17 = vld [vmem:[#allocation2 + $0x22c] sm:$0xff] }
 0x239   : > { %v6390_v11 = vadd.f32 %v2115_v9, %v1349_v0  ;;  %v1942_v54 = vld [vmem:[%s7961_s3 + $0xb0] sm:$0xff]  ;;  %2443 = vmatpush.msrb.mxu1 %v2276_v38  ;;  %v1351_v38 = vadd.f32 %v6329_v23, %v6052_v43  ;;  %v1985_v43 = vpop.permute.xlu0 %1984 }
 0x23a   : > { %v1642_v32 = vpop.f32.mrf.mxu2  ;;  %v1804_v21 = vpop.f32.mrf.mxu3  ;;  %2064 = vperm.xlu1 %5258, %v1942_v54   ;;  %v6404_v9 = vld [vmem:[#allocation2 + $0x172] sm:$0xff] }
 0x23b   : > { %v1643_v18 = vadd.f32 %v1642_v32, %v6321_v24  ;;  %2394 = vmatmul.f32.gmra.mxu0 %v6388_v56  ;;  %v1980_v13 = vpop.permute.xlu2 %1979 }
 0x23d   : > { %v1892_v45 = vadd.f32 %v1804_v21, %v1643_v18  ;;  %v6397_v52 = vpop.f32.mrf.mxu1  ;;  %v3094_v21 = vld [vmem:[#allocation7 + $0x198] sm:$0xff] }
 0x23e   : > { %3261 = vmatpush.msrb.mxu0 %v3094_v21 }
 0x23f   : > { %v2116_v0 = vmul.f32 %v1975_v1, %v1892_v45  ;;  %1692 = vmatmul.f32.gmra.mxu2 %v1431_v46  ;;  %1854 = vmatmul.f32.gmra.mxu3 %v1747_v17  ;;  %v1432_v1 = vld [vmem:[#allocation2 + $0xb4] sm:$0xff] }
 0x240   : > { %1591 = vmatmul.f32.gmra.mxu1 %v6153_v15  ;;  %v6402_v24 = vpop.f32.mrf.mxu0  ;;  %v1748_v46 = vld [vmem:[#allocation2 + $0x234] sm:$0xff]  ;;  %v1940_v15 = vld [vmem:[%s7961_s3 + $0xa0] sm:$0xff] }
 0x241   : > { %7988 = vst [vmem:[#allocation24_spill] sm:$0xff] %v6402_v24  ;;  %v6406_v47 = vadd.f32 %v2116_v0, %v1350_v53  ;;  %2054 = vperm.xlu2 %5259, %v1940_v15   ;;  %v6420_v0 = vld [vmem:[#allocation2 + $0x17a] sm:$0xff]  ;;  %v3122_v24 = vld [vmem:[#allocation7 + $0x290] sm:$0xff] }
 0x242   : > { %v1645_v32 = vpop.f32.mrf.mxu2  ;;  %v1807_v18 = vpop.f32.mrf.mxu3  ;;  %3149 = vmatpush.msrb.mxu3 %v3122_v24  ;;  %v1352_v24 = vadd.f32 %v6329_v23, %v6062_v60 }
 0x243   : > { %v1646_v54 = vadd.f32 %v1645_v32, %v6336_v39  ;;  %2397 = vmatmul.f32.gmra.mxu0 %v6404_v9  ;;  %v2579_v32 = vld [vmem:[#allocation7 + $0x310] sm:$0xff]  ;;  %v1990_v60 = vpop.permute.xlu1 %1989 }
 0x244   : > { %2606 = vmatpush.msrb.mxu2 %v2579_v32  ;;  %v6436_v32 = vld [vmem:[#allocation2 + $0x182] sm:$0xff] }
 0x245   : > { %v1893_v17 = vadd.f32 %v1807_v18, %v1646_v54  ;;  %v6413_v45 = vpop.f32.mrf.mxu1 }
 0x247   : > { %v2117_v53 = vmul.f32 %v1980_v13, %v1893_v17  ;;  %1695 = vmatmul.f32.gmra.mxu2 %v1432_v1  ;;  %1857 = vmatmul.f32.gmra.mxu3 %v1748_v46  ;;  %v1433_v13 = vld [vmem:[#allocation2 + $0xbc] sm:$0xff] }
 0x248   : > { %1594 = vmatmul.f32.gmra.mxu1 %v6165_v63  ;;  %v6418_v39 = vpop.f32.mrf.mxu0  ;;  %v1749_v1 = vld [vmem:[#allocation2 + $0x23c] sm:$0xff] }
 0x249   : > { %7989 = vst [vmem:[#allocation25_spill] sm:$0xff] %v6418_v39  ;;  %v6422_v21 = vadd.f32 %v2117_v53, %v1351_v38  ;;  %v1944_v63 = vld [vmem:[%s7961_s3 + $0xc0] sm:$0xff]  ;;  %v2275_v38 = vld [vmem:[#allocation7 + $0x90] sm:$0xff] }
 0x24a   : > { %v1648_v18 = vpop.f32.mrf.mxu2  ;;  %v1810_v54 = vpop.f32.mrf.mxu3  ;;  %2074 = vperm.xlu0 %5257, %v1944_v63   ;;  %2444 = vmatpush.msrb.mxu1 %v2275_v38  ;;  %v2273_v38 = vld [vmem:[#allocation7 + $0x80] sm:$0xff] }
 0x24b   : > { %v1649_v15 = vadd.f32 %v1648_v18, %v6351_v8  ;;  %2400 = vmatmul.f32.gmra.mxu0 %v6420_v0 }
 0x24d   : > { %v1894_v46 = vadd.f32 %v1810_v54, %v1649_v15  ;;  %v6429_v17 = vpop.f32.mrf.mxu1  ;;  %v3093_v54 = vld [vmem:[#allocation7 + $0x190] sm:$0xff] }
 0x24e   : > { %3262 = vmatpush.msrb.mxu0 %v3093_v54 }
 0x24f   : > { %v2118_v53 = vmul.f32 %v1985_v43, %v1894_v46  ;;  %1698 = vmatmul.f32.gmra.mxu2 %v1433_v13  ;;  %1860 = vmatmul.f32.gmra.mxu3 %v1749_v1  ;;  %v1750_v43 = vld [vmem:[#allocation2 + $0x244] sm:$0xff] }
 0x250   : > { %1597 = vmatmul.f32.gmra.mxu1 %v6177_v3  ;;  %v6434_v8 = vpop.f32.mrf.mxu0  ;;  %v1945_v3 = vld [vmem:[%s7961_s3 + $0xc8] sm:$0xff] }
 0x251   : > { %7990 = vst [vmem:[#allocation26_spill] sm:$0xff] %v6434_v8  ;;  %v6438_v18 = vadd.f32 %v2118_v53, %v1352_v24  ;;  %v2274_v13 = vld [vmem:[#allocation7 + $0x88] sm:$0xff]  ;;  %2079 = vperm.xlu1 %5258, %v1945_v3   ;;  %v1353_v24 = vadd.f32 %v6329_v23, %v6072_v31 }
 0x252   : > { %v1651_v15 = vpop.f32.mrf.mxu2  ;;  %v1813_v39 = vpop.f32.mrf.mxu3  ;;  %2445 = vmatpush.msrb.mxu1 %v2274_v13 }
 0x253   : > { %v1652_v63 = vadd.f32 %v1651_v15, %v6366_v7  ;;  %2403 = vmatmul.f32.gmra.mxu0 %v6436_v32  ;;  %v5271_v7 = vld [vmem:[#allocation2 + $0xc4] sm:$0xff] }
 0x254   : > { %v6452_v15 = vld [vmem:[#allocation2 + $0x18a] sm:$0xff]  ;;  %2446 = vmatpush.msrb.mxu1 %v2273_v38  ;;  %v1354_v38 = vadd.f32 %v6329_v23, %v6081_v22  ;;  %v2000_v22 = vpop.permute.xlu0 %1999 }
 0x255   : > { %v1895_v1 = vadd.f32 %v1813_v39, %v1652_v63  ;;  %v6445_v46 = vpop.f32.mrf.mxu1  ;;  %v2578_v39 = vld [vmem:[#allocation7 + $0x308] sm:$0xff] }
 0x256   : > { %v3121_v63 = vld [vmem:[#allocation7 + $0x288] sm:$0xff]  ;;  %2607 = vmatpush.msrb.mxu2 %v2578_v39  ;;  %v6468_v39 = vld [vmem:[#allocation2 + $0x192] sm:$0xff] }
 0x257   : > { %v2119_v53 = vmul.f32 %v1990_v60, %v1895_v1  ;;  %1701 = vmatmul.f32.gmra.mxu2 %v5271_v7  ;;  %1863 = vmatmul.f32.gmra.mxu3 %v1750_v43  ;;  %v1995_v60 = vpop.permute.xlu2 %1994  ;;  %v1751_v43 = vld [vmem:[#allocation2 + $0x24c] sm:$0xff] }
 0x258   : > { %1600 = vmatmul.f32.gmra.mxu1 %v6186_v35  ;;  %v6450_v54 = vpop.f32.mrf.mxu0  ;;  %3150 = vmatpush.msrb.mxu3 %v3121_v63  ;;  %v1943_v35 = vld [vmem:[%s7961_s3 + $0xb8] sm:$0xff]  ;;  %v5272_v7 = vld [vmem:[#allocation2 + $0xcc] sm:$0xff] }
 0x259   : > { %v6454_v8 = vadd.f32 %v2119_v53, %v1353_v24  ;;  %2069 = vperm.xlu2 %5259, %v1943_v35  }
 0x25a   : > { %v1654_v3 = vpop.f32.mrf.mxu2  ;;  %v1816_v13 = vpop.f32.mrf.mxu3 }
 0x25b   : > { %v1655_v31 = vadd.f32 %v1654_v3, %v6381_v16  ;;  %2406 = vmatmul.f32.gmra.mxu0 %v6452_v15  ;;  %v3092_v3 = vld [vmem:[#allocation7 + $0x188] sm:$0xff] }
 0x25c   : > { %3263 = vmatpush.msrb.mxu0 %v3092_v3  ;;  %v6484_v3 = vld [vmem:[#allocation2 + $0x19a] sm:$0xff] }
 0x25d   : > { %v1896_v1 = vadd.f32 %v1816_v13, %v1655_v31  ;;  %v6461_v24 = vpop.f32.mrf.mxu1 }
 0x25f   : > { %v2120_v53 = vmul.f32 %v1995_v60, %v1896_v1  ;;  %1704 = vmatmul.f32.gmra.mxu2 %v5272_v7  ;;  %1866 = vmatmul.f32.gmra.mxu3 %v1751_v43  ;;  %v1752_v60 = vld [vmem:[#allocation2 + $0x254] sm:$0xff] }
 0x260   : > { %1603 = vmatmul.f32.gmra.mxu1 %v6195_v62  ;;  %v6466_v16 = vpop.f32.mrf.mxu0  ;;  %v1947_v62 = vld [vmem:[%s7961_s3 + $0xd8] sm:$0xff] }
 0x261   : > { %7991 = vst [vmem:[#allocation27_spill] sm:$0xff] %v6466_v16  ;;  %v6470_v63 = vadd.f32 %v2120_v53, %v1354_v38  ;;  %2089 = vperm.xlu0 %5257, %v1947_v62   ;;  %v1355_v38 = vadd.f32 %v6329_v23, %v6090_v36  ;;  %v5273_v7 = vld [vmem:[#allocation2 + $0xd4] sm:$0xff]  ;;  %v2577_v16 = vld [vmem:[#allocation7 + $0x300] sm:$0xff] }
 0x262   : > { %v1657_v13 = vpop.f32.mrf.mxu2  ;;  %v1819_v31 = vpop.f32.mrf.mxu3  ;;  %2608 = vmatpush.msrb.mxu2 %v2577_v16  ;;  %v5274_v16 = vld [vmem:[#allocation2 + $0xdc] sm:$0xff] }
 0x263   : > { %7992 = vst [vmem:[#allocation28_spill] sm:$0xff] %v6470_v63  ;;  %v1658_v35 = vadd.f32 %v1657_v13, %v6397_v52  ;;  %2409 = vmatmul.f32.gmra.mxu0 %v6468_v39 }
 0x265   : > { %v1897_v43 = vadd.f32 %v1819_v31, %v1658_v35  ;;  %v6477_v1 = vpop.f32.mrf.mxu1  ;;  %v3120_v31 = vld [vmem:[#allocation7 + $0x280] sm:$0xff] }
 0x266   : > { %3151 = vmatpush.msrb.mxu3 %v3120_v31 }
 0x267   : > { %v2121_v53 = vmul.f32 %v2000_v22, %v1897_v43  ;;  %1707 = vmatmul.f32.gmra.mxu2 %v5273_v7  ;;  %1869 = vmatmul.f32.gmra.mxu3 %v1752_v60  ;;  %v2005_v22 = vpop.permute.xlu1 %2004  ;;  %v1753_v60 = vld [vmem:[#allocation2 + $0x25c] sm:$0xff] }
 0x268   : > { %1606 = vmatmul.f32.gmra.mxu1 %v6207_v61  ;;  %v6482_v52 = vpop.f32.mrf.mxu0  ;;  %v1948_v61 = vld [vmem:[%s7961_s3 + $0xe0] sm:$0xff] }
 0x269   : > { %7993 = vst [vmem:[#allocation29_spill] sm:$0xff] %v6482_v52  ;;  %v6486_v13 = vadd.f32 %v2121_v53, %v1355_v38  ;;  %2094 = vperm.xlu1 %5258, %v1948_v61   ;;  %v1356_v38 = vadd.f32 %v6329_v23, %v6099_v4  ;;  %v6500_v7 = vld [vmem:[#allocation2 + $0x1a2] sm:$0xff]  ;;  %v2010_v4 = vpop.permute.xlu2 %2009 }
 0x26a   : > { %v1660_v35 = vpop.f32.mrf.mxu2  ;;  %v1822_v63 = vpop.f32.mrf.mxu3 }
 0x26b   : > { %v1661_v36 = vadd.f32 %v1660_v35, %v6413_v45  ;;  %2412 = vmatmul.f32.gmra.mxu0 %v6484_v3  ;;  %v3091_v35 = vld [vmem:[#allocation7 + $0x180] sm:$0xff] }
 0x26c   : > { %3264 = vmatpush.msrb.mxu0 %v3091_v35  ;;  %v5275_v35 = vld [vmem:[#allocation2 + $0xe4] sm:$0xff] }
 0x26d   : > { %v1898_v62 = vadd.f32 %v1822_v63, %v1661_v36  ;;  %v6493_v43 = vpop.f32.mrf.mxu1 }
 0x26f   : > { %v2122_v53 = vmul.f32 %v2005_v22, %v1898_v62  ;;  %1710 = vmatmul.f32.gmra.mxu2 %v5274_v16  ;;  %1872 = vmatmul.f32.gmra.mxu3 %v1753_v60  ;;  %v1754_v22 = vld [vmem:[#allocation2 + $0x264] sm:$0xff] }
 0x270   : > { %1609 = vmatmul.f32.gmra.mxu1 %v6222_v50  ;;  %v6498_v45 = vpop.f32.mrf.mxu0  ;;  %v1946_v50 = vld [vmem:[%s7961_s3 + $0xd0] sm:$0xff] }
 0x271   : > { %7994 = vst [vmem:[#allocation30_spill] sm:$0xff] %v6498_v45  ;;  %v6502_v31 = vadd.f32 %v2122_v53, %v1356_v38  ;;  %v2240_v16 = vld [vmem:[#allocation2 + $0x6a] sm:$0xff]  ;;  %2084 = vperm.xlu2 %5259, %v1946_v50   ;;  %v1357_v38 = vadd.f32 %v6329_v23, %v6108_v26  ;;  %v2015_v26 = vpop.permute.xlu0 %2014 }
 0x272   : > { %v1663_v63 = vpop.f32.mrf.mxu2  ;;  %v1825_v36 = vpop.f32.mrf.mxu3 }
 0x273   : > { %7995 = vst [vmem:[#allocation31_spill] sm:$0xff] %v6502_v31  ;;  %v1664_v61 = vadd.f32 %v1663_v63, %v6429_v17  ;;  %2415 = vmatmul.f32.gmra.mxu0 %v6500_v7  ;;  %v6515_v63 = vld [vmem:[#allocation2 + $0x1aa] sm:$0xff]  ;;  %v3965_v31 = vld [vmem:[#allocation7 + $0x6f8] sm:$0xff] }
 0x274   : > { %3966 = vmatpush.msra.mxu2 %v3965_v31  ;;  %v1358_v31 = vadd.f32 %v6329_v23, %v6116_v12  ;;  %v2020_v12 = vpop.permute.xlu1 %2019 }
 0x275   : > { %v1899_v60 = vadd.f32 %v1825_v36, %v1664_v61  ;;  %v6509_v62 = vpop.f32.mrf.mxu1  ;;  %v3924_v36 = vld [vmem:[#allocation7 + $0x5f8] sm:$0xff] }
 0x276   : > { %4079 = vmatpush.msra.mxu3 %v3924_v36 }
 0x277   : > { %v2123_v53 = vmul.f32 %v2010_v4, %v1899_v60  ;;  %1713 = vmatmul.f32.gmra.mxu2 %v5275_v35  ;;  %1875 = vmatmul.f32.gmra.mxu3 %v1754_v22  ;;  %v1755_v4 = vld [vmem:[#allocation2 + $0x26c] sm:$0xff] }
 0x278   : > { %2447 = vmatmul.f32.vlgmr.msrb.gmra.mxu1 %v2240_v16  ;;  %v6513_v17 = vpop.f32.mrf.mxu0  ;;  %v1950_v22 = vld [vmem:[%s7961_s3 + $0xf0] sm:$0xff] }
 0x279   : > { %7996 = vst [vmem:[#allocation32_spill] sm:$0xff] %v6513_v17  ;;  %v6517_v45 = vadd.f32 %v2123_v53, %v1357_v38  ;;  %v2241_v38 = vld [vmem:[#allocation2 + $0x72] sm:$0xff]  ;;  %2104 = vperm.xlu0 %5257, %v1950_v22  }
 0x27a   : > { %v1666_v61 = vpop.f32.mrf.mxu2  ;;  %v1828_v52 = vpop.f32.mrf.mxu3  ;;  %v3410_v53 = vld [vmem:[#allocation7 + $0x478] sm:$0xff] }
 0x27b   : > { %7997 = vst [vmem:[#allocation33_spill] sm:$0xff] %v6517_v45  ;;  %v1667_v50 = vadd.f32 %v1666_v61, %v6445_v46  ;;  %2418 = vmatmul.f32.gmra.mxu0 %v6515_v63  ;;  %3411 = vmatpush.msra.mxu1 %v3410_v53  ;;  %v5276_v46 = vld [vmem:[#allocation2 + $0xec] sm:$0xff]  ;;  %v2242_v53 = vld [vmem:[#allocation2 + $0x7a] sm:$0xff] }
 0x27c   : > { %v6530_v61 = vld [vmem:[#allocation2 + $0x1b2] sm:$0xff] }
 0x27d   : > { %v1900_v60 = vadd.f32 %v1828_v52, %v1667_v50  ;;  %v6524_v16 = vpop.f32.mrf.mxu1  ;;  %v4240_v52 = vld [vmem:[#allocation7 + $0x878] sm:$0xff] }
 0x27e   : > { %4241 = vmatpush.msra.mxu0 %v4240_v52  ;;  %v6545_v52 = vld [vmem:[#allocation2 + $0x1ba] sm:$0xff] }
 0x27f   : > { %v2124_v35 = vmul.f32 %v2015_v26, %v1900_v60  ;;  %1716 = vmatmul.f32.gmra.mxu2 %v5276_v46  ;;  %1878 = vmatmul.f32.gmra.mxu3 %v1755_v4  ;;  %v1756_v26 = vld [vmem:[#allocation2 + $0x274] sm:$0xff] }
 0x280   : > { %2450 = vmatmul.f32.gmra.mxu1 %v2241_v38  ;;  %v6528_v36 = vpop.f32.mrf.mxu0  ;;  %v1951_v4 = vld [vmem:[%s7961_s3 + $0xf8] sm:$0xff] }
 0x281   : > { %7998 = vst [vmem:[#allocation34_spill] sm:$0xff] %v6528_v36  ;;  %v6532_v17 = vadd.f32 %v2124_v35, %v1358_v31  ;;  %2109 = vperm.xlu1 %5258, %v1951_v4   ;;  %v1359_v31 = vadd.f32 %v6329_v23, %v6124_v19  ;;  %v5277_v46 = vld [vmem:[#allocation2 + $0xf4] sm:$0xff]  ;;  %v2025_v19 = vpop.permute.xlu2 %2024 }
 0x282   : > { %v1669_v50 = vpop.f32.mrf.mxu2  ;;  %v1831_v45 = vpop.f32.mrf.mxu3  ;;  %v3964_v36 = vld [vmem:[#allocation7 + $0x6f0] sm:$0xff] }
 0x283   : > { %7999 = vst [vmem:[#allocation35_spill] sm:$0xff] %v6532_v17  ;;  %v1670_v22 = vadd.f32 %v1669_v50, %v6461_v24  ;;  %2421 = vmatmul.f32.gmra.mxu0 %v6530_v61  ;;  %3967 = vmatpush.msra.mxu2 %v3964_v36  ;;  %v1360_v36 = vadd.f32 %v6329_v23, %v6135_v41  ;;  %v5497_v41 = vmov 1  }
 0x284   : > { %5261 = vset.pattern.permute.xlu0 %v5497_v41 }
 0x285   : > { %v1901_v60 = vadd.f32 %v1831_v45, %v1670_v22  ;;  %v6539_v38 = vpop.f32.mrf.mxu1  ;;  %v3923_v45 = vld [vmem:[#allocation7 + $0x5f0] sm:$0xff] }
 0x286   : > { %4080 = vmatpush.msra.mxu3 %v3923_v45 }
 0x287   : > { %v2125_v35 = vmul.f32 %v2020_v12, %v1901_v60  ;;  %1719 = vmatmul.f32.gmra.mxu2 %v5277_v46  ;;  %1881 = vmatmul.f32.gmra.mxu3 %v1756_v26  ;;  %v1757_v12 = vld [vmem:[#allocation2 + $0x27c] sm:$0xff]  ;;  %v1949_v26 = vld [vmem:[%s7961_s3 + $0xe8] sm:$0xff] }
 0x288   : > { %2453 = vmatmul.f32.gmra.mxu1 %v2242_v53  ;;  %v6543_v24 = vpop.f32.mrf.mxu0  ;;  %2099 = vperm.xlu2 %5259, %v1949_v26  }
 0x289   : > { %8000 = vst [vmem:[#allocation36_spill] sm:$0xff] %v6543_v24  ;;  %v6547_v50 = vadd.f32 %v2125_v35, %v1359_v31  ;;  %v2243_v31 = vld [vmem:[#allocation2 + $0x82] sm:$0xff]  ;;  %v3409_v35 = vld [vmem:[#allocation7 + $0x470] sm:$0xff]  ;;  %5262 = vset.pattern.permute.xlu1 %v5497_v41 }
 0x28a   : > { %v1672_v22 = vpop.f32.mrf.mxu2  ;;  %v1834_v17 = vpop.f32.mrf.mxu3  ;;  %3412 = vmatpush.msra.mxu1 %v3409_v35 }
 0x28b   : > { %v1673_v4 = vadd.f32 %v1672_v22, %v6477_v1  ;;  %2424 = vmatmul.f32.gmra.mxu0 %v6545_v52  ;;  %v5278_v1 = vld [vmem:[#allocation2 + $0xfc] sm:$0xff] }
 0x28c   : > { %v6560_v22 = vld [vmem:[#allocation2 + $0x1c2] sm:$0xff] }
 0x28d   : > { %v1902_v60 = vadd.f32 %v1834_v17, %v1673_v4  ;;  %v6554_v53 = vpop.f32.mrf.mxu1  ;;  %v4239_v17 = vld [vmem:[#allocation7 + $0x870] sm:$0xff]  ;;  %v2739_v4 = vld [vmem:[%s7961_s3 + $0x8] sm:$0xff] }
 0x28e   : > { %4242 = vmatpush.msra.mxu0 %v4239_v17  ;;  %2777 = vperm.xlu0 %5261, %v2739_v4   ;;  %v3058_v4 = vld [vmem:[#allocation2 + $0x76] sm:$0xff] }
 0x28f   : > { %v2126_v46 = vmul.f32 %v2025_v19, %v1902_v60  ;;  %1722 = vmatmul.f32.gmra.mxu2 %v5278_v1  ;;  %1884 = vmatmul.f32.gmra.mxu3 %v1757_v12  ;;  %v2030_v12 = vpop.permute.xlu0 %2029  ;;  %v6569_v60 = vld [vmem:[#allocation2 + $0xd6] sm:$0xff]  ;;  %v1361_v1 = vadd.f32 %v6329_v23, %v6148_v59 }
 0x290   : > { %2456 = vmatmul.f32.gmra.mxu1 %v2243_v31  ;;  %v6558_v45 = vpop.f32.mrf.mxu0  ;;  %5260 = vset.pattern.permute.xlu2 %v5497_v41  ;;  %v6584_v41 = vld [vmem:[%s7961_s3 + $0x10] sm:$0xff] }
 0x291   : > { %8001 = vst [vmem:[#allocation37_spill] sm:$0xff] %v6558_v45  ;;  %v6562_v24 = vadd.f32 %v2126_v46, %v1360_v36  ;;  %v2244_v46 = vld [vmem:[#allocation2 + $0x8a] sm:$0xff]  ;;  %2782 = vperm.xlu1 %5262, %v6584_v41  }
 0x292   : > { %v1675_v26 = vpop.f32.mrf.mxu2  ;;  %v1837_v35 = vpop.f32.mrf.mxu3  ;;  %v3963_v45 = vld [vmem:[#allocation7 + $0x6e8] sm:$0xff] }
 0x293   : > { %8002 = vst [vmem:[#allocation38_spill] sm:$0xff] %v6562_v24  ;;  %v1676_v19 = vadd.f32 %v1675_v26, %v6493_v43  ;;  %2427 = vmatmul.f32.gmra.mxu0 %v6560_v22  ;;  %3968 = vmatpush.msra.mxu2 %v3963_v45  ;;  %v3059_v45 = vld [vmem:[#allocation2 + $0x7e] sm:$0xff] }
 0x295   : > { %v1903_v31 = vadd.f32 %v1837_v35, %v1676_v19  ;;  %v6571_v36 = vpop.f32.mrf.mxu1  ;;  %v3922_v35 = vld [vmem:[#allocation7 + $0x5e8] sm:$0xff] }
 0x296   : > { %4081 = vmatpush.msra.mxu3 %v3922_v35  ;;  %v4238_v35 = vld [vmem:[#allocation7 + $0x868] sm:$0xff] }
 0x297   : > { %v2127_v17 = vmul.f32 %v2030_v12, %v1903_v31  ;;  %2609 = vmatmul.f32.vlgmr.msrb.gmra.mxu2 %v6277_v2  ;;  %3152 = vmatmul.f32.vlgmr.msrb.gmra.mxu3 %v6569_v60  ;;  %v2035_v12 = vpop.permute.xlu1 %2034  ;;  %v6588_v31 = vld [vmem:[#allocation2 + $0xde] sm:$0xff] }
 0x298   : > { %2459 = vmatmul.f32.gmra.mxu1 %v2244_v46  ;;  %v6577_v43 = vpop.f32.mrf.mxu0  ;;  %4243 = vmatpush.msra.mxu0 %v4238_v35 }
 0x299   : > { %8003 = vst [vmem:[#allocation39_spill] sm:$0xff] %v6577_v43  ;;  %v6579_v26 = vadd.f32 %v2127_v17, %v1361_v1  ;;  %v2245_v17 = vld [vmem:[#allocation2 + $0x92] sm:$0xff]  ;;  %v3408_v43 = vld [vmem:[#allocation7 + $0x468] sm:$0xff] }
 0x29a   : > { %v1678_v19 = vpop.f32.mrf.mxu2  ;;  %v1840_v59 = vpop.f32.mrf.mxu3  ;;  %3413 = vmatpush.msra.mxu1 %v3408_v43 }
 0x29b   : > { %8004 = vst [vmem:[#allocation40_spill] sm:$0xff] %v6579_v26  ;;  %v1679_v2 = vadd.f32 %v1678_v19, %v6509_v62  ;;  %3265 = vmatmul.f32.vlgmr.msrb.gmra.mxu0 %v3058_v4  ;;  %v1362_v26 = vadd.f32 %v6329_v23, %v6160_v42  ;;  %v6603_v19 = vld [vmem:[%s7961_s3] sm:$0xff] }
 0x29c   : > { %2772 = vperm.xlu2 %5260, %v6603_v19  }
 0x29d   : > { %v1904_v46 = vadd.f32 %v1840_v59, %v1679_v2  ;;  %v6590_v1 = vpop.f32.mrf.mxu1  ;;  %v6607_v2 = vld [vmem:[#allocation2 + $0xe6] sm:$0xff] }
 0x29f   : > { %v2128_v24 = vmul.f32 %v2035_v12, %v1904_v46  ;;  %2612 = vmatmul.f32.gmra.mxu2 %v6289_v10  ;;  %3155 = vmatmul.f32.gmra.mxu3 %v6588_v31  ;;  %v2040_v10 = vpop.permute.xlu2 %2039  ;;  %v1363_v46 = vadd.f32 %v6329_v23, %v6172_v48 }
 0x2a0   : > { %2462 = vmatmul.f32.gmra.mxu1 %v2245_v17  ;;  %v6596_v62 = vpop.f32.mrf.mxu0 }
 0x2a1   : > { %8005 = vst [vmem:[#allocation41_spill] sm:$0xff] %v6596_v62  ;;  %v6598_v4 = vadd.f32 %v2128_v24, %v1362_v26  ;;  %v2246_v26 = vld [vmem:[#allocation2 + $0x9a] sm:$0xff] }
 0x2a2   : > { %v1681_v43 = vpop.f32.mrf.mxu2  ;;  %v1843_v59 = vpop.f32.mrf.mxu3  ;;  %v3921_v62 = vld [vmem:[#allocation7 + $0x5e0] sm:$0xff] }
 0x2a3   : > { %8006 = vst [vmem:[#allocation42_spill] sm:$0xff] %v6598_v4  ;;  %v1682_v42 = vadd.f32 %v1681_v43, %v6524_v16  ;;  %3268 = vmatmul.f32.gmra.mxu0 %v3059_v45  ;;  %v3060_v16 = vld [vmem:[#allocation2 + $0x86] sm:$0xff]  ;;  %4082 = vmatpush.msra.mxu3 %v3921_v62  ;;  %v3061_v62 = vld [vmem:[#allocation2 + $0x8e] sm:$0xff] }
 0x2a4   : > { %v3962_v43 = vld [vmem:[#allocation7 + $0x6e0] sm:$0xff] }
 0x2a5   : > { %v1905_v12 = vadd.f32 %v1843_v59, %v1682_v42  ;;  %v6609_v24 = vpop.f32.mrf.mxu1  ;;  %v6622_v59 = vld [vmem:[%s7961_s3 + $0x20] sm:$0xff]  ;;  %3969 = vmatpush.msra.mxu2 %v3962_v43 }
 0x2a6   : > { %2792 = vperm.xlu1 %5262, %v6622_v59   ;;  %v4237_v43 = vld [vmem:[#allocation7 + $0x860] sm:$0xff] }
 0x2a7   : > { %v2129_v17 = vmul.f32 %v2040_v10, %v1905_v12  ;;  %2615 = vmatmul.f32.gmra.mxu2 %v6301_v27  ;;  %3158 = vmatmul.f32.gmra.mxu3 %v6607_v2  ;;  %v2045_v10 = vpop.permute.xlu0 %2044  ;;  %v6626_v12 = vld [vmem:[#allocation2 + $0xee] sm:$0xff] }
 0x2a8   : > { %2465 = vmatmul.f32.gmra.mxu1 %v2246_v26  ;;  %v6615_v35 = vpop.f32.mrf.mxu0  ;;  %4244 = vmatpush.msra.mxu0 %v4237_v43  ;;  %v3920_v43 = vld [vmem:[#allocation7 + $0x5d8] sm:$0xff] }
 0x2a9   : > { %8007 = vst [vmem:[#allocation43_spill] sm:$0xff] %v6615_v35  ;;  %v6617_v45 = vadd.f32 %v2129_v17, %v1363_v46  ;;  %v2247_v17 = vld [vmem:[#allocation2 + $0xa2] sm:$0xff]  ;;  %4083 = vmatpush.msra.mxu3 %v3920_v43  ;;  %v1366_v43 = vadd.f32 %v6329_v23, %v6202_v5 }
 0x2aa   : > { %v1684_v42 = vpop.f32.mrf.mxu2  ;;  %v1846_v48 = vpop.f32.mrf.mxu3  ;;  %v3407_v35 = vld [vmem:[#allocation7 + $0x460] sm:$0xff] }
 0x2ab   : > { %8008 = vst [vmem:[#allocation44_spill] sm:$0xff] %v6617_v45  ;;  %v1685_v27 = vadd.f32 %v1684_v42, %v6539_v38  ;;  %3271 = vmatmul.f32.gmra.mxu0 %v3060_v16  ;;  %3414 = vmatpush.msra.mxu1 %v3407_v35  ;;  %v1364_v45 = vadd.f32 %v6329_v23, %v6181_v20  ;;  %v6639_v20 = vld [vmem:[#allocation2 + $0xf6] sm:$0xff] }
 0x2ad   : > { %v1906_v26 = vadd.f32 %v1846_v48, %v1685_v27  ;;  %v6628_v46 = vpop.f32.mrf.mxu1  ;;  %v2050_v27 = vpop.permute.xlu1 %2049 }
 0x2af   : > { %v2130_v4 = vmul.f32 %v2045_v10, %v1906_v26  ;;  %2618 = vmatmul.f32.gmra.mxu2 %v6313_v14  ;;  %3161 = vmatmul.f32.gmra.mxu3 %v6626_v12  ;;  %v2248_v26 = vld [vmem:[#allocation2 + $0xaa] sm:$0xff] }
 0x2b0   : > { %2468 = vmatmul.f32.gmra.mxu1 %v2247_v17  ;;  %v6634_v38 = vpop.f32.mrf.mxu0  ;;  %v1365_v17 = vadd.f32 %v6329_v23, %v6190_v55 }
 0x2b1   : > { %8009 = vst [vmem:[#allocation45_spill] sm:$0xff] %v6634_v38  ;;  %v6636_v16 = vadd.f32 %v2130_v4, %v1364_v45 }
 0x2b2   : > { %v1687_v42 = vpop.f32.mrf.mxu2  ;;  %v1849_v48 = vpop.f32.mrf.mxu3 }
 0x2b3   : > { %8010 = vst [vmem:[#allocation46_spill] sm:$0xff] %v6636_v16  ;;  %v1688_v35 = vadd.f32 %v1687_v42, %v6554_v53  ;;  %3274 = vmatmul.f32.gmra.mxu0 %v3061_v62  ;;  %v3062_v53 = vld [vmem:[#allocation2 + $0x96] sm:$0xff] }
 0x2b4   : > { %v3961_v62 = vld [vmem:[#allocation7 + $0x6d8] sm:$0xff] }
 0x2b5   : > { %v1907_v10 = vadd.f32 %v1849_v48, %v1688_v35  ;;  %v6641_v14 = vpop.f32.mrf.mxu1  ;;  %v6654_v42 = vld [vmem:[%s7961_s3 + $0x18] sm:$0xff]  ;;  %3970 = vmatpush.msra.mxu2 %v3961_v62 }
 0x2b6   : > { %2787 = vperm.xlu2 %5260, %v6654_v42   ;;  %v3406_v62 = vld [vmem:[#allocation7 + $0x458] sm:$0xff] }
 0x2b7   : > { %v2131_v38 = vmul.f32 %v2050_v27, %v1907_v10  ;;  %2621 = vmatmul.f32.gmra.mxu2 %v6327_v30  ;;  %3164 = vmatmul.f32.gmra.mxu3 %v6639_v20  ;;  %v6659_v30 = vld [vmem:[%s7961_s3 + $0x30] sm:$0xff]  ;;  %v6663_v27 = vld [vmem:[#allocation2 + $0xfe] sm:$0xff] }
 0x2b8   : > { %2471 = vmatmul.f32.gmra.mxu1 %v2248_v26  ;;  %v6647_v4 = vpop.f32.mrf.mxu0  ;;  %2802 = vperm.xlu0 %5261, %v6659_v30  }
 0x2b9   : > { %8011 = vst [vmem:[#allocation47_spill] sm:$0xff] %v6647_v4  ;;  %v6649_v45 = vadd.f32 %v2131_v38, %v1365_v17  ;;  %v2055_v38 = vpop.permute.xlu2 %2054  ;;  %v2249_v17 = vld [vmem:[#allocation2 + $0xb2] sm:$0xff]  ;;  %3415 = vmatpush.msra.mxu1 %v3406_v62 }
 0x2ba   : > { %v1690_v48 = vpop.f32.mrf.mxu2  ;;  %v1852_v55 = vpop.f32.mrf.mxu3 }
 0x2bb   : > { %8012 = vst [vmem:[#allocation48_spill] sm:$0xff] %v6649_v45  ;;  %v1691_v35 = vadd.f32 %v1690_v48, %v6571_v36  ;;  %3277 = vmatmul.f32.gmra.mxu0 %v3062_v53  ;;  %v3063_v53 = vld [vmem:[#allocation2 + $0x9e] sm:$0xff] }
 0x2bd   : > { %v1908_v10 = vadd.f32 %v1852_v55, %v1691_v35  ;;  %v6666_v26 = vpop.f32.mrf.mxu1  ;;  %v4236_v55 = vld [vmem:[#allocation7 + $0x858] sm:$0xff] }
 0x2be   : > { %v6679_v35 = vld [vmem:[%s7961_s3 + $0x38] sm:$0xff]  ;;  %4245 = vmatpush.msra.mxu0 %v4236_v55 }
 0x2bf   : > { %v2132_v4 = vmul.f32 %v2055_v38, %v1908_v10  ;;  %2624 = vmatmul.f32.gmra.mxu2 %v6342_v49  ;;  %3167 = vmatmul.f32.gmra.mxu3 %v6663_v27  ;;  %v2060_v49 = vpop.permute.xlu0 %2059  ;;  %v6683_v38 = vld [vmem:[#allocation2 + $0x106] sm:$0xff] }
 0x2c0   : > { %2474 = vmatmul.f32.gmra.mxu1 %v2249_v17  ;;  %v6672_v36 = vpop.f32.mrf.mxu0  ;;  %2807 = vperm.xlu1 %5262, %v6679_v35   ;;  %v2250_v17 = vld [vmem:[#allocation2 + $0xba] sm:$0xff] }
 0x2c1   : > { %8013 = vst [vmem:[#allocation49_spill] sm:$0xff] %v6672_v36  ;;  %v6674_v48 = vadd.f32 %v2132_v4, %v1366_v43  ;;  %v1367_v43 = vadd.f32 %v6329_v23, %v6217_v6 }
 0x2c2   : > { %v1693_v62 = vpop.f32.mrf.mxu2  ;;  %v1855_v45 = vpop.f32.mrf.mxu3 }
 0x2c3   : > { %8014 = vst [vmem:[#allocation50_spill] sm:$0xff] %v6674_v48  ;;  %v1694_v5 = vadd.f32 %v1693_v62, %v6590_v1  ;;  %3280 = vmatmul.f32.gmra.mxu0 %v3063_v53  ;;  %v3064_v1 = vld [vmem:[#allocation2 + $0xa6] sm:$0xff]  ;;  %v3960_v62 = vld [vmem:[#allocation7 + $0x6d0] sm:$0xff] }
 0x2c4   : > { %v3919_v48 = vld [vmem:[#allocation7 + $0x5d0] sm:$0xff]  ;;  %3971 = vmatpush.msra.mxu2 %v3960_v62 }
 0x2c5   : > { %v1909_v10 = vadd.f32 %v1855_v45, %v1694_v5  ;;  %v6685_v4 = vpop.f32.mrf.mxu1  ;;  %v6698_v45 = vld [vmem:[%s7961_s3 + $0x28] sm:$0xff]  ;;  %4084 = vmatpush.msra.mxu3 %v3919_v48 }
 0x2c6   : > { %2797 = vperm.xlu2 %5260, %v6698_v45  }
 0x2c7   : > { %v2133_v36 = vmul.f32 %v2060_v49, %v1909_v10  ;;  %2627 = vmatmul.f32.gmra.mxu2 %v6357_v34  ;;  %3170 = vmatmul.f32.gmra.mxu3 %v6683_v38  ;;  %v2065_v34 = vpop.permute.xlu1 %2064  ;;  %v6702_v49 = vld [vmem:[#allocation2 + $0x10e] sm:$0xff] }
 0x2c8   : > { %2477 = vmatmul.f32.gmra.mxu1 %v2250_v17  ;;  %v6691_v55 = vpop.f32.mrf.mxu0  ;;  %v2251_v17 = vld [vmem:[#allocation2 + $0xc2] sm:$0xff] }
 0x2c9   : > { %8015 = vst [vmem:[#allocation51_spill] sm:$0xff] %v6691_v55  ;;  %v6693_v53 = vadd.f32 %v2133_v36, %v1367_v43  ;;  %v3405_v43 = vld [vmem:[#allocation7 + $0x450] sm:$0xff]  ;;  %v6706_v55 = vld [vmem:[#allocation9] ss:$0 sm:$0xff] }
 0x2ca   : > { %v1696_v5 = vpop.f32.mrf.mxu2  ;;  %v1858_v6 = vpop.f32.mrf.mxu3  ;;  %3416 = vmatpush.msra.mxu1 %v3405_v43  ;;  %v1368_v62 = vadd.f32 %v6706_v55, %v6229_v33 }
 0x2cb   : > { %8016 = vst [vmem:[#allocation52_spill] sm:$0xff] %v6693_v53  ;;  %v1697_v23 = vadd.f32 %v1696_v5, %v6609_v24  ;;  %3283 = vmatmul.f32.gmra.mxu0 %v3064_v1  ;;  %v3065_v1 = vld [vmem:[#allocation2 + $0xae] sm:$0xff] }
 0x2cd   : > { %v1910_v36 = vadd.f32 %v1858_v6, %v1697_v23  ;;  %v6704_v10 = vpop.f32.mrf.mxu1  ;;  %v4235_v6 = vld [vmem:[#allocation7 + $0x850] sm:$0xff]  ;;  %v6719_v23 = vld [vmem:[%s7961_s3 + $0x48] sm:$0xff] }
 0x2ce   : > { %4246 = vmatpush.msra.mxu0 %v4235_v6  ;;  %2817 = vperm.xlu0 %5261, %v6719_v23   ;;  %v5280_v6 = vld [vmem:[#allocation2 + $0xca] sm:$0xff] }
 0x2cf   : > { %v2134_v48 = vmul.f32 %v2065_v34, %v1910_v36  ;;  %2630 = vmatmul.f32.gmra.mxu2 %v6372_v29  ;;  %3173 = vmatmul.f32.gmra.mxu3 %v6702_v49  ;;  %v2070_v29 = vpop.permute.xlu2 %2069  ;;  %v6723_v34 = vld [vmem:[#allocation2 + $0x116] sm:$0xff] }
 0x2d0   : > { %2480 = vmatmul.f32.gmra.mxu1 %v2251_v17  ;;  %v6712_v24 = vpop.f32.mrf.mxu0 }
 0x2d1   : > { %8017 = vst [vmem:[#allocation53_spill] sm:$0xff] %v6712_v24  ;;  %v6714_v5 = vadd.f32 %v2134_v48, %v1368_v62  ;;  %v1369_v62 = vadd.f32 %v6706_v55, %v6239_v28 }
 0x2d2   : > { %v1699_v43 = vpop.f32.mrf.mxu2  ;;  %v1861_v53 = vpop.f32.mrf.mxu3 }
 0x2d3   : > { %8018 = vst [vmem:[#allocation54_spill] sm:$0xff] %v6714_v5  ;;  %v1700_v33 = vadd.f32 %v1699_v43, %v6628_v46  ;;  %3286 = vmatmul.f32.gmra.mxu0 %v3065_v1  ;;  %v3066_v46 = vld [vmem:[#allocation2 + $0xb6] sm:$0xff]  ;;  %v3959_v43 = vld [vmem:[#allocation7 + $0x6c8] sm:$0xff] }
 0x2d4   : > { %v3918_v5 = vld [vmem:[#allocation7 + $0x5c8] sm:$0xff]  ;;  %3972 = vmatpush.msra.mxu2 %v3959_v43 }
 0x2d5   : > { %v1911_v36 = vadd.f32 %v1861_v53, %v1700_v33  ;;  %v6725_v17 = vpop.f32.mrf.mxu1  ;;  %v6738_v53 = vld [vmem:[%s7961_s3 + $0x50] sm:$0xff]  ;;  %4085 = vmatpush.msra.mxu3 %v3918_v5 }
 0x2d6   : > { %2822 = vperm.xlu1 %5262, %v6738_v53  }
 0x2d7   : > { %v2135_v48 = vmul.f32 %v2070_v29, %v1911_v36  ;;  %2633 = vmatmul.f32.gmra.mxu2 %v6388_v56  ;;  %3176 = vmatmul.f32.gmra.mxu3 %v6723_v34  ;;  %v2075_v29 = vpop.permute.xlu0 %2074  ;;  %v6742_v36 = vld [vmem:[#allocation2 + $0x11e] sm:$0xff] }
 0x2d8   : > { %2483 = vmatmul.f32.gmra.mxu1 %v5280_v6  ;;  %v6731_v24 = vpop.f32.mrf.mxu0  ;;  %v3404_v6 = vld [vmem:[#allocation7 + $0x448] sm:$0xff] }
 0x2d9   : > { %8019 = vst [vmem:[#allocation55_spill] sm:$0xff] %v6731_v24  ;;  %v6733_v1 = vadd.f32 %v2135_v48, %v1369_v62  ;;  %3417 = vmatpush.msra.mxu1 %v3404_v6  ;;  %v1370_v24 = vadd.f32 %v6706_v55, %v6248_v37 }
 0x2da   : > { %v1702_v28 = vpop.f32.mrf.mxu2  ;;  %v1864_v33 = vpop.f32.mrf.mxu3 }
 0x2db   : > { %8020 = vst [vmem:[#allocation56_spill] sm:$0xff] %v6733_v1  ;;  %v1703_v56 = vadd.f32 %v1702_v28, %v6641_v14  ;;  %3289 = vmatmul.f32.gmra.mxu0 %v3066_v46  ;;  %v5281_v14 = vld [vmem:[#allocation2 + $0xd2] sm:$0xff]  ;;  %v3067_v46 = vld [vmem:[#allocation2 + $0xbe] sm:$0xff]  ;;  %v4234_v28 = vld [vmem:[#allocation7 + $0x848] sm:$0xff] }
 0x2dc   : > { %4247 = vmatpush.msra.mxu0 %v4234_v28  ;;  %v5282_v28 = vld [vmem:[#allocation2 + $0xda] sm:$0xff] }
 0x2dd   : > { %v1912_v62 = vadd.f32 %v1864_v33, %v1703_v56  ;;  %v6744_v48 = vpop.f32.mrf.mxu1  ;;  %v6757_v33 = vld [vmem:[%s7961_s3 + $0x40] sm:$0xff] }
 0x2de   : > { %2812 = vperm.xlu2 %5260, %v6757_v33  }
 0x2df   : > { %v2136_v1 = vmul.f32 %v2075_v29, %v1912_v62  ;;  %2636 = vmatmul.f32.gmra.mxu2 %v6404_v9  ;;  %3179 = vmatmul.f32.gmra.mxu3 %v6742_v36  ;;  %v2080_v29 = vpop.permute.xlu1 %2079  ;;  %v6761_v62 = vld [vmem:[#allocation2 + $0x126] sm:$0xff] }
 0x2e0   : > { %2486 = vmatmul.f32.gmra.mxu1 %v5281_v14  ;;  %v6750_v5 = vpop.f32.mrf.mxu0 }
 0x2e1   : > { %8021 = vst [vmem:[#allocation57_spill] sm:$0xff] %v6750_v5  ;;  %v6752_v43 = vadd.f32 %v2136_v1, %v1370_v24  ;;  %v1371_v1 = vadd.f32 %v6706_v55, %v6257_v44 }
 0x2e2   : > { %v1705_v56 = vpop.f32.mrf.mxu2  ;;  %v1867_v37 = vpop.f32.mrf.mxu3 }
 0x2e3   : > { %8022 = vst [vmem:[#allocation58_spill] sm:$0xff] %v6752_v43  ;;  %v1706_v9 = vadd.f32 %v1705_v56, %v6666_v26  ;;  %3292 = vmatmul.f32.gmra.mxu0 %v3067_v46  ;;  %v3068_v26 = vld [vmem:[#allocation2 + $0xc6] sm:$0xff] }
 0x2e4   : > { %v3958_v56 = vld [vmem:[#allocation7 + $0x6c0] sm:$0xff] }
 0x2e5   : > { %v1913_v6 = vadd.f32 %v1867_v37, %v1706_v9  ;;  %v6763_v24 = vpop.f32.mrf.mxu1  ;;  %v3917_v43 = vld [vmem:[#allocation7 + $0x5c0] sm:$0xff]  ;;  %3973 = vmatpush.msra.mxu2 %v3958_v56 }
 0x2e6   : > { %v6776_v37 = vld [vmem:[%s7961_s3 + $0x60] sm:$0xff]  ;;  %4086 = vmatpush.msra.mxu3 %v3917_v43 }
 0x2e7   : > { %v2137_v14 = vmul.f32 %v2080_v29, %v1913_v6  ;;  %2639 = vmatmul.f32.gmra.mxu2 %v6420_v0  ;;  %3182 = vmatmul.f32.gmra.mxu3 %v6761_v62  ;;  %v2085_v29 = vpop.permute.xlu2 %2084  ;;  %v6780_v6 = vld [vmem:[#allocation2 + $0x12e] sm:$0xff] }
 0x2e8   : > { %2489 = vmatmul.f32.gmra.mxu1 %v5282_v28  ;;  %v6769_v5 = vpop.f32.mrf.mxu0  ;;  %2832 = vperm.xlu0 %5261, %v6776_v37   ;;  %v3403_v28 = vld [vmem:[#allocation7 + $0x440] sm:$0xff] }
 0x2e9   : > { %8023 = vst [vmem:[#allocation59_spill] sm:$0xff] %v6769_v5  ;;  %v6771_v46 = vadd.f32 %v2137_v14, %v1371_v1  ;;  %3418 = vmatpush.msra.mxu1 %v3403_v28  ;;  %v1372_v5 = vadd.f32 %v6706_v55, %v6266_v51 }
 0x2ea   : > { %v1708_v44 = vpop.f32.mrf.mxu2  ;;  %v1870_v9 = vpop.f32.mrf.mxu3 }
 0x2eb   : > { %8024 = vst [vmem:[#allocation60_spill] sm:$0xff] %v6771_v46  ;;  %v1709_v0 = vadd.f32 %v1708_v44, %v6685_v4  ;;  %3295 = vmatmul.f32.gmra.mxu0 %v3068_v26  ;;  %v5283_v4 = vld [vmem:[#allocation2 + $0xe2] sm:$0xff]  ;;  %v3069_v26 = vld [vmem:[#allocation2 + $0xce] sm:$0xff] }
 0x2ec   : > { %v4233_v44 = vld [vmem:[#allocation7 + $0x840] sm:$0xff] }
 0x2ed   : > { %v1914_v1 = vadd.f32 %v1870_v9, %v1709_v0  ;;  %v6782_v14 = vpop.f32.mrf.mxu1  ;;  %v6795_v9 = vld [vmem:[%s7961_s3 + $0x68] sm:$0xff]  ;;  %4248 = vmatpush.msra.mxu0 %v4233_v44 }
 0x2ee   : > { %2837 = vperm.xlu1 %5262, %v6795_v9   ;;  %v5284_v44 = vld [vmem:[#allocation2 + $0xea] sm:$0xff] }
 0x2ef   : > { %v2138_v46 = vmul.f32 %v2085_v29, %v1914_v1  ;;  %2642 = vmatmul.f32.gmra.mxu2 %v6436_v32  ;;  %3185 = vmatmul.f32.gmra.mxu3 %v6780_v6  ;;  %v2090_v29 = vpop.permute.xlu0 %2089  ;;  %v6799_v1 = vld [vmem:[#allocation2 + $0x136] sm:$0xff] }
 0x2f0   : > { %2492 = vmatmul.f32.gmra.mxu1 %v5283_v4  ;;  %v6788_v43 = vpop.f32.mrf.mxu0 }
 0x2f1   : > { %8025 = vst [vmem:[#allocation61_spill] sm:$0xff] %v6788_v43  ;;  %v6790_v56 = vadd.f32 %v2138_v46, %v1372_v5  ;;  %v1373_v46 = vadd.f32 %v6706_v55, %v6275_v57 }
 0x2f2   : > { %v1711_v0 = vpop.f32.mrf.mxu2  ;;  %v1873_v51 = vpop.f32.mrf.mxu3 }
 0x2f3   : > { %8026 = vst [vmem:[#allocation62_spill] sm:$0xff] %v6790_v56  ;;  %v1712_v32 = vadd.f32 %v1711_v0, %v6704_v10  ;;  %3298 = vmatmul.f32.gmra.mxu0 %v3069_v26  ;;  %v3957_v26 = vld [vmem:[#allocation7 + $0x6b8] sm:$0xff] }
 0x2f4   : > { %v3916_v0 = vld [vmem:[#allocation7 + $0x5b8] sm:$0xff]  ;;  %3974 = vmatpush.msra.mxu2 %v3957_v26 }
 0x2f5   : > { %v1915_v28 = vadd.f32 %v1873_v51, %v1712_v32  ;;  %v6801_v5 = vpop.f32.mrf.mxu1  ;;  %v6814_v51 = vld [vmem:[%s7961_s3 + $0x58] sm:$0xff]  ;;  %4087 = vmatpush.msra.mxu3 %v3916_v0 }
 0x2f6   : > { %2827 = vperm.xlu2 %5260, %v6814_v51   ;;  %v4232_v26 = vld [vmem:[#allocation7 + $0x838] sm:$0xff] }
 0x2f7   : > { %v2139_v4 = vmul.f32 %v2090_v29, %v1915_v28  ;;  %2645 = vmatmul.f32.gmra.mxu2 %v6452_v15  ;;  %3188 = vmatmul.f32.gmra.mxu3 %v6799_v1  ;;  %v3402_v29 = vld [vmem:[#allocation7 + $0x438] sm:$0xff]  ;;  %v2095_v28 = vpop.permute.xlu1 %2094 }
 0x2f8   : > { %2495 = vmatmul.f32.gmra.mxu1 %v5284_v44  ;;  %v6807_v43 = vpop.f32.mrf.mxu0  ;;  %v6832_v0 = vld [vmem:[%s7961_s3 + $0x78] sm:$0xff]  ;;  %4249 = vmatpush.msra.mxu0 %v4232_v26 }
 0x2f9   : > { %8027 = vst [vmem:[#allocation63_spill] sm:$0xff] %v6807_v43  ;;  %v6809_v10 = vadd.f32 %v2139_v4, %v1373_v46  ;;  %v6819_v46 = vld [vmem:[#allocation2 + $0x13e] sm:$0xff]  ;;  %3419 = vmatpush.msra.mxu1 %v3402_v29  ;;  %v1374_v43 = vadd.f32 %v6706_v55, %v6287_v25  ;;  %2847 = vperm.xlu0 %5261, %v6832_v0   ;;  %v6839_v29 = vld [vmem:[#allocation2 + $0x146] sm:$0xff] }
 0x2fa   : > { %v1714_v32 = vpop.f32.mrf.mxu2  ;;  %v1876_v57 = vpop.f32.mrf.mxu3 }
 0x2fb   : > { %8028 = vst [vmem:[#allocation64_spill] sm:$0xff] %v6809_v10  ;;  %v1715_v15 = vadd.f32 %v1714_v32, %v6725_v17  ;;  %3301 = vmatmul.f32.gmra.mxu0 %v6569_v60  ;;  %v5285_v17 = vld [vmem:[#allocation2 + $0xf2] sm:$0xff] }
 0x2fd   : > { %v1916_v4 = vadd.f32 %v1876_v57, %v1715_v15  ;;  %v6821_v44 = vpop.f32.mrf.mxu1  ;;  %v2100_v15 = vpop.permute.xlu2 %2099 }
 0x2ff   : > { %v2140_v10 = vmul.f32 %v2095_v28, %v1916_v4  ;;  %2648 = vmatmul.f32.gmra.mxu2 %v6468_v39  ;;  %3191 = vmatmul.f32.gmra.mxu3 %v6819_v46 }
 0x300   : > { %2498 = vmatmul.f32.gmra.mxu1 %v5285_v17  ;;  %v6827_v60 = vpop.f32.mrf.mxu0  ;;  %v8031_v17 = vld [vmem:[#allocation15_spill] sm:$0xff] }
 0x301   : > { %8029 = vst [vmem:[#allocation65_spill] sm:$0xff] %v6827_v60  ;;  %v6834_v32 = vadd.f32 %v2140_v10, %v1374_v43  ;;  %v1375_v60 = vadd.f32 %v6706_v55, %v8031_v17  ;;  %v5286_v10 = vld [vmem:[#allocation2 + $0xfa] sm:$0xff]  ;;  %v2105_v17 = vpop.permute.xlu0 %2104 }
 0x302   : > { %v1717_v25 = vpop.f32.mrf.mxu2  ;;  %v1879_v57 = vpop.f32.mrf.mxu3 }
 0x303   : > { %8030 = vst [vmem:[#allocation66_spill] sm:$0xff] %v6834_v32  ;;  %v1718_v39 = vadd.f32 %v1717_v25, %v6744_v48  ;;  %3304 = vmatmul.f32.gmra.mxu0 %v6588_v31  ;;  %v3956_v48 = vld [vmem:[#allocation7 + $0x6b0] sm:$0xff]  ;;  %v6852_v25 = vld [vmem:[%s7961_s3 + $0x80] sm:$0xff] }
 0x304   : > { %v3915_v31 = vld [vmem:[#allocation7 + $0x5b0] sm:$0xff]  ;;  %3975 = vmatpush.msra.mxu2 %v3956_v48  ;;  %2852 = vperm.xlu1 %5262, %v6852_v25  }
 0x305   : > { %v1917_v28 = vadd.f32 %v1879_v57, %v1718_v39  ;;  %v6841_v4 = vpop.f32.mrf.mxu1  ;;  %4088 = vmatpush.msra.mxu3 %v3915_v31  ;;  %v5287_v31 = vld [vmem:[#allocation2 + $0x102] sm:$0xff] }
 0x307   : > { %v2141_v43 = vmul.f32 %v2100_v15, %v1917_v28  ;;  %2651 = vmatmul.f32.gmra.mxu2 %v6484_v3  ;;  %3194 = vmatmul.f32.gmra.mxu3 %v6839_v29  ;;  %v3401_v28 = vld [vmem:[#allocation7 + $0x430] sm:$0xff] }
 0x308   : > { %2501 = vmatmul.f32.gmra.mxu1 %v5286_v10  ;;  %v6847_v26 = vpop.f32.mrf.mxu0  ;;  %v6859_v10 = vld [vmem:[#allocation2 + $0x14e] sm:$0xff] }
 0x309   : > { %8032 = vst [vmem:[#allocation15_spill] sm:$0xff] %v6847_v26  ;;  %v6854_v57 = vadd.f32 %v2141_v43, %v1375_v60  ;;  %3420 = vmatpush.msra.mxu1 %v3401_v28  ;;  %v8034_v60 = vld [vmem:[#allocation16_spill] sm:$0xff]  ;;  %v2110_v28 = vpop.permute.xlu1 %2109 }
 0x30a   : > { %v1720_v39 = vpop.f32.mrf.mxu2  ;;  %v1882_v15 = vpop.f32.mrf.mxu3  ;;  %v1376_v43 = vadd.f32 %v6706_v55, %v8034_v60 }
 0x30b   : > { %8033 = vst [vmem:[#allocation67_spill] sm:$0xff] %v6854_v57  ;;  %v1721_v3 = vadd.f32 %v1720_v39, %v6763_v24  ;;  %3307 = vmatmul.f32.gmra.mxu0 %v6607_v2  ;;  %v4231_v2 = vld [vmem:[#allocation7 + $0x830] sm:$0xff] }
 0x30c   : > { %v6872_v39 = vld [vmem:[%s7961_s3 + $0x70] sm:$0xff]  ;;  %4250 = vmatpush.msra.mxu0 %v4231_v2 }
 0x30d   : > { %v1918_v26 = vadd.f32 %v1882_v15, %v1721_v3  ;;  %v6861_v32 = vpop.f32.mrf.mxu1  ;;  %2842 = vperm.xlu2 %5260, %v6872_v39  }
 0x30f   : > { %v2142_v48 = vmul.f32 %v2105_v17, %v1918_v26  ;;  %2654 = vmatmul.f32.gmra.mxu2 %v6500_v7  ;;  %3197 = vmatmul.f32.gmra.mxu3 %v6859_v10  ;;  %v6879_v17 = vld [vmem:[#allocation2 + $0x156] sm:$0xff] }
 0x310   : > { %2504 = vmatmul.f32.gmra.mxu1 %v5287_v31  ;;  %v6867_v24 = vpop.f32.mrf.mxu0 }
 0x311   : > { %8035 = vst [vmem:[#allocation16_spill] sm:$0xff] %v6867_v24  ;;  %v6874_v15 = vadd.f32 %v2142_v48, %v1376_v43  ;;  %v8037_v24 = vld [vmem:[#allocation17_spill] sm:$0xff]  ;;  %v5288_v48 = vld [vmem:[#allocation2 + $0x10a] sm:$0xff] }
 0x312   : > { %v1723_v26 = vpop.f32.mrf.mxu2  ;;  %v1885_v3 = vpop.f32.mrf.mxu3  ;;  %v1377_v57 = vadd.f32 %v6706_v55, %v8037_v24 }
 0x313   : > { %8036 = vst [vmem:[#allocation68_spill] sm:$0xff] %v6874_v15  ;;  %v1724_v7 = vadd.f32 %v1723_v26, %v6782_v14  ;;  %3310 = vmatmul.f32.gmra.mxu0 %v6626_v12  ;;  %v3955_v14 = vld [vmem:[#allocation7 + $0x6a8] sm:$0xff]  ;;  %v6890_v12 = vld [vmem:[%s7961_s3 + $0x98] sm:$0xff]  ;;  %v2773_v55 = vpop.permute.xlu2 %2772 }
 0x314   : > { %v3914_v26 = vld [vmem:[#allocation7 + $0x5a8] sm:$0xff]  ;;  %3976 = vmatpush.msra.mxu2 %v3955_v14  ;;  %2867 = vperm.xlu1 %5262, %v6890_v12  }
 0x315   : > { %v1919_v60 = vadd.f32 %v1885_v3, %v1724_v7  ;;  %v6881_v31 = vpop.f32.mrf.mxu1  ;;  %v8038_v3 = vld [vmem:[#allocation18_spill] sm:$0xff]  ;;  %4089 = vmatpush.msra.mxu3 %v3914_v26  ;;  %v8041_v26 = vld [vmem:[#allocation20_spill] sm:$0xff] }
 0x316   : > { %v2449_v7 = vadd.f32 %v6801_v5, %v8038_v3  ;;  %v3400_v5 = vld [vmem:[#allocation7 + $0x428] sm:$0xff] }
 0x317   : > { %v2143_v43 = vmul.f32 %v2110_v28, %v1919_v60  ;;  %2657 = vmatmul.f32.gmra.mxu2 %v6515_v63  ;;  %3200 = vmatmul.f32.gmra.mxu3 %v6879_v17  ;;  %v6899_v63 = vld [vmem:[%s7961_s3 + $0x90] sm:$0xff] }
 0x318   : > { %2507 = vmatmul.f32.gmra.mxu1 %v5288_v48  ;;  %v3266_v2 = vpop.f32.mrf.mxu0  ;;  %2862 = vperm.xlu0 %5261, %v6899_v63  }
 0x319   : > { %v6894_v15 = vadd.f32 %v2143_v43, %v1377_v57  ;;  %v6906_v57 = vld [vmem:[#allocation2 + $0x15e] sm:$0xff]  ;;  %3421 = vmatpush.msra.mxu1 %v3400_v5 }
 0x31a   : > { %v2610_v24 = vpop.f32.mrf.mxu2  ;;  %v3153_v28 = vpop.f32.mrf.mxu3 }
 0x31b   : > { %8039 = vst [vmem:[#allocation17_spill] sm:$0xff] %v6894_v15  ;;  %v2706_v60 = vadd.f32 %v2610_v24, %v2449_v7  ;;  %v6903_v48 = vadd.f32 %v3266_v2, %v3153_v28  ;;  %3313 = vmatmul.f32.gmra.mxu0 %v6639_v20  ;;  %v5289_v15 = vld [vmem:[#allocation2 + $0x112] sm:$0xff]  ;;  %v4230_v7 = vld [vmem:[#allocation7 + $0x828] sm:$0xff] }
 0x31c   : > { %v6918_v20 = vld [vmem:[%s7961_s3 + $0x88] sm:$0xff]  ;;  %4251 = vmatpush.msra.mxu0 %v4230_v7 }
 0x31d   : > { %8040 = vst [vmem:[#allocation18_spill] sm:$0xff] %v6903_v48  ;;  %v2930_v43 = vmul.f32 %v2773_v55, %v2706_v60  ;;  %v6908_v14 = vpop.f32.mrf.mxu1  ;;  %v6923_v55 = vld [vmem:[%s7961_s3 + $0xb0] sm:$0xff]  ;;  %2857 = vperm.xlu2 %5260, %v6918_v20   ;;  %v5290_v48 = vld [vmem:[#allocation2 + $0x11a] sm:$0xff] }
 0x31e   : > { %v8043_v24 = vld [vmem:[#allocation19_spill] sm:$0xff]  ;;  %2882 = vperm.xlu1 %5262, %v6923_v55  }
 0x31f   : > { %v6911_v3 = vadd.f32 %v2930_v43, %v8041_v26  ;;  %2660 = vmatmul.f32.gmra.mxu2 %v6530_v61  ;;  %3203 = vmatmul.f32.gmra.mxu3 %v6906_v57  ;;  %v2452_v28 = vadd.f32 %v6821_v44, %v8043_v24  ;;  %v2778_v61 = vpop.permute.xlu0 %2777  ;;  %v6938_v44 = vld [vmem:[#allocation2 + $0x166] sm:$0xff] }
 0x320   : > { %2510 = vmatmul.f32.gmra.mxu1 %v5289_v15  ;;  %v3269_v2 = vpop.f32.mrf.mxu0  ;;  %v6931_v15 = vld [vmem:[%s7961_s3 + $0xa8] sm:$0xff] }
 0x321   : > { %8042 = vst [vmem:[#allocation20_spill] sm:$0xff] %v6911_v3  ;;  %2877 = vperm.xlu0 %5261, %v6931_v15  }
 0x322   : > { %v2613_v60 = vpop.f32.mrf.mxu2  ;;  %v3156_v5 = vpop.f32.mrf.mxu3 }
 0x323   : > { %v2707_v43 = vadd.f32 %v2613_v60, %v2452_v28  ;;  %v6935_v26 = vadd.f32 %v3269_v2, %v3156_v5  ;;  %3316 = vmatmul.f32.gmra.mxu0 %v6663_v27  ;;  %v3954_v28 = vld [vmem:[#allocation7 + $0x6a0] sm:$0xff]  ;;  %v2783_v5 = vpop.permute.xlu1 %2782 }
 0x324   : > { %v3913_v2 = vld [vmem:[#allocation7 + $0x5a0] sm:$0xff]  ;;  %3977 = vmatpush.msra.mxu2 %v3954_v28 }
 0x325   : > { %8044 = vst [vmem:[#allocation19_spill] sm:$0xff] %v6935_v26  ;;  %v2931_v7 = vmul.f32 %v2778_v61, %v2707_v43  ;;  %v6940_v24 = vpop.f32.mrf.mxu1  ;;  %v6950_v27 = vld [vmem:[%s7961_s3 + $0xa0] sm:$0xff]  ;;  %4090 = vmatpush.msra.mxu3 %v3913_v2  ;;  %v6970_v2 = vld [vmem:[#allocation2 + $0x16e] sm:$0xff] }
 0x326   : > { %v8046_v61 = vld [vmem:[#allocation21_spill] sm:$0xff]  ;;  %2872 = vperm.xlu2 %5260, %v6950_v27   ;;  %8048 = vst [vmem:[#allocation70_spill] sm:$0xff] %v6970_v2  ;;  %v8049_v26 = vld [vmem:[#allocation23_spill] sm:$0xff] }
 0x327   : > { %v6943_v3 = vadd.f32 %v2931_v7, %v6359_v58  ;;  %2663 = vmatmul.f32.gmra.mxu2 %v6545_v52  ;;  %3206 = vmatmul.f32.gmra.mxu3 %v6938_v44  ;;  %v2455_v60 = vadd.f32 %v6841_v4, %v8046_v61  ;;  %v6957_v58 = vld [vmem:[%s7961_s3 + $0xc8] sm:$0xff]  ;;  %v6962_v52 = vld [vmem:[%s7961_s3 + $0xc0] sm:$0xff] }
 0x328   : > { %2513 = vmatmul.f32.gmra.mxu1 %v5290_v48  ;;  %v3272_v56 = vpop.f32.mrf.mxu0  ;;  %2897 = vperm.xlu1 %5262, %v6957_v58   ;;  %v3399_v28 = vld [vmem:[#allocation7 + $0x420] sm:$0xff] }
 0x329   : > { %8045 = vst [vmem:[#allocation69_spill] sm:$0xff] %v6943_v3  ;;  %2892 = vperm.xlu0 %5261, %v6962_v52   ;;  %3422 = vmatpush.msra.mxu1 %v3399_v28 }
 0x32a   : > { %v2616_v48 = vpop.f32.mrf.mxu2  ;;  %v3159_v43 = vpop.f32.mrf.mxu3 }
 0x32b   : > { %v2708_v4 = vadd.f32 %v2616_v48, %v2455_v60  ;;  %v6966_v7 = vadd.f32 %v3272_v56, %v3159_v43  ;;  %3319 = vmatmul.f32.gmra.mxu0 %v6683_v38  ;;  %v5291_v56 = vld [vmem:[#allocation2 + $0x122] sm:$0xff]  ;;  %v6982_v48 = vld [vmem:[%s7961_s3 + $0xb8] sm:$0xff] }
 0x32c   : > { %v4229_v38 = vld [vmem:[#allocation7 + $0x820] sm:$0xff] }
 0x32d   : > { %8047 = vst [vmem:[#allocation21_spill] sm:$0xff] %v6966_v7  ;;  %v2932_v61 = vmul.f32 %v2783_v5, %v2708_v4  ;;  %v6972_v3 = vpop.f32.mrf.mxu1  ;;  %v6987_v5 = vld [vmem:[%s7961_s3 + $0xe0] sm:$0xff]  ;;  %4252 = vmatpush.msra.mxu0 %v4229_v38  ;;  %v6994_v4 = vld [vmem:[%s7961_s3 + $0xd8] sm:$0xff] }
 0x32e   : > { %8051 = vst [vmem:[#allocation71_spill] sm:$0xff] %v6987_v5  ;;  %2887 = vperm.xlu2 %5260, %v6982_v48   ;;  %v7002_v38 = vld [vmem:[#allocation2 + $0x176] sm:$0xff] }
 0x32f   : > { %v6975_v16 = vadd.f32 %v2932_v61, %v8049_v26  ;;  %2666 = vmatmul.f32.gmra.mxu2 %v6560_v22  ;;  %3209 = vmatmul.f32.gmra.mxu3 %v6970_v2  ;;  %v8052_v26 = vld [vmem:[#allocation22_spill] sm:$0xff]  ;;  %v2788_v22 = vpop.permute.xlu2 %2787  ;;  %8054 = vst [vmem:[#allocation72_spill] sm:$0xff] %v7002_v38 }
 0x330   : > { %2516 = vmatmul.f32.gmra.mxu1 %v5291_v56  ;;  %v3275_v60 = vpop.f32.mrf.mxu0  ;;  %v2458_v43 = vadd.f32 %v6861_v32, %v8052_v26  ;;  %2912 = vperm.xlu1 %5262, %v6987_v5   ;;  %v2564_v32 = vld [vmem:[#allocation2 + $0x1ca] sm:$0xff] }
 0x331   : > { %8050 = vst [vmem:[#allocation23_spill] sm:$0xff] %v6975_v16  ;;  %2907 = vperm.xlu0 %5261, %v6994_v4   ;;  %v5292_v5 = vld [vmem:[#allocation2 + $0x12a] sm:$0xff] }
 0x332   : > { %v2619_v28 = vpop.f32.mrf.mxu2  ;;  %v3162_v61 = vpop.f32.mrf.mxu3 }
 0x333   : > { %v2709_v56 = vadd.f32 %v2619_v28, %v2458_v43  ;;  %v6998_v16 = vadd.f32 %v3275_v60, %v3162_v61  ;;  %3322 = vmatmul.f32.gmra.mxu0 %v6702_v49  ;;  %v3953_v43 = vld [vmem:[#allocation7 + $0x698] sm:$0xff]  ;;  %v7013_v49 = vld [vmem:[%s7961_s3 + $0xd0] sm:$0xff]  ;;  %v2793_v61 = vpop.permute.xlu1 %2792 }
 0x334   : > { %v3912_v28 = vld [vmem:[#allocation7 + $0x598] sm:$0xff]  ;;  %3978 = vmatpush.msra.mxu2 %v3953_v43 }
 0x335   : > { %8053 = vst [vmem:[#allocation22_spill] sm:$0xff] %v6998_v16  ;;  %v2933_v26 = vmul.f32 %v2788_v22, %v2709_v56  ;;  %v7004_v7 = vpop.f32.mrf.mxu1  ;;  %v2461_v22 = vadd.f32 %v6881_v31, %v6386_v40  ;;  %4091 = vmatpush.msra.mxu3 %v3912_v28  ;;  %v2565_v43 = vld [vmem:[#allocation2 + $0x1d2] sm:$0xff]  ;;  %v7033_v28 = vld [vmem:[#allocation2 + $0x17e] sm:$0xff] }
 0x336   : > { %2902 = vperm.xlu2 %5260, %v7013_v49   ;;  %8057 = vst [vmem:[#allocation75_spill] sm:$0xff] %v7033_v28 }
 0x337   : > { %v7007_v2 = vadd.f32 %v2933_v26, %v6390_v11  ;;  %2669 = vmatmul.f32.gmra.mxu2 %v2564_v32  ;;  %3212 = vmatmul.f32.gmra.mxu3 %v7002_v38  ;;  %v7020_v11 = vld [vmem:[%s7961_s3 + $0xf8] sm:$0xff] }
 0x338   : > { %2519 = vmatmul.f32.gmra.mxu1 %v5292_v5  ;;  %v3278_v60 = vpop.f32.mrf.mxu0  ;;  %v7025_v5 = vld [vmem:[%s7961_s3 + $0xf0] sm:$0xff]  ;;  %2927 = vperm.xlu1 %5262, %v7020_v11   ;;  %v3398_v26 = vld [vmem:[#allocation7 + $0x418] sm:$0xff] }
 0x339   : > { %8055 = vst [vmem:[#allocation73_spill] sm:$0xff] %v7007_v2  ;;  %2922 = vperm.xlu0 %5261, %v7025_v5   ;;  %3423 = vmatpush.msra.mxu1 %v3398_v26 }
 0x33a   : > { %v2622_v56 = vpop.f32.mrf.mxu2  ;;  %v3165_v32 = vpop.f32.mrf.mxu3 }
 0x33b   : > { %v2710_v40 = vadd.f32 %v2622_v56, %v2461_v22  ;;  %v7029_v31 = vadd.f32 %v3278_v60, %v3165_v32  ;;  %3325 = vmatmul.f32.gmra.mxu0 %v6723_v34  ;;  %v5293_v60 = vld [vmem:[#allocation2 + $0x132] sm:$0xff]  ;;  %v7044_v56 = vld [vmem:[%s7961_s3 + $0xe8] sm:$0xff] }
 0x33c   : > { %v4228_v34 = vld [vmem:[#allocation7 + $0x818] sm:$0xff]  ;;  %8059 = vst [vmem:[#allocation77_spill] sm:$0xff] %v7044_v56 }
 0x33d   : > { %8056 = vst [vmem:[#allocation74_spill] sm:$0xff] %v7029_v31  ;;  %v2934_v2 = vmul.f32 %v2793_v61, %v2710_v40  ;;  %v7035_v16 = vpop.f32.mrf.mxu1  ;;  %v8060_v32 = vld [vmem:[#allocation24_spill] sm:$0xff]  ;;  %v2798_v40 = vpop.permute.xlu2 %2797  ;;  %4253 = vmatpush.msra.mxu0 %v4228_v34 }
 0x33e   : > { %v2464_v61 = vadd.f32 %v6908_v14, %v8060_v32  ;;  %2917 = vperm.xlu2 %5260, %v7044_v56   ;;  %v2566_v14 = vld [vmem:[#allocation2 + $0x1da] sm:$0xff]  ;;  %v7057_v32 = vld [vmem:[#allocation2 + $0x186] sm:$0xff] }
 0x33f   : > { %v7038_v38 = vadd.f32 %v2934_v2, %v6406_v47  ;;  %2672 = vmatmul.f32.gmra.mxu2 %v2565_v43  ;;  %3215 = vmatmul.f32.gmra.mxu3 %v7033_v28  ;;  %v5498_v2 = vmov 2  }
 0x340   : > { %2522 = vmatmul.f32.gmra.mxu1 %v5293_v60  ;;  %v3281_v22 = vpop.f32.mrf.mxu0  ;;  %5265 = vset.pattern.permute.xlu1 %v5498_v2 }
 0x341   : > { %8058 = vst [vmem:[#allocation76_spill] sm:$0xff] %v7038_v38  ;;  %5264 = vset.pattern.permute.xlu0 %v5498_v2  ;;  %v7055_v38 = vld [vmem:[%s7961_s3 + $0x8] sm:$0xff]  ;;  %3600 = vperm.xlu1 %5265, %v6584_v41   ;;  %v2803_v41 = vpop.permute.xlu0 %2802 }
 0x342   : > { %v2625_v26 = vpop.f32.mrf.mxu2  ;;  %v3168_v47 = vpop.f32.mrf.mxu3  ;;  %3595 = vperm.xlu0 %5264, %v7055_v38  }
 0x343   : > { %v2711_v43 = vadd.f32 %v2625_v26, %v2464_v61  ;;  %v7049_v60 = vadd.f32 %v3281_v22, %v3168_v47  ;;  %3328 = vmatmul.f32.gmra.mxu0 %v6742_v36  ;;  %v5294_v36 = vld [vmem:[#allocation2 + $0x13a] sm:$0xff]  ;;  %v3952_v26 = vld [vmem:[#allocation7 + $0x690] sm:$0xff] }
 0x344   : > { %v3911_v47 = vld [vmem:[#allocation7 + $0x590] sm:$0xff]  ;;  %3979 = vmatpush.msra.mxu2 %v3952_v26 }
 0x345   : > { %8061 = vst [vmem:[#allocation24_spill] sm:$0xff] %v7049_v60  ;;  %v2935_v34 = vmul.f32 %v2798_v40, %v2711_v43  ;;  %v7061_v31 = vpop.f32.mrf.mxu1  ;;  %v8062_v60 = vld [vmem:[#allocation25_spill] sm:$0xff]  ;;  %4092 = vmatpush.msra.mxu3 %v3911_v47 }
 0x346   : > { %v2467_v28 = vadd.f32 %v6940_v24, %v8062_v60  ;;  %5263 = vset.pattern.permute.xlu2 %v5498_v2  ;;  %v4227_v2 = vld [vmem:[#allocation7 + $0x810] sm:$0xff] }
 0x347   : > { %v7064_v22 = vadd.f32 %v2935_v34, %v6422_v21  ;;  %2675 = vmatmul.f32.gmra.mxu2 %v2566_v14  ;;  %3218 = vmatmul.f32.gmra.mxu3 %v7057_v32  ;;  %v3397_v14 = vld [vmem:[#allocation7 + $0x410] sm:$0xff]  ;;  %v2567_v34 = vld [vmem:[#allocation2 + $0x1e2] sm:$0xff] }
 0x348   : > { %2525 = vmatmul.f32.gmra.mxu1 %v5294_v36  ;;  %v3284_v61 = vpop.f32.mrf.mxu0  ;;  %3590 = vperm.xlu2 %5263, %v6603_v19   ;;  %v7073_v36 = vld [vmem:[#allocation2 + $0x18e] sm:$0xff] }
 0x349   : > { %3610 = vperm.xlu1 %5265, %v6622_v59   ;;  %3424 = vmatpush.msra.mxu1 %v3397_v14  ;;  %v2808_v59 = vpop.permute.xlu1 %2807 }
 0x34a   : > { %v2628_v40 = vpop.f32.mrf.mxu2  ;;  %v3171_v43 = vpop.f32.mrf.mxu3  ;;  %3620 = vperm.xlu0 %5264, %v6659_v30   ;;  %4254 = vmatpush.msra.mxu0 %v4227_v2 }
 0x34b   : > { %v2712_v56 = vadd.f32 %v2628_v40, %v2467_v28  ;;  %v7069_v21 = vadd.f32 %v3284_v61, %v3171_v43  ;;  %3331 = vmatmul.f32.gmra.mxu0 %v6761_v62  ;;  %v5295_v62 = vld [vmem:[#allocation2 + $0x142] sm:$0xff]  ;;  %v7089_v40 = vld [vmem:[#allocation2 + $0x196] sm:$0xff] }
 0x34c   : > { %v8063_v61 = vld [vmem:[#allocation26_spill] sm:$0xff] }
 0x34d   : > { %v2936_v24 = vmul.f32 %v2803_v41, %v2712_v56  ;;  %v7077_v60 = vpop.f32.mrf.mxu1  ;;  %v2470_v26 = vadd.f32 %v6972_v3, %v8063_v61  ;;  %v3396_v43 = vld [vmem:[#allocation7 + $0x408] sm:$0xff] }
 0x34e   : > { %3425 = vmatpush.msra.mxu1 %v3396_v43 }
 0x34f   : > { %v7080_v28 = vadd.f32 %v2936_v24, %v6438_v18  ;;  %2678 = vmatmul.f32.gmra.mxu2 %v2567_v34  ;;  %3221 = vmatmul.f32.gmra.mxu3 %v7073_v36  ;;  %v2568_v18 = vld [vmem:[#allocation2 + $0x1ea] sm:$0xff]  ;;  %v3395_v34 = vld [vmem:[#allocation7 + $0x400] sm:$0xff] }
 0x350   : > { %2528 = vmatmul.f32.gmra.mxu1 %v5295_v62  ;;  %v3287_v19 = vpop.f32.mrf.mxu0  ;;  %3605 = vperm.xlu2 %5263, %v6654_v42   ;;  %v5296_v42 = vld [vmem:[#allocation2 + $0x14a] sm:$0xff] }
 0x351   : > { %3625 = vperm.xlu1 %5265, %v6679_v35   ;;  %v3951_v62 = vld [vmem:[#allocation7 + $0x688] sm:$0xff]  ;;  %v2473_v35 = vadd.f32 %v7004_v7, %v6450_v54  ;;  %3426 = vmatpush.msra.mxu1 %v3395_v34 }
 0x352   : > { %v2631_v30 = vpop.f32.mrf.mxu2  ;;  %v3174_v56 = vpop.f32.mrf.mxu3  ;;  %3635 = vperm.xlu0 %5264, %v6719_v23   ;;  %3980 = vmatpush.msra.mxu2 %v3951_v62 }
 0x353   : > { %v2713_v47 = vadd.f32 %v2631_v30, %v2470_v26  ;;  %v7085_v41 = vadd.f32 %v3287_v19, %v3174_v56  ;;  %3334 = vmatmul.f32.gmra.mxu0 %v6780_v6  ;;  %v3910_v19 = vld [vmem:[#allocation7 + $0x588] sm:$0xff]  ;;  %v2813_v23 = vpop.permute.xlu2 %2812  ;;  %v7105_v30 = vld [vmem:[#allocation2 + $0x19e] sm:$0xff]  ;;  %v8064_v56 = vld [vmem:[#allocation28_spill] sm:$0xff] }
 0x354   : > { %4093 = vmatpush.msra.mxu3 %v3910_v19  ;;  %v2570_v19 = vld [vmem:[#allocation2 + $0x1fa] sm:$0xff] }
 0x355   : > { %v2937_v3 = vmul.f32 %v2808_v59, %v2713_v47  ;;  %v7093_v14 = vpop.f32.mrf.mxu1  ;;  %v2569_v59 = vld [vmem:[#allocation2 + $0x1f2] sm:$0xff] }
 0x357   : > { %v7096_v24 = vadd.f32 %v2937_v3, %v6454_v8  ;;  %2681 = vmatmul.f32.gmra.mxu2 %v2568_v18  ;;  %3224 = vmatmul.f32.gmra.mxu3 %v7089_v40  ;;  %v5297_v18 = vld [vmem:[#allocation2 + $0x152] sm:$0xff]  ;;  %v8065_v3 = vld [vmem:[#allocation27_spill] sm:$0xff] }
 0x358   : > { %2531 = vmatmul.f32.gmra.mxu1 %v5296_v42  ;;  %v3290_v6 = vpop.f32.mrf.mxu0  ;;  %3615 = vperm.xlu2 %5263, %v6698_v45   ;;  %v4226_v45 = vld [vmem:[#allocation7 + $0x808] sm:$0xff]  ;;  %v2476_v34 = vadd.f32 %v7035_v16, %v8065_v3  ;;  %v2818_v42 = vpop.permute.xlu0 %2817 }
 0x359   : > { %3640 = vperm.xlu1 %5265, %v6738_v53   ;;  %4255 = vmatpush.msra.mxu0 %v4226_v45  ;;  %v7137_v3 = vld [vmem:[#allocation2 + $0x1ae] sm:$0xff] }
 0x35a   : > { %v2634_v2 = vpop.f32.mrf.mxu2  ;;  %v3177_v61 = vpop.f32.mrf.mxu3  ;;  %3650 = vperm.xlu0 %5264, %v6776_v37  }
 0x35b   : > { %v2714_v26 = vadd.f32 %v2634_v2, %v2473_v35  ;;  %v7101_v8 = vadd.f32 %v3290_v6, %v3177_v61  ;;  %3337 = vmatmul.f32.gmra.mxu0 %v6799_v1  ;;  %v7121_v35 = vld [vmem:[#allocation2 + $0x1a6] sm:$0xff]  ;;  %v5298_v61 = vld [vmem:[#allocation2 + $0x15a] sm:$0xff] }
 0x35d   : > { %v2938_v54 = vmul.f32 %v2813_v23, %v2714_v26  ;;  %v7109_v7 = vpop.f32.mrf.mxu1 }
 0x35f   : > { %v7112_v47 = vadd.f32 %v2938_v54, %v8064_v56  ;;  %2684 = vmatmul.f32.gmra.mxu2 %v2569_v59  ;;  %3227 = vmatmul.f32.gmra.mxu3 %v7105_v30  ;;  %v3909_v59 = vld [vmem:[#allocation7 + $0x580] sm:$0xff] }
 0x360   : > { %2534 = vmatmul.f32.gmra.mxu1 %v5297_v18  ;;  %v3293_v43 = vpop.f32.mrf.mxu0  ;;  %3630 = vperm.xlu2 %5263, %v6757_v33   ;;  %v3950_v33 = vld [vmem:[#allocation7 + $0x680] sm:$0xff] }
 0x361   : > { %3655 = vperm.xlu1 %5265, %v6795_v9   ;;  %v8066_v54 = vld [vmem:[#allocation29_spill] sm:$0xff]  ;;  %v2823_v9 = vpop.permute.xlu1 %2822  ;;  %3981 = vmatpush.msra.mxu2 %v3950_v33 }
 0x362   : > { %v2637_v53 = vpop.f32.mrf.mxu2  ;;  %v3180_v37 = vpop.f32.mrf.mxu3  ;;  %3665 = vperm.xlu0 %5264, %v6832_v0   ;;  %v2479_v56 = vadd.f32 %v7061_v31, %v8066_v54  ;;  %4094 = vmatpush.msra.mxu3 %v3909_v59  ;;  %v2572_v59 = vld [vmem:[#allocation2 + $0x20a] sm:$0xff]  ;;  %v7153_v54 = vld [vmem:[#allocation2 + $0x1b6] sm:$0xff] }
 0x363   : > { %v2715_v6 = vadd.f32 %v2637_v53, %v2476_v34  ;;  %v7117_v62 = vadd.f32 %v3293_v43, %v3180_v37  ;;  %3340 = vmatmul.f32.gmra.mxu0 %v6819_v46  ;;  %v2828_v37 = vpop.permute.xlu2 %2827 }
 0x365   : > { %v2939_v23 = vmul.f32 %v2818_v42, %v2715_v6  ;;  %v7125_v16 = vpop.f32.mrf.mxu1  ;;  %v8067_v42 = vld [vmem:[#allocation31_spill] sm:$0xff]  ;;  %v5299_v6 = vld [vmem:[#allocation2 + $0x162] sm:$0xff] }
 0x367   : > { %v7128_v2 = vadd.f32 %v2939_v23, %v6486_v13  ;;  %2687 = vmatmul.f32.gmra.mxu2 %v2570_v19  ;;  %3230 = vmatmul.f32.gmra.mxu3 %v7121_v35  ;;  %v2571_v13 = vld [vmem:[#allocation2 + $0x202] sm:$0xff] }
 0x368   : > { %2537 = vmatmul.f32.gmra.mxu1 %v5298_v61  ;;  %v3296_v26 = vpop.f32.mrf.mxu0  ;;  %3645 = vperm.xlu2 %5263, %v6814_v51   ;;  %v4225_v19 = vld [vmem:[#allocation7 + $0x800] sm:$0xff] }
 0x369   : > { %3670 = vperm.xlu1 %5265, %v6852_v25   ;;  %v8068_v23 = vld [vmem:[#allocation30_spill] sm:$0xff]  ;;  %4256 = vmatpush.msra.mxu0 %v4225_v19 }
 0x36a   : > { %v2640_v0 = vpop.f32.mrf.mxu2  ;;  %v3183_v18 = vpop.f32.mrf.mxu3  ;;  %3680 = vperm.xlu0 %5264, %v6899_v63   ;;  %v2482_v61 = vadd.f32 %v7077_v60, %v8068_v23  ;;  %v8069_v60 = vld [vmem:[#allocation33_spill] sm:$0xff]  ;;  %v8071_v23 = vld [vmem:[#allocation35_spill] sm:$0xff] }
 0x36b   : > { %v2716_v43 = vadd.f32 %v2640_v0, %v2479_v56  ;;  %v7133_v45 = vadd.f32 %v3296_v26, %v3183_v18  ;;  %3343 = vmatmul.f32.gmra.mxu0 %v6839_v29  ;;  %v2843_v18 = vpop.permute.xlu2 %2842  ;;  %v7170_v19 = vld [vmem:[#allocation2 + $0x1be] sm:$0xff] }
 0x36d   : > { %v2940_v31 = vmul.f32 %v2823_v9, %v2716_v43  ;;  %v7141_v34 = vpop.f32.mrf.mxu1  ;;  %v8070_v43 = vld [vmem:[#allocation32_spill] sm:$0xff] }
 0x36f   : > { %v7144_v53 = vadd.f32 %v2940_v31, %v8067_v42  ;;  %2690 = vmatmul.f32.gmra.mxu2 %v2571_v13  ;;  %3233 = vmatmul.f32.gmra.mxu3 %v7137_v3  ;;  %v2485_v13 = vadd.f32 %v7093_v14, %v8070_v43  ;;  %v2833_v31 = vpop.permute.xlu0 %2832  ;;  %v7189_v43 = vld [vmem:[#allocation2 + $0x1c6] sm:$0xff] }
 0x370   : > { %2540 = vmatmul.f32.gmra.mxu1 %v5299_v6  ;;  %v3299_v51 = vpop.f32.mrf.mxu0  ;;  %3660 = vperm.xlu2 %5263, %v6872_v39   ;;  %v4823_v6 = vld [vmem:[#allocation7 + $0x8f8] sm:$0xff] }
 0x371   : > { %3685 = vperm.xlu1 %5265, %v6890_v12   ;;  %4824 = vmatpush.msrb.mxu1 %v4823_v6 }
 0x372   : > { %v2643_v25 = vpop.f32.mrf.mxu2  ;;  %v3186_v63 = vpop.f32.mrf.mxu3  ;;  %3695 = vperm.xlu0 %5264, %v6931_v15  }
 0x373   : > { %v2717_v26 = vadd.f32 %v2643_v25, %v2482_v61  ;;  %v7149_v33 = vadd.f32 %v3299_v51, %v3186_v63  ;;  %3346 = vmatmul.f32.gmra.mxu0 %v6859_v10  ;;  %v2573_v51 = vld [vmem:[#allocation2 + $0x212] sm:$0xff]  ;;  %v2838_v25 = vpop.permute.xlu1 %2837 }
 0x375   : > { %v2941_v56 = vmul.f32 %v2828_v37, %v2717_v26  ;;  %v7157_v9 = vpop.f32.mrf.mxu1  ;;  %v8072_v26 = vld [vmem:[#allocation34_spill] sm:$0xff] }
 0x377   : > { %v7160_v0 = vadd.f32 %v2941_v56, %v8069_v60  ;;  %2693 = vmatmul.f32.gmra.mxu2 %v2572_v59  ;;  %3236 = vmatmul.f32.gmra.mxu3 %v7153_v54 }
 0x378   : > { %3427 = vmatmul.f32.vlgmr.msra.gmra.mxu1 %v6799_v1  ;;  %v3302_v39 = vpop.f32.mrf.mxu0  ;;  %3675 = vperm.xlu2 %5263, %v6918_v20   ;;  %v7180_v20 = vpop.permute.xlu2 %2857 }
 0x379   : > { %3700 = vperm.xlu1 %5265, %v6923_v55   ;;  %v2488_v55 = vadd.f32 %v7109_v7, %v8072_v26 }
 0x37a   : > { %v2646_v12 = vpop.f32.mrf.mxu2  ;;  %v3189_v42 = vpop.f32.mrf.mxu3  ;;  %3710 = vperm.xlu0 %5264, %v6962_v52  }
 0x37b   : > { %v2718_v15 = vadd.f32 %v2646_v12, %v2485_v13  ;;  %v7166_v37 = vadd.f32 %v3302_v39, %v3189_v42  ;;  %3349 = vmatmul.f32.gmra.mxu0 %v6879_v17  ;;  %v2574_v39 = vld [vmem:[#allocation2 + $0x21a] sm:$0xff]  ;;  %v2848_v42 = vpop.permute.xlu0 %2847 }
 0x37d   : > { %v2942_v1 = vmul.f32 %v2833_v31, %v2718_v15  ;;  %v7174_v14 = vpop.f32.mrf.mxu1  ;;  %v7199_v31 = vpop.permute.xlu1 %2852 }
 0x37f   : > { %v7177_v61 = vadd.f32 %v2942_v1, %v8071_v23  ;;  %2696 = vmatmul.f32.gmra.mxu2 %v2573_v51  ;;  %3239 = vmatmul.f32.gmra.mxu3 %v7170_v19  ;;  %v2575_v23 = vld [vmem:[#allocation2 + $0x222] sm:$0xff] }
 0x380   : > { %3430 = vmatmul.f32.gmra.mxu1 %v6819_v46  ;;  %v3305_v63 = vpop.f32.mrf.mxu0  ;;  %3690 = vperm.xlu2 %5263, %v6950_v27   ;;  %v7201_v12 = vpop.permute.xlu2 %2872 }
 0x381   : > { %3715 = vperm.xlu1 %5265, %v6957_v58   ;;  %v8073_v58 = vld [vmem:[#allocation36_spill] sm:$0xff] }
 0x382   : > { %v2649_v52 = vpop.f32.mrf.mxu2  ;;  %v3192_v59 = vpop.f32.mrf.mxu3  ;;  %3725 = vperm.xlu0 %5264, %v6994_v4   ;;  %v2491_v4 = vadd.f32 %v7125_v16, %v8073_v58  ;;  %v8076_v16 = vld [vmem:[#allocation38_spill] sm:$0xff] }
 0x383   : > { %v2719_v56 = vadd.f32 %v2649_v52, %v2488_v55  ;;  %v7185_v60 = vadd.f32 %v3305_v63, %v3192_v59  ;;  %3352 = vmatmul.f32.gmra.mxu0 %v6906_v57  ;;  %v8075_v63 = vld [vmem:[#allocation71_spill] sm:$0xff] }
 0x385   : > { %v2943_v46 = vmul.f32 %v2838_v25, %v2719_v56  ;;  %v7193_v13 = vpop.f32.mrf.mxu1  ;;  %v7210_v25 = vld [vmem:[#allocation2 + $0x1ce] sm:$0xff] }
 0x387   : > { %v7196_v7 = vadd.f32 %v2943_v46, %v6547_v50  ;;  %2699 = vmatmul.f32.gmra.mxu2 %v2574_v39  ;;  %3242 = vmatmul.f32.gmra.mxu3 %v7189_v43  ;;  %v4822_v50 = vld [vmem:[#allocation7 + $0x8f0] sm:$0xff] }
 0x388   : > { %3433 = vmatmul.f32.gmra.mxu1 %v6839_v29  ;;  %v3308_v27 = vpop.f32.mrf.mxu0  ;;  %3705 = vperm.xlu2 %5263, %v6982_v48   ;;  %v7220_v52 = vpop.permute.xlu2 %2887 }
 0x389   : > { %3730 = vperm.xlu1 %5265, %v8075_v63   ;;  %4825 = vmatpush.msrb.mxu1 %v4822_v50  ;;  %v7222_v48 = vpop.permute.xlu1 %2867 }
 0x38a   : > { %v2652_v15 = vpop.f32.mrf.mxu2  ;;  %v3195_v6 = vpop.f32.mrf.mxu3  ;;  %3740 = vperm.xlu0 %5264, %v7025_v5   ;;  %v8078_v5 = vld [vmem:[#allocation37_spill] sm:$0xff] }
 0x38b   : > { %v2720_v51 = vadd.f32 %v2652_v15, %v2491_v4  ;;  %v7206_v1 = vadd.f32 %v3308_v27, %v3195_v6  ;;  %3355 = vmatmul.f32.gmra.mxu0 %v6938_v44  ;;  %v7225_v56 = vpop.permute.xlu0 %2862  ;;  %v8080_v4 = vld [vmem:[#allocation70_spill] sm:$0xff] }
 0x38c   : > { %v3900_v15 = vld [vmem:[#allocation2 + $0xdc] sm:$0xff] }
 0x38d   : > { %8074 = vst [vmem:[#allocation25_spill] sm:$0xff] %v7206_v1  ;;  %v2944_v29 = vmul.f32 %v2843_v18, %v2720_v51  ;;  %v7214_v26 = vpop.f32.mrf.mxu1  ;;  %v2494_v18 = vadd.f32 %v7141_v34, %v8078_v5  ;;  %v3876_v6 = vld [vmem:[#allocation2 + $0x1c] sm:$0xff]  ;;  %v8081_v34 = vld [vmem:[#allocation40_spill] sm:$0xff] }
 0x38f   : > { %v7217_v55 = vadd.f32 %v2944_v29, %v8076_v16  ;;  %2702 = vmatmul.f32.gmra.mxu2 %v2575_v23  ;;  %3245 = vmatmul.f32.gmra.mxu3 %v7210_v25  ;;  %v4192_v29 = vld [vmem:[#allocation2 + $0x19c] sm:$0xff] }
 0x390   : > { %3436 = vmatmul.f32.gmra.mxu1 %v6859_v10  ;;  %v3311_v59 = vpop.f32.mrf.mxu0  ;;  %3720 = vperm.xlu2 %5263, %v7013_v49   ;;  %v5499_v10 = vmov 3  }
 0x391   : > { %8077 = vst [vmem:[#allocation26_spill] sm:$0xff] %v7217_v55  ;;  %3745 = vperm.xlu1 %5265, %v7020_v11   ;;  %v7240_v63 = vpop.permute.xlu1 %2882  ;;  %v8083_v11 = vld [vmem:[#allocation39_spill] sm:$0xff] }
 0x392   : > { %v2655_v39 = vpop.f32.mrf.mxu2  ;;  %v3198_v46 = vpop.f32.mrf.mxu3  ;;  %5267 = vset.pattern.permute.xlu0 %v5499_v10 }
 0x393   : > { %v2721_v27 = vadd.f32 %v2655_v39, %v2494_v18  ;;  %v7229_v58 = vadd.f32 %v3311_v59, %v3198_v46  ;;  %3358 = vmatmul.f32.gmra.mxu0 %v8080_v4  ;;  %4425 = vperm.xlu0 %5267, %v7055_v38   ;;  %v7243_v16 = vpop.permute.xlu0 %2877  ;;  %v7247_v59 = vpop.permute.xlu2 %2902  ;;  %v8085_v46 = vld [vmem:[#allocation77_spill] sm:$0xff] }
 0x395   : > { %8079 = vst [vmem:[#allocation28_spill] sm:$0xff] %v7229_v58  ;;  %v2945_v51 = vmul.f32 %v2848_v42, %v2721_v27  ;;  %v7234_v50 = vpop.f32.mrf.mxu1  ;;  %v2497_v42 = vadd.f32 %v7157_v9, %v8083_v11  ;;  %v3901_v27 = vld [vmem:[#allocation2 + $0xe4] sm:$0xff] }
 0x397   : > { %v7238_v23 = vadd.f32 %v2945_v51, %v8081_v34  ;;  %3982 = vmatmul.f32.vlgmr.msra.gmra.mxu2 %v3900_v15  ;;  %4095 = vmatmul.f32.vlgmr.msra.gmra.mxu3 %v3876_v6  ;;  %v3877_v15 = vld [vmem:[#allocation2 + $0x24] sm:$0xff] }
 0x398   : > { %3439 = vmatmul.f32.gmra.mxu1 %v6879_v17  ;;  %v3314_v49 = vpop.f32.mrf.mxu0  ;;  %3735 = vperm.xlu2 %5263, %v8085_v46   ;;  %v4388_v17 = vld [vmem:[%s7961_s3 + $0x10] sm:$0xff]  ;;  %v8086_v51 = vld [vmem:[#allocation42_spill] sm:$0xff] }
 0x399   : > { %8082 = vst [vmem:[#allocation27_spill] sm:$0xff] %v7238_v23  ;;  %5268 = vset.pattern.permute.xlu1 %v5499_v10 }
 0x39a   : > { %v2658_v5 = vpop.f32.mrf.mxu2  ;;  %v3201_v38 = vpop.f32.mrf.mxu3  ;;  %4430 = vperm.xlu1 %5268, %v4388_v17  }
 0x39b   : > { %v2722_v18 = vadd.f32 %v2658_v5, %v2497_v42  ;;  %v7249_v39 = vadd.f32 %v3314_v49, %v3201_v38  ;;  %4257 = vmatmul.f32.vlgmr.msra.gmra.mxu0 %v4192_v29  ;;  %v4821_v49 = vld [vmem:[#allocation7 + $0x8e8] sm:$0xff]  ;;  %v7261_v29 = vpop.permute.xlu1 %2897  ;;  %v8088_v5 = vld [vmem:[#allocation41_spill] sm:$0xff] }
 0x39c   : > { %v4193_v42 = vld [vmem:[#allocation2 + $0x1a4] sm:$0xff]  ;;  %v2500_v38 = vadd.f32 %v7174_v14, %v8088_v5  ;;  %4826 = vmatpush.msrb.mxu1 %v4821_v49  ;;  %v8090_v5 = vld [vmem:[#allocation44_spill] sm:$0xff] }
 0x39d   : > { %8084 = vst [vmem:[#allocation29_spill] sm:$0xff] %v7249_v39  ;;  %v2946_v6 = vmul.f32 %v7199_v31, %v2722_v18  ;;  %v7256_v9 = vpop.f32.mrf.mxu1  ;;  %v7266_v31 = vpop.permute.xlu0 %2892 }
 0x39f   : > { %v7259_v34 = vadd.f32 %v2946_v6, %v8086_v51  ;;  %3985 = vmatmul.f32.gmra.mxu2 %v3901_v27  ;;  %4098 = vmatmul.f32.gmra.mxu3 %v3877_v15  ;;  %v7270_v27 = vpop.permute.xlu2 %2917  ;;  %v3902_v15 = vld [vmem:[#allocation2 + $0xec] sm:$0xff] }
 0x3a0   : > { %3442 = vmatmul.f32.gmra.mxu1 %v6906_v57  ;;  %v3317_v11 = vpop.f32.mrf.mxu0  ;;  %5266 = vset.pattern.permute.xlu2 %v5499_v10  ;;  %v3878_v51 = vld [vmem:[#allocation2 + $0x2c] sm:$0xff]  ;;  %v4386_v57 = vld [vmem:[%s7961_s3] sm:$0xff] }
 0x3a1   : > { %8087 = vst [vmem:[#allocation31_spill] sm:$0xff] %v7259_v34  ;;  %4420 = vperm.xlu2 %5266, %v4386_v57   ;;  %v4194_v10 = vld [vmem:[#allocation2 + $0x1ac] sm:$0xff] }
 0x3a2   : > { %v2661_v18 = vpop.f32.mrf.mxu2  ;;  %v3204_v46 = vpop.f32.mrf.mxu3 }
 0x3a3   : > { %v2723_v17 = vadd.f32 %v2661_v18, %v2500_v38  ;;  %v7268_v6 = vadd.f32 %v3317_v11, %v3204_v46  ;;  %4260 = vmatmul.f32.gmra.mxu0 %v4193_v42  ;;  %v8092_v42 = vld [vmem:[#allocation43_spill] sm:$0xff]  ;;  %v7284_v18 = vpop.permute.xlu1 %2912 }
 0x3a4   : > { %v2503_v38 = vadd.f32 %v7193_v13, %v8092_v42  ;;  %v8094_v42 = vld [vmem:[#allocation46_spill] sm:$0xff] }
 0x3a5   : > { %8089 = vst [vmem:[#allocation30_spill] sm:$0xff] %v7268_v6  ;;  %v2947_v14 = vmul.f32 %v7180_v20, %v2723_v17  ;;  %v7276_v49 = vpop.f32.mrf.mxu1  ;;  %v7288_v57 = vpop.permute.xlu0 %2907 }
 0x3a7   : > { %v7279_v34 = vadd.f32 %v2947_v14, %v8090_v5  ;;  %3988 = vmatmul.f32.gmra.mxu2 %v3902_v15  ;;  %4101 = vmatmul.f32.gmra.mxu3 %v3878_v51  ;;  %v3903_v14 = vld [vmem:[#allocation2 + $0xf4] sm:$0xff]  ;;  %v7296_v13 = vpop.permute.xlu2 %3590 }
 0x3a8   : > { %3445 = vmatmul.f32.gmra.mxu1 %v6938_v44  ;;  %v3320_v11 = vpop.f32.mrf.mxu0  ;;  %v3879_v15 = vld [vmem:[#allocation2 + $0x34] sm:$0xff]  ;;  %v4390_v44 = vld [vmem:[%s7961_s3 + $0x20] sm:$0xff] }
 0x3a9   : > { %8091 = vst [vmem:[#allocation33_spill] sm:$0xff] %v7279_v34  ;;  %4440 = vperm.xlu1 %5268, %v4390_v44  }
 0x3aa   : > { %v2664_v46 = vpop.f32.mrf.mxu2  ;;  %v3207_v6 = vpop.f32.mrf.mxu3 }
 0x3ab   : > { %v2724_v20 = vadd.f32 %v2664_v46, %v2503_v38  ;;  %v7286_v17 = vadd.f32 %v3320_v11, %v3207_v6  ;;  %4263 = vmatmul.f32.gmra.mxu0 %v4194_v10  ;;  %v4820_v6 = vld [vmem:[#allocation7 + $0x8e0] sm:$0xff]  ;;  %v4195_v10 = vld [vmem:[#allocation2 + $0x1b4] sm:$0xff]  ;;  %v7306_v44 = vpop.permute.xlu1 %2927 }
 0x3ac   : > { %v8096_v46 = vld [vmem:[#allocation45_spill] sm:$0xff]  ;;  %4827 = vmatpush.msrb.mxu1 %v4820_v6 }
 0x3ad   : > { %8093 = vst [vmem:[#allocation32_spill] sm:$0xff] %v7286_v17  ;;  %v2948_v51 = vmul.f32 %v7225_v56, %v2724_v20  ;;  %v7294_v5 = vpop.f32.mrf.mxu1  ;;  %v2506_v17 = vadd.f32 %v7214_v26, %v8096_v46 }
 0x3af   : > { %v7299_v38 = vadd.f32 %v2948_v51, %v8094_v42  ;;  %3991 = vmatmul.f32.gmra.mxu2 %v3903_v14  ;;  %4104 = vmatmul.f32.gmra.mxu3 %v3879_v15  ;;  %v3904_v51 = vld [vmem:[#allocation2 + $0xfc] sm:$0xff]  ;;  %v7316_v26 = vpop.permute.xlu2 %3605 }
 0x3b0   : > { %3448 = vmatmul.f32.gmra.mxu1 %v8080_v4  ;;  %v3323_v11 = vpop.f32.mrf.mxu0  ;;  %v3880_v14 = vld [vmem:[#allocation2 + $0x3c] sm:$0xff]  ;;  %v7311_v4 = vpop.permute.xlu0 %2922 }
 0x3b1   : > { %8095 = vst [vmem:[#allocation35_spill] sm:$0xff] %v7299_v38  ;;  %v8098_v38 = vld [vmem:[#allocation48_spill] sm:$0xff] }
 0x3b2   : > { %v2667_v56 = vpop.f32.mrf.mxu2  ;;  %v3210_v20 = vpop.f32.mrf.mxu3 }
 0x3b3   : > { %v2725_v34 = vadd.f32 %v2667_v56, %v2506_v17  ;;  %v7304_v39 = vadd.f32 %v3323_v11, %v3210_v20  ;;  %4266 = vmatmul.f32.gmra.mxu0 %v4195_v10  ;;  %v8100_v17 = vld [vmem:[#allocation72_spill] sm:$0xff]  ;;  %v4196_v11 = vld [vmem:[#allocation2 + $0x1bc] sm:$0xff]  ;;  %v8101_v10 = vld [vmem:[#allocation47_spill] sm:$0xff] }
 0x3b4   : > { %v2509_v46 = vadd.f32 %v7234_v50, %v8101_v10  ;;  %v7332_v50 = vpop.permute.xlu1 %3600 }
 0x3b5   : > { %8097 = vst [vmem:[#allocation34_spill] sm:$0xff] %v7304_v39  ;;  %v2949_v15 = vmul.f32 %v7222_v48, %v2725_v34  ;;  %v7309_v42 = vpop.f32.mrf.mxu1  ;;  %v3905_v39 = vld [vmem:[#allocation2 + $0x104] sm:$0xff] }
 0x3b7   : > { %v7314_v23 = vadd.f32 %v2949_v15, %v8098_v38  ;;  %3994 = vmatmul.f32.gmra.mxu2 %v3904_v51  ;;  %4107 = vmatmul.f32.gmra.mxu3 %v3880_v14  ;;  %v3881_v38 = vld [vmem:[#allocation2 + $0x44] sm:$0xff]  ;;  %v4389_v51 = vld [vmem:[%s7961_s3 + $0x18] sm:$0xff]  ;;  %v4392_v14 = vld [vmem:[%s7961_s3 + $0x30] sm:$0xff] }
 0x3b8   : > { %3451 = vmatmul.f32.gmra.mxu1 %v8100_v17  ;;  %v3326_v6 = vpop.f32.mrf.mxu0  ;;  %4435 = vperm.xlu2 %5266, %v4389_v51  }
 0x3b9   : > { %8099 = vst [vmem:[#allocation36_spill] sm:$0xff] %v7314_v23  ;;  %4450 = vperm.xlu0 %5267, %v4392_v14   ;;  %v8106_v23 = vld [vmem:[#allocation49_spill] sm:$0xff] }
 0x3ba   : > { %v2670_v56 = vpop.f32.mrf.mxu2  ;;  %v3213_v48 = vpop.f32.mrf.mxu3 }
 0x3bb   : > { %v2726_v34 = vadd.f32 %v2670_v56, %v2509_v46  ;;  %v7321_v20 = vadd.f32 %v3326_v6, %v3213_v48  ;;  %4269 = vmatmul.f32.gmra.mxu0 %v4196_v11  ;;  %v8103_v6 = vld [vmem:[#allocation50_spill] sm:$0xff]  ;;  %v7337_v11 = vpop.permute.xlu0 %3595  ;;  %v4819_v46 = vld [vmem:[#allocation7 + $0x8d8] sm:$0xff]  ;;  %v8105_v56 = vld [vmem:[#allocation75_spill] sm:$0xff] }
 0x3bc   : > { %4828 = vmatpush.msrb.mxu1 %v4819_v46  ;;  %v7355_v46 = vpop.permute.xlu1 %3610 }
 0x3bd   : > { %8102 = vst [vmem:[#allocation71_spill] sm:$0xff] %v7321_v20  ;;  %v2950_v15 = vmul.f32 %v7201_v12, %v2726_v34  ;;  %v7330_v17 = vpop.f32.mrf.mxu1  ;;  %v4197_v20 = vld [vmem:[#allocation2 + $0x1c4] sm:$0xff]  ;;  %v2512_v12 = vadd.f32 %v7256_v9, %v8106_v23  ;;  %v7342_v34 = vpop.permute.xlu2 %3615  ;;  %v8108_v23 = vld [vmem:[#allocation52_spill] sm:$0xff] }
 0x3bf   : > { %v7335_v10 = vadd.f32 %v2950_v15, %v8103_v6  ;;  %3997 = vmatmul.f32.gmra.mxu2 %v3905_v39  ;;  %4110 = vmatmul.f32.gmra.mxu3 %v3881_v38  ;;  %v3906_v39 = vld [vmem:[#allocation2 + $0x10c] sm:$0xff]  ;;  %v4393_v6 = vld [vmem:[%s7961_s3 + $0x38] sm:$0xff] }
 0x3c0   : > { %3454 = vmatmul.f32.gmra.mxu1 %v8105_v56  ;;  %v3329_v48 = vpop.f32.mrf.mxu0  ;;  %v3882_v38 = vld [vmem:[#allocation2 + $0x4c] sm:$0xff]  ;;  %4455 = vperm.xlu1 %5268, %v4393_v6  }
 0x3c1   : > { %8104 = vst [vmem:[#allocation38_spill] sm:$0xff] %v7335_v10 }
 0x3c2   : > { %v2673_v51 = vpop.f32.mrf.mxu2  ;;  %v3216_v14 = vpop.f32.mrf.mxu3 }
 0x3c3   : > { %v2727_v58 = vadd.f32 %v2673_v51, %v2512_v12  ;;  %v7344_v15 = vadd.f32 %v3329_v48, %v3216_v14  ;;  %4272 = vmatmul.f32.gmra.mxu0 %v4197_v20  ;;  %v4198_v48 = vld [vmem:[#allocation2 + $0x1cc] sm:$0xff]  ;;  %v7360_v14 = vpop.permute.xlu0 %3620 }
 0x3c4   : > { %v8110_v12 = vld [vmem:[#allocation51_spill] sm:$0xff] }
 0x3c5   : > { %8107 = vst [vmem:[#allocation37_spill] sm:$0xff] %v7344_v15  ;;  %v2951_v56 = vmul.f32 %v7243_v16, %v2727_v58  ;;  %v7350_v10 = vpop.f32.mrf.mxu1  ;;  %v2515_v51 = vadd.f32 %v7276_v49, %v8110_v12  ;;  %v8112_v49 = vld [vmem:[#allocation54_spill] sm:$0xff] }
 0x3c7   : > { %v7353_v9 = vadd.f32 %v2951_v56, %v8108_v23  ;;  %4000 = vmatmul.f32.gmra.mxu2 %v3906_v39  ;;  %4113 = vmatmul.f32.gmra.mxu3 %v3882_v38  ;;  %v7364_v56 = vpop.permute.xlu2 %3630  ;;  %v3907_v39 = vld [vmem:[#allocation2 + $0x114] sm:$0xff] }
 0x3c8   : > { %3457 = vmatmul.f32.gmra.mxu1 %v7057_v32  ;;  %v3332_v20 = vpop.f32.mrf.mxu0  ;;  %v3883_v38 = vld [vmem:[#allocation2 + $0x54] sm:$0xff]  ;;  %v4391_v32 = vld [vmem:[%s7961_s3 + $0x28] sm:$0xff] }
 0x3c9   : > { %8109 = vst [vmem:[#allocation70_spill] sm:$0xff] %v7353_v9  ;;  %4445 = vperm.xlu2 %5266, %v4391_v32  }
 0x3ca   : > { %v2676_v58 = vpop.f32.mrf.mxu2  ;;  %v3219_v16 = vpop.f32.mrf.mxu3 }
 0x3cb   : > { %v2728_v15 = vadd.f32 %v2676_v58, %v2515_v51  ;;  %v7362_v6 = vadd.f32 %v3332_v20, %v3219_v16  ;;  %4275 = vmatmul.f32.gmra.mxu0 %v4198_v48  ;;  %v4818_v20 = vld [vmem:[#allocation7 + $0x8d0] sm:$0xff]  ;;  %v8114_v58 = vld [vmem:[#allocation53_spill] sm:$0xff] }
 0x3cc   : > { %v4199_v51 = vld [vmem:[#allocation2 + $0x1d4] sm:$0xff]  ;;  %v2518_v16 = vadd.f32 %v7294_v5, %v8114_v58  ;;  %4829 = vmatpush.msrb.mxu1 %v4818_v20 }
 0x3cd   : > { %8111 = vst [vmem:[#allocation40_spill] sm:$0xff] %v7362_v6  ;;  %v2952_v23 = vmul.f32 %v7240_v63, %v2728_v15  ;;  %v7370_v9 = vpop.f32.mrf.mxu1  ;;  %v7378_v6 = vpop.permute.xlu1 %3625  ;;  %v8116_v20 = vld [vmem:[#allocation56_spill] sm:$0xff] }
 0x3cf   : > { %v7373_v12 = vadd.f32 %v2952_v23, %v8112_v49  ;;  %4003 = vmatmul.f32.gmra.mxu2 %v3907_v39  ;;  %4116 = vmatmul.f32.gmra.mxu3 %v3883_v38  ;;  %v7382_v23 = vpop.permute.xlu0 %3635  ;;  %v3925_v39 = vld [vmem:[#allocation2 + $0x11c] sm:$0xff]  ;;  %v7390_v58 = vpop.permute.xlu2 %3645 }
 0x3d0   : > { %3460 = vmatmul.f32.gmra.mxu1 %v7073_v36  ;;  %v3335_v48 = vpop.f32.mrf.mxu0  ;;  %v3884_v38 = vld [vmem:[#allocation2 + $0x5c] sm:$0xff]  ;;  %v4395_v36 = vld [vmem:[%s7961_s3 + $0x48] sm:$0xff] }
 0x3d1   : > { %8113 = vst [vmem:[#allocation39_spill] sm:$0xff] %v7373_v12  ;;  %4465 = vperm.xlu0 %5267, %v4395_v36   ;;  %v3926_v36 = vld [vmem:[#allocation2 + $0x124] sm:$0xff] }
 0x3d2   : > { %v2679_v63 = vpop.f32.mrf.mxu2  ;;  %v3222_v15 = vpop.f32.mrf.mxu3 }
 0x3d3   : > { %v2729_v55 = vadd.f32 %v2679_v63, %v2518_v16  ;;  %v7380_v32 = vadd.f32 %v3335_v48, %v3222_v15  ;;  %4278 = vmatmul.f32.gmra.mxu0 %v4199_v51  ;;  %v4200_v51 = vld [vmem:[#allocation2 + $0x1dc] sm:$0xff]  ;;  %v8118_v63 = vld [vmem:[#allocation55_spill] sm:$0xff] }
 0x3d4   : > { %v2521_v15 = vadd.f32 %v7309_v42, %v8118_v63  ;;  %v8120_v42 = vld [vmem:[#allocation58_spill] sm:$0xff] }
 0x3d5   : > { %8115 = vst [vmem:[#allocation77_spill] sm:$0xff] %v7380_v32  ;;  %v2953_v49 = vmul.f32 %v7220_v52, %v2729_v55  ;;  %v7388_v5 = vpop.f32.mrf.mxu1  ;;  %v7400_v1 = vpop.permute.xlu1 %3640  ;;  %v4201_v63 = vld [vmem:[#allocation2 + $0x1e4] sm:$0xff] }
 0x3d7   : > { %v7393_v16 = vadd.f32 %v2953_v49, %v8116_v20  ;;  %4006 = vmatmul.f32.gmra.mxu2 %v3925_v39  ;;  %4119 = vmatmul.f32.gmra.mxu3 %v3884_v38  ;;  %v3885_v49 = vld [vmem:[#allocation2 + $0x64] sm:$0xff]  ;;  %v4396_v39 = vld [vmem:[%s7961_s3 + $0x50] sm:$0xff]  ;;  %v7408_v20 = vpop.permute.xlu0 %3650 }
 0x3d8   : > { %3463 = vmatmul.f32.gmra.mxu1 %v7089_v40  ;;  %v3338_v48 = vpop.f32.mrf.mxu0  ;;  %4470 = vperm.xlu1 %5268, %v4396_v39  }
 0x3d9   : > { %8117 = vst [vmem:[#allocation42_spill] sm:$0xff] %v7393_v16 }
 0x3da   : > { %v2682_v32 = vpop.f32.mrf.mxu2  ;;  %v3225_v12 = vpop.f32.mrf.mxu3 }
 0x3db   : > { %v2730_v55 = vadd.f32 %v2682_v32, %v2521_v15  ;;  %v7398_v52 = vadd.f32 %v3338_v48, %v3225_v12  ;;  %4281 = vmatmul.f32.gmra.mxu0 %v4200_v51  ;;  %v7413_v12 = vpop.permute.xlu2 %3660  ;;  %v4817_v48 = vld [vmem:[#allocation7 + $0x8c8] sm:$0xff]  ;;  %v8122_v15 = vld [vmem:[#allocation57_spill] sm:$0xff] }
 0x3dc   : > { %4830 = vmatpush.msrb.mxu1 %v4817_v48 }
 0x3dd   : > { %8119 = vst [vmem:[#allocation41_spill] sm:$0xff] %v7398_v52  ;;  %v2954_v40 = vmul.f32 %v7266_v31, %v2730_v55  ;;  %v7406_v38 = vpop.f32.mrf.mxu1  ;;  %v2524_v31 = vadd.f32 %v7330_v17, %v8122_v15  ;;  %v8124_v17 = vld [vmem:[#allocation60_spill] sm:$0xff]  ;;  %v8126_v15 = vld [vmem:[#allocation59_spill] sm:$0xff] }
 0x3df   : > { %v7411_v32 = vadd.f32 %v2954_v40, %v8120_v42  ;;  %4009 = vmatmul.f32.gmra.mxu2 %v3926_v36  ;;  %4122 = vmatmul.f32.gmra.mxu3 %v3885_v49  ;;  %v3927_v40 = vld [vmem:[#allocation2 + $0x12c] sm:$0xff]  ;;  %v4394_v49 = vld [vmem:[%s7961_s3 + $0x40] sm:$0xff] }
 0x3e0   : > { %3466 = vmatmul.f32.gmra.mxu1 %v7105_v30  ;;  %v3341_v51 = vpop.f32.mrf.mxu0  ;;  %v3886_v36 = vld [vmem:[#allocation2 + $0x6c] sm:$0xff]  ;;  %4460 = vperm.xlu2 %5266, %v4394_v49  }
 0x3e1   : > { %8121 = vst [vmem:[#allocation44_spill] sm:$0xff] %v7411_v32  ;;  %v7426_v32 = vpop.permute.xlu1 %3655 }
 0x3e2   : > { %v2685_v55 = vpop.f32.mrf.mxu2  ;;  %v3228_v52 = vpop.f32.mrf.mxu3 }
 0x3e3   : > { %v2731_v16 = vadd.f32 %v2685_v55, %v2524_v31  ;;  %v7418_v39 = vadd.f32 %v3341_v51, %v3228_v52  ;;  %4284 = vmatmul.f32.gmra.mxu0 %v4201_v63  ;;  %v7431_v52 = vpop.permute.xlu0 %3665  ;;  %v4202_v63 = vld [vmem:[#allocation2 + $0x1ec] sm:$0xff]  ;;  %v2527_v31 = vadd.f32 %v7350_v10, %v8126_v15  ;;  %v8129_v10 = vld [vmem:[#allocation62_spill] sm:$0xff] }
 0x3e5   : > { %8123 = vst [vmem:[#allocation43_spill] sm:$0xff] %v7418_v39  ;;  %v2955_v30 = vmul.f32 %v7261_v29, %v2731_v16  ;;  %v7424_v42 = vpop.f32.mrf.mxu1  ;;  %v7436_v29 = vpop.permute.xlu2 %3675 }
 0x3e6   : > { %8127 = vst [vmem:[#allocation45_spill] sm:$0xff] %v7436_v29 }
 0x3e7   : > { %v7429_v48 = vadd.f32 %v2955_v30, %v8124_v17  ;;  %4012 = vmatmul.f32.gmra.mxu2 %v3927_v40  ;;  %4125 = vmatmul.f32.gmra.mxu3 %v3886_v36  ;;  %v3928_v30 = vld [vmem:[#allocation2 + $0x134] sm:$0xff]  ;;  %v4398_v36 = vld [vmem:[%s7961_s3 + $0x60] sm:$0xff] }
 0x3e8   : > { %3469 = vmatmul.f32.gmra.mxu1 %v7121_v35  ;;  %v3344_v51 = vpop.f32.mrf.mxu0  ;;  %v3887_v40 = vld [vmem:[#allocation2 + $0x74] sm:$0xff]  ;;  %4480 = vperm.xlu0 %5267, %v4398_v36  }
 0x3e9   : > { %8125 = vst [vmem:[#allocation46_spill] sm:$0xff] %v7429_v48 }
 0x3ea   : > { %v2688_v16 = vpop.f32.mrf.mxu2  ;;  %v3231_v55 = vpop.f32.mrf.mxu3 }
 0x3eb   : > { %v2732_v39 = vadd.f32 %v2688_v16, %v2527_v31  ;;  %v7438_v49 = vadd.f32 %v3344_v51, %v3231_v55  ;;  %4287 = vmatmul.f32.gmra.mxu0 %v4202_v63  ;;  %v7449_v31 = vpop.permute.xlu1 %3670  ;;  %v4816_v51 = vld [vmem:[#allocation7 + $0x8c0] sm:$0xff]  ;;  %v4203_v16 = vld [vmem:[#allocation2 + $0x1f4] sm:$0xff]  ;;  %v7454_v48 = vpop.permute.xlu0 %3680 }
 0x3ec   : > { %v8131_v55 = vld [vmem:[#allocation61_spill] sm:$0xff]  ;;  %8132 = vst [vmem:[#allocation47_spill] sm:$0xff] %v7454_v48  ;;  %4831 = vmatpush.msrb.mxu1 %v4816_v51  ;;  %v8135_v48 = vld [vmem:[#allocation64_spill] sm:$0xff] }
 0x3ed   : > { %8128 = vst [vmem:[#allocation48_spill] sm:$0xff] %v7438_v49  ;;  %v2956_v35 = vmul.f32 %v7247_v59, %v2732_v39  ;;  %v7444_v17 = vpop.f32.mrf.mxu1  ;;  %v2530_v49 = vadd.f32 %v7370_v9, %v8131_v55  ;;  %v8134_v55 = vld [vmem:[#allocation18_spill] sm:$0xff] }
 0x3ef   : > { %v7447_v15 = vadd.f32 %v2956_v35, %v8129_v10  ;;  %4015 = vmatmul.f32.gmra.mxu2 %v3928_v30  ;;  %4128 = vmatmul.f32.gmra.mxu3 %v3887_v40  ;;  %v7458_v30 = vpop.permute.xlu2 %3690  ;;  %v3929_v40 = vld [vmem:[#allocation2 + $0x13c] sm:$0xff] }
 0x3f0   : > { %3472 = vmatmul.f32.gmra.mxu1 %v7137_v3  ;;  %v3347_v63 = vpop.f32.mrf.mxu0  ;;  %v3888_v10 = vld [vmem:[#allocation2 + $0x7c] sm:$0xff]  ;;  %v4399_v3 = vld [vmem:[%s7961_s3 + $0x68] sm:$0xff] }
 0x3f1   : > { %8130 = vst [vmem:[#allocation72_spill] sm:$0xff] %v7447_v15  ;;  %4485 = vperm.xlu1 %5268, %v4399_v3   ;;  %v8138_v3 = vld [vmem:[#allocation20_spill] sm:$0xff] }
 0x3f2   : > { %v2691_v59 = vpop.f32.mrf.mxu2  ;;  %v3234_v39 = vpop.f32.mrf.mxu3 }
 0x3f3   : > { %v2733_v36 = vadd.f32 %v2691_v59, %v2530_v49  ;;  %v7456_v35 = vadd.f32 %v3347_v63, %v3234_v39  ;;  %4290 = vmatmul.f32.gmra.mxu0 %v4203_v16  ;;  %v4204_v16 = vld [vmem:[#allocation2 + $0x1fc] sm:$0xff]  ;;  %v8137_v59 = vld [vmem:[#allocation63_spill] sm:$0xff] }
 0x3f4   : > { %v2533_v39 = vadd.f32 %v7388_v5, %v8137_v59  ;;  %v3889_v5 = vld [vmem:[#allocation2 + $0x84] sm:$0xff] }
 0x3f5   : > { %8133 = vst [vmem:[#allocation50_spill] sm:$0xff] %v7456_v35  ;;  %v2957_v15 = vmul.f32 %v7288_v57, %v2733_v36  ;;  %v3428_v9 = vpop.f32.mrf.mxu1  ;;  %v7472_v35 = vpop.permute.xlu1 %3685  ;;  %v8140_v59 = vld [vmem:[#allocation19_spill] sm:$0xff] }
 0x3f6   : > { %v3524_v51 = vadd.f32 %v3428_v9, %v8134_v55 }
 0x3f7   : > { %v7466_v29 = vadd.f32 %v2957_v15, %v8135_v48  ;;  %4018 = vmatmul.f32.gmra.mxu2 %v3929_v40  ;;  %4131 = vmatmul.f32.gmra.mxu3 %v3888_v10  ;;  %v7479_v40 = vpop.permute.xlu0 %3695  ;;  %v3930_v10 = vld [vmem:[#allocation2 + $0x144] sm:$0xff] }
 0x3f8   : > { %v3748_v49 = vmul.f32 %v7296_v13, %v3524_v51  ;;  %3475 = vmatmul.f32.gmra.mxu1 %v7153_v54  ;;  %v3350_v63 = vpop.f32.mrf.mxu0  ;;  %v4815_v13 = vld [vmem:[#allocation7 + $0x8b8] sm:$0xff] }
 0x3f9   : > { %8136 = vst [vmem:[#allocation75_spill] sm:$0xff] %v7466_v29  ;;  %v4397_v54 = vld [vmem:[%s7961_s3 + $0x58] sm:$0xff]  ;;  %4832 = vmatpush.msrb.mxu1 %v4815_v13 }
 0x3fa   : > { %v2694_v57 = vpop.f32.mrf.mxu2  ;;  %v3237_v36 = vpop.f32.mrf.mxu3  ;;  %v7475_v9 = vadd.f32 %v3748_v49, %v8138_v3  ;;  %4475 = vperm.xlu2 %5266, %v4397_v54   ;;  %v4205_v3 = vld [vmem:[#allocation2 + $0x204] sm:$0xff]  ;;  %v8143_v13 = vld [vmem:[#allocation65_spill] sm:$0xff] }
 0x3fb   : > { %v2734_v48 = vadd.f32 %v2694_v57, %v2533_v39  ;;  %v7477_v15 = vadd.f32 %v3350_v63, %v3237_v36  ;;  %4293 = vmatmul.f32.gmra.mxu0 %v4204_v16  ;;  %v7485_v49 = vpop.permute.xlu2 %3705  ;;  %v8141_v39 = vld [vmem:[#allocation66_spill] sm:$0xff]  ;;  %v2536_v54 = vadd.f32 %v7406_v38, %v8143_v13 }
 0x3fd   : > { %8139 = vst [vmem:[#allocation49_spill] sm:$0xff] %v7477_v15  ;;  %v2958_v55 = vmul.f32 %v7284_v18, %v2734_v48  ;;  %v3431_v51 = vpop.f32.mrf.mxu1  ;;  %v8144_v15 = vld [vmem:[#allocation69_spill] sm:$0xff] }
 0x3fe   : > { %v3525_v63 = vadd.f32 %v3431_v51, %v8140_v59 }
 0x3ff   : > { %v7489_v16 = vadd.f32 %v2958_v55, %v8141_v39  ;;  %4021 = vmatmul.f32.gmra.mxu2 %v3930_v10  ;;  %4134 = vmatmul.f32.gmra.mxu3 %v3889_v5  ;;  %v7500_v10 = vpop.permute.xlu1 %3700  ;;  %v3890_v5 = vld [vmem:[#allocation2 + $0x8c] sm:$0xff] }
 0x400   : > { %v3749_v57 = vmul.f32 %v7337_v11, %v3525_v63  ;;  %3478 = vmatmul.f32.gmra.mxu1 %v7170_v19  ;;  %v3353_v36 = vpop.f32.mrf.mxu0  ;;  %v4401_v19 = vld [vmem:[%s7961_s3 + $0x78] sm:$0xff]  ;;  %v3931_v11 = vld [vmem:[#allocation2 + $0x14c] sm:$0xff]  ;;  %v7506_v63 = vpop.permute.xlu0 %3710 }
 0x401   : > { %8142 = vst [vmem:[#allocation52_spill] sm:$0xff] %v7489_v16  ;;  %4495 = vperm.xlu0 %5267, %v4401_v19  }
 0x402   : > { %v2697_v18 = vpop.f32.mrf.mxu2  ;;  %v3240_v48 = vpop.f32.mrf.mxu3  ;;  %v7496_v29 = vadd.f32 %v3749_v57, %v8144_v15  ;;  %v8146_v15 = vld [vmem:[#allocation21_spill] sm:$0xff]  ;;  %v8147_v57 = vld [vmem:[#allocation67_spill] sm:$0xff] }
 0x403   : > { %v2735_v51 = vadd.f32 %v2697_v18, %v2536_v54  ;;  %v7498_v59 = vadd.f32 %v3353_v36, %v3240_v48  ;;  %4296 = vmatmul.f32.gmra.mxu0 %v4205_v3  ;;  %v7512_v3 = vpop.permute.xlu2 %3720  ;;  %v4206_v18 = vld [vmem:[#allocation2 + $0x20c] sm:$0xff] }
 0x404   : > { %v8149_v48 = vld [vmem:[#allocation15_spill] sm:$0xff] }
 0x405   : > { %8145 = vst [vmem:[#allocation51_spill] sm:$0xff] %v7498_v59  ;;  %v2959_v38 = vmul.f32 %v7270_v27, %v2735_v51  ;;  %v3434_v55 = vpop.f32.mrf.mxu1  ;;  %v2539_v27 = vadd.f32 %v7424_v42, %v8149_v48  ;;  %v8150_v59 = vld [vmem:[#allocation23_spill] sm:$0xff] }
 0x406   : > { %v3526_v39 = vadd.f32 %v3434_v55, %v8146_v15 }
 0x407   : > { %v7510_v36 = vadd.f32 %v2959_v38, %v8147_v57  ;;  %4024 = vmatmul.f32.gmra.mxu2 %v3931_v11  ;;  %4137 = vmatmul.f32.gmra.mxu3 %v3890_v5  ;;  %v4814_v11 = vld [vmem:[#allocation7 + $0x8b0] sm:$0xff]  ;;  %v8152_v5 = vld [vmem:[#allocation14_spill] sm:$0xff] }
 0x408   : > { %v3750_v13 = vmul.f32 %v7332_v50, %v3526_v39  ;;  %3481 = vmatmul.f32.gmra.mxu1 %v7189_v43  ;;  %v3356_v54 = vpop.f32.mrf.mxu0  ;;  %v4402_v50 = vld [vmem:[%s7961_s3 + $0x80] sm:$0xff]  ;;  %v5300_v43 = vld [vmem:[#allocation2 + $0xf0] sm:$0xff] }
 0x409   : > { %8148 = vst [vmem:[#allocation54_spill] sm:$0xff] %v7510_v36  ;;  %v4741_v39 = vadd.f32 %v5300_v43, %v8152_v5  ;;  %v3932_v57 = vld [vmem:[#allocation2 + $0x154] sm:$0xff]  ;;  %4833 = vmatpush.msrb.mxu1 %v4814_v11  ;;  %4500 = vperm.xlu1 %5268, %v4402_v50  }
 0x40a   : > { %v2700_v51 = vpop.f32.mrf.mxu2  ;;  %v3243_v19 = vpop.f32.mrf.mxu3  ;;  %v7519_v55 = vadd.f32 %v3750_v13, %v8150_v59  ;;  %v3891_v36 = vld [vmem:[#allocation2 + $0x94] sm:$0xff] }
 0x40b   : > { %v2736_v38 = vadd.f32 %v2700_v51, %v2539_v27  ;;  %v7521_v15 = vadd.f32 %v3356_v54, %v3243_v19  ;;  %4299 = vmatmul.f32.gmra.mxu0 %v4206_v18  ;;  %v7528_v13 = vpop.permute.xlu1 %3715  ;;  %v8153_v54 = vld [vmem:[#allocation22_spill] sm:$0xff]  ;;  %v8154_v18 = vld [vmem:[#allocation68_spill] sm:$0xff]  ;;  %v7534_v51 = vpop.permute.xlu0 %3725 }
 0x40c   : > { %8156 = vst [vmem:[#allocation55_spill] sm:$0xff] %v7534_v51  ;;  %v5301_v19 = vld [vmem:[#allocation2 + $0xf8] sm:$0xff]  ;;  %v4209_v51 = vld [vmem:[#allocation2 + $0x224] sm:$0xff] }
 0x40d   : > { %8151 = vst [vmem:[#allocation53_spill] sm:$0xff] %v7521_v15  ;;  %v2960_v42 = vmul.f32 %v7311_v4, %v2736_v38  ;;  %v3437_v59 = vpop.f32.mrf.mxu1  ;;  %v4742_v43 = vadd.f32 %v5301_v19, %v4741_v39  ;;  %v4207_v4 = vld [vmem:[#allocation2 + $0x214] sm:$0xff]  ;;  %v7540_v15 = vpop.permute.xlu2 %3735  ;;  %v3892_v19 = vld [vmem:[#allocation2 + $0x9c] sm:$0xff] }
 0x40e   : > { %v3527_v48 = vadd.f32 %v3437_v59, %v8153_v54  ;;  %v8157_v38 = vld [vmem:[#allocation16_spill] sm:$0xff]  ;;  %8158 = vst [vmem:[#allocation58_spill] sm:$0xff] %v7540_v15  ;;  %v8159_v54 = vld [vmem:[#allocation73_spill] sm:$0xff] }
 0x40f   : > { %v7532_v27 = vadd.f32 %v2960_v42, %v8154_v18  ;;  %4027 = vmatmul.f32.gmra.mxu2 %v3932_v57  ;;  %4140 = vmatmul.f32.gmra.mxu3 %v3891_v36  ;;  %v2542_v50 = vadd.f32 %v7444_v17, %v8157_v38  ;;  %v5302_v17 = vld [vmem:[#allocation2 + $0x100] sm:$0xff]  ;;  %v8166_v15 = vld [vmem:[#allocation76_spill] sm:$0xff] }
 0x410   : > { %v3751_v5 = vmul.f32 %v7316_v26, %v3527_v48  ;;  %3484 = vmatmul.f32.gmra.mxu1 %v7210_v25  ;;  %v3359_v11 = vpop.f32.mrf.mxu0  ;;  %v4400_v25 = vld [vmem:[%s7961_s3 + $0x70] sm:$0xff]  ;;  %v4405_v26 = vld [vmem:[%s7961_s3 + $0x98] sm:$0xff]  ;;  %v4743_v39 = vadd.f32 %v5302_v17, %v4742_v43 }
 0x411   : > { %8155 = vst [vmem:[#allocation56_spill] sm:$0xff] %v7532_v27  ;;  %v3933_v48 = vld [vmem:[#allocation2 + $0x15c] sm:$0xff]  ;;  %4490 = vperm.xlu2 %5266, %v4400_v25   ;;  %4515 = vperm.xlu1 %5268, %v4405_v26  }
 0x412   : > { %v2703_v59 = vpop.f32.mrf.mxu2  ;;  %v3246_v42 = vpop.f32.mrf.mxu3  ;;  %v7543_v57 = vadd.f32 %v3751_v5, %v8159_v54  ;;  %v4208_v26 = vld [vmem:[#allocation2 + $0x21c] sm:$0xff] }
 0x413   : > { %v2737_v36 = vadd.f32 %v2703_v59, %v2542_v50  ;;  %v7545_v18 = vadd.f32 %v3359_v11, %v3246_v42  ;;  %4302 = vmatmul.f32.gmra.mxu0 %v4207_v4  ;;  %v3382_v11 = vld [vmem:[#allocation2 + $0x1d6] sm:$0xff]  ;;  %v8161_v50 = vld [vmem:[#allocation74_spill] sm:$0xff]  ;;  %v7558_v54 = vpop.permute.xlu1 %3730  ;;  %v7561_v17 = vpop.permute.xlu0 %3740 }
 0x414   : > { %v8162_v59 = vld [vmem:[#allocation17_spill] sm:$0xff]  ;;  %8164 = vst [vmem:[#allocation59_spill] sm:$0xff] %v7558_v54 }
 0x415   : > { %8160 = vst [vmem:[#allocation57_spill] sm:$0xff] %v7545_v18  ;;  %v2961_v5 = vmul.f32 %v7306_v44, %v2737_v36  ;;  %v3440_v38 = vpop.f32.mrf.mxu1  ;;  %v5303_v18 = vld [vmem:[#allocation2 + $0x108] sm:$0xff] }
 0x416   : > { %v3528_v4 = vadd.f32 %v3440_v38, %v8161_v50  ;;  %v4744_v27 = vadd.f32 %v5303_v18, %v4743_v39  ;;  %8165 = vst [vmem:[#allocation62_spill] sm:$0xff] %v7561_v17  ;;  %v4421_v18 = vpop.permute.xlu2 %4420  ;;  %v3934_v39 = vld [vmem:[#allocation2 + $0x164] sm:$0xff]  ;;  %v5304_v50 = vld [vmem:[#allocation2 + $0x110] sm:$0xff] }
 0x417   : > { %v7556_v42 = vadd.f32 %v2961_v5, %v8162_v59  ;;  %4030 = vmatmul.f32.gmra.mxu2 %v3933_v48  ;;  %4143 = vmatmul.f32.gmra.mxu3 %v3892_v19  ;;  %v4813_v48 = vld [vmem:[#allocation7 + $0x8a8] sm:$0xff]  ;;  %v4408_v19 = vld [vmem:[%s7961_s3 + $0xb0] sm:$0xff] }
 0x418   : > { %v3752_v43 = vmul.f32 %v7355_v46, %v3528_v4  ;;  %3487 = vmatmul.f32.gmra.mxu1 %v3382_v11  ;;  %v4258_v25 = vpop.f32.mrf.mxu0  ;;  %v4404_v46 = vld [vmem:[%s7961_s3 + $0x90] sm:$0xff]  ;;  %v3893_v11 = vld [vmem:[#allocation2 + $0xa4] sm:$0xff]  ;;  %v4745_v4 = vadd.f32 %v5304_v50, %v4744_v27 }
 0x419   : > { %8163 = vst [vmem:[#allocation60_spill] sm:$0xff] %v7556_v42  ;;  %4834 = vmatpush.msrb.mxu1 %v4813_v48  ;;  %4530 = vperm.xlu1 %5268, %v4408_v19   ;;  %v4716_v48 = vld [vmem:[#allocation2 + $0x120] sm:$0xff] }
 0x41a   : > { %v3983_v44 = vpop.f32.mrf.mxu2  ;;  %v4096_v36 = vpop.f32.mrf.mxu3  ;;  %v7564_v38 = vadd.f32 %v3752_v43, %v8166_v15  ;;  %v3383_v43 = vld [vmem:[#allocation2 + $0x1de] sm:$0xff]  ;;  %4510 = vperm.xlu0 %5267, %v4404_v46  }
 0x41b   : > { %v4097_v5 = vadd.f32 %v4096_v36, %v3983_v44  ;;  %4305 = vmatmul.f32.gmra.mxu0 %v4208_v26  ;;  %v4715_v26 = vld [vmem:[#allocation2 + $0x118] sm:$0xff]  ;;  %v7577_v27 = vpop.permute.xlu1 %3745 }
 0x41c   : > { %v8167_v44 = vld [vmem:[#allocation24_spill] sm:$0xff]  ;;  %v4746_v42 = vadd.f32 %v4745_v4, %v4715_v26 }
 0x41d   : > { %v3443_v15 = vpop.f32.mrf.mxu1  ;;  %v4354_v59 = vadd.f32 %v4258_v25, %v4097_v5  ;;  %v4717_v25 = vld [vmem:[#allocation2 + $0x128] sm:$0xff] }
 0x41e   : > { %v3529_v36 = vadd.f32 %v3443_v15, %v8167_v44  ;;  %v4747_v5 = vadd.f32 %v4746_v42, %v4716_v48  ;;  %v3935_v15 = vld [vmem:[#allocation2 + $0x16c] sm:$0xff] }
 0x41f   : > { %v4578_v17 = vmul.f32 %v4421_v18, %v4354_v59  ;;  %4033 = vmatmul.f32.gmra.mxu2 %v3934_v39  ;;  %4146 = vmatmul.f32.gmra.mxu3 %v3893_v11  ;;  %v4426_v11 = vpop.permute.xlu0 %4425  ;;  %v3894_v42 = vld [vmem:[#allocation2 + $0xac] sm:$0xff] }
 0x420   : > { %v3753_v16 = vmul.f32 %v7342_v34, %v3529_v36  ;;  %3490 = vmatmul.f32.gmra.mxu1 %v3383_v43  ;;  %v4261_v54 = vpop.f32.mrf.mxu0  ;;  %v4411_v34 = vld [vmem:[%s7961_s3 + $0xc8] sm:$0xff]  ;;  %v4748_v39 = vadd.f32 %v4747_v5, %v4717_v25 }
 0x421   : > { %v7575_v19 = vadd.f32 %v4578_v17, %v7475_v9  ;;  %v4407_v9 = vld [vmem:[%s7961_s3 + $0xa8] sm:$0xff]  ;;  %v4718_v17 = vld [vmem:[#allocation2 + $0x130] sm:$0xff]  ;;  %4545 = vperm.xlu1 %5268, %v4411_v34  }
 0x422   : > { %v3986_v46 = vpop.f32.mrf.mxu2  ;;  %v4099_v50 = vpop.f32.mrf.mxu3  ;;  %v7580_v4 = vadd.f32 %v3753_v16, %v7064_v22  ;;  %v3384_v22 = vld [vmem:[#allocation2 + $0x1e6] sm:$0xff]  ;;  %4525 = vperm.xlu0 %5267, %v4407_v9   ;;  %v4719_v16 = vld [vmem:[#allocation2 + $0x138] sm:$0xff] }
 0x423   : > { %v4100_v18 = vadd.f32 %v4099_v50, %v3986_v46  ;;  %4308 = vmatmul.f32.gmra.mxu0 %v4209_v51  ;;  %v4749_v51 = vadd.f32 %v4748_v39, %v4718_v17  ;;  %v4210_v5 = vld [vmem:[#allocation2 + $0x22c] sm:$0xff]  ;;  %v4720_v46 = vld [vmem:[#allocation2 + $0x140] sm:$0xff]  ;;  %v3936_v17 = vld [vmem:[#allocation2 + $0x174] sm:$0xff] }
 0x425   : > { %v3446_v59 = vpop.f32.mrf.mxu1  ;;  %v4355_v43 = vadd.f32 %v4261_v54, %v4100_v18  ;;  %v4750_v36 = vadd.f32 %v4749_v51, %v4719_v16  ;;  %v4721_v54 = vld [vmem:[#allocation2 + $0x148] sm:$0xff] }
 0x426   : > { %v3530_v26 = vadd.f32 %v3446_v59, %v7069_v21  ;;  %v3895_v59 = vld [vmem:[#allocation2 + $0xb4] sm:$0xff] }
 0x427   : > { %v4579_v44 = vmul.f32 %v4426_v11, %v4355_v43  ;;  %4036 = vmatmul.f32.gmra.mxu2 %v3935_v15  ;;  %4149 = vmatmul.f32.gmra.mxu3 %v3894_v42  ;;  %v4751_v18 = vadd.f32 %v4750_v36, %v4720_v46  ;;  %v4812_v11 = vld [vmem:[#allocation7 + $0x8a0] sm:$0xff]  ;;  %v4431_v42 = vpop.permute.xlu1 %4430  ;;  %v4722_v43 = vld [vmem:[#allocation2 + $0x150] sm:$0xff] }
 0x428   : > { %v3754_v48 = vmul.f32 %v7360_v14, %v3530_v26  ;;  %3493 = vmatmul.f32.gmra.mxu1 %v3384_v22  ;;  %v4264_v25 = vpop.f32.mrf.mxu0  ;;  %v4403_v14 = vld [vmem:[%s7961_s3 + $0x88] sm:$0xff]  ;;  %v4723_v26 = vld [vmem:[#allocation2 + $0x158] sm:$0xff] }
 0x429   : > { %v7591_v50 = vadd.f32 %v4579_v44, %v7496_v29  ;;  %v4414_v29 = vld [vmem:[%s7961_s3 + $0xe0] sm:$0xff]  ;;  %v4752_v15 = vadd.f32 %v4751_v18, %v4721_v54  ;;  %4835 = vmatpush.msrb.mxu1 %v4812_v11  ;;  %4505 = vperm.xlu2 %5266, %v4403_v14   ;;  %v3385_v51 = vld [vmem:[#allocation2 + $0x1ee] sm:$0xff] }
 0x42a   : > { %v3989_v34 = vpop.f32.mrf.mxu2  ;;  %v4102_v9 = vpop.f32.mrf.mxu3  ;;  %v7594_v21 = vadd.f32 %v3754_v48, %v7080_v28  ;;  %v4410_v28 = vld [vmem:[%s7961_s3 + $0xc0] sm:$0xff]  ;;  %4560 = vperm.xlu1 %5268, %v4414_v29   ;;  %v4211_v18 = vld [vmem:[#allocation2 + $0x234] sm:$0xff] }
 0x42b   : > { %v4103_v39 = vadd.f32 %v4102_v9, %v3989_v34  ;;  %4311 = vmatmul.f32.gmra.mxu0 %v4210_v5  ;;  %4540 = vperm.xlu0 %5267, %v4410_v28   ;;  %v4753_v44 = vadd.f32 %v4752_v15, %v4722_v43  ;;  %v4724_v34 = vld [vmem:[#allocation2 + $0x160] sm:$0xff] }
 0x42c   : > { %v3896_v28 = vld [vmem:[#allocation2 + $0xbc] sm:$0xff] }
 0x42d   : > { %v3449_v22 = vpop.f32.mrf.mxu1  ;;  %v4356_v16 = vadd.f32 %v4264_v25, %v4103_v39  ;;  %v4754_v5 = vadd.f32 %v4753_v44, %v4723_v26  ;;  %v4725_v25 = vld [vmem:[#allocation2 + $0x168] sm:$0xff] }
 0x42e   : > { %v3531_v36 = vadd.f32 %v3449_v22, %v7085_v41 }
 0x42f   : > { %v4580_v48 = vmul.f32 %v4431_v42, %v4356_v16  ;;  %4039 = vmatmul.f32.gmra.mxu2 %v3936_v17  ;;  %4152 = vmatmul.f32.gmra.mxu3 %v3895_v59  ;;  %v4755_v39 = vadd.f32 %v4754_v5, %v4724_v34  ;;  %v4417_v17 = vld [vmem:[%s7961_s3 + $0xf8] sm:$0xff]  ;;  %v4436_v42 = vpop.permute.xlu2 %4435  ;;  %v4728_v34 = vld [vmem:[#allocation2 + $0x180] sm:$0xff] }
 0x430   : > { %v3755_v46 = vmul.f32 %v7378_v6, %v3531_v36  ;;  %3496 = vmatmul.f32.gmra.mxu1 %v3385_v51  ;;  %v4267_v54 = vpop.f32.mrf.mxu0  ;;  %v4406_v6 = vld [vmem:[%s7961_s3 + $0xa0] sm:$0xff]  ;;  %v3386_v16 = vld [vmem:[#allocation2 + $0x1f6] sm:$0xff] }
 0x431   : > { %v7608_v9 = vadd.f32 %v4580_v48, %v7519_v55  ;;  %v4413_v55 = vld [vmem:[%s7961_s3 + $0xd8] sm:$0xff]  ;;  %v4756_v15 = vadd.f32 %v4755_v39, %v4725_v25  ;;  %4520 = vperm.xlu2 %5266, %v4406_v6  }
 0x432   : > { %v3992_v11 = vpop.f32.mrf.mxu2  ;;  %v4105_v14 = vpop.f32.mrf.mxu3  ;;  %v7611_v29 = vadd.f32 %v3755_v46, %v7096_v24  ;;  %v3937_v59 = vld [vmem:[#allocation2 + $0x17c] sm:$0xff]  ;;  %v4726_v24 = vld [vmem:[#allocation2 + $0x170] sm:$0xff]  ;;  %4575 = vperm.xlu1 %5268, %v4417_v17  }
 0x433   : > { %v4106_v41 = vadd.f32 %v4105_v14, %v3992_v11  ;;  %4314 = vmatmul.f32.gmra.mxu0 %v4211_v18  ;;  %4555 = vperm.xlu0 %5267, %v4413_v55   ;;  %v4727_v51 = vld [vmem:[#allocation2 + $0x178] sm:$0xff]  ;;  %v4757_v26 = vadd.f32 %v4756_v15, %v4726_v24  ;;  %v4416_v17 = vld [vmem:[%s7961_s3 + $0xf0] sm:$0xff]  ;;  %v3938_v55 = vld [vmem:[#allocation2 + $0x184] sm:$0xff] }
 0x434   : > { %v4212_v18 = vld [vmem:[#allocation2 + $0x23c] sm:$0xff]  ;;  %v3897_v15 = vld [vmem:[#allocation2 + $0xc4] sm:$0xff]  ;;  %v4730_v24 = vld [vmem:[#allocation2 + $0x190] sm:$0xff] }
 0x435   : > { %v3452_v43 = vpop.f32.mrf.mxu1  ;;  %v4357_v22 = vadd.f32 %v4267_v54, %v4106_v41  ;;  %v4758_v48 = vadd.f32 %v4757_v26, %v4727_v51  ;;  %v4729_v54 = vld [vmem:[#allocation2 + $0x188] sm:$0xff]  ;;  %v4811_v6 = vld [vmem:[#allocation7 + $0x898] sm:$0xff] }
 0x436   : > { %v3532_v44 = vadd.f32 %v3452_v43, %v7101_v8  ;;  %4836 = vmatpush.msrb.mxu1 %v4811_v6  ;;  %v4213_v26 = vld [vmem:[#allocation2 + $0x244] sm:$0xff] }
 0x437   : > { %v4581_v36 = vmul.f32 %v4436_v42, %v4357_v22  ;;  %4042 = vmatmul.f32.gmra.mxu2 %v3937_v59  ;;  %4155 = vmatmul.f32.gmra.mxu3 %v3896_v28  ;;  %v4759_v39 = vadd.f32 %v4758_v48, %v4728_v34  ;;  %v3387_v28 = vld [vmem:[#allocation2 + $0x1fe] sm:$0xff] }
 0x438   : > { %v3756_v5 = vmul.f32 %v7364_v56, %v3532_v44  ;;  %3499 = vmatmul.f32.gmra.mxu1 %v3386_v16  ;;  %v4270_v46 = vpop.f32.mrf.mxu0  ;;  %v4409_v56 = vld [vmem:[%s7961_s3 + $0xb8] sm:$0xff]  ;;  %v4732_v6 = vld [vmem:[#allocation2 + $0x1a0] sm:$0xff] }
 0x439   : > { %v7625_v25 = vadd.f32 %v4581_v36, %v7543_v57  ;;  %v4441_v57 = vpop.permute.xlu1 %4440  ;;  %4535 = vperm.xlu2 %5266, %v4409_v56   ;;  %v4760_v42 = vadd.f32 %v4759_v39, %v4729_v54  ;;  %v4731_v48 = vld [vmem:[#allocation2 + $0x198] sm:$0xff]  ;;  %v3939_v54 = vld [vmem:[#allocation2 + $0x18c] sm:$0xff] }
 0x43a   : > { %v3995_v11 = vpop.f32.mrf.mxu2  ;;  %v4108_v14 = vpop.f32.mrf.mxu3  ;;  %v7628_v41 = vadd.f32 %v3756_v5, %v7112_v47  ;;  %v3898_v39 = vld [vmem:[#allocation2 + $0xcc] sm:$0xff] }
 0x43b   : > { %v4109_v8 = vadd.f32 %v4108_v14, %v3995_v11  ;;  %4317 = vmatmul.f32.gmra.mxu0 %v4212_v18  ;;  %4570 = vperm.xlu0 %5267, %v4416_v17   ;;  %v4761_v44 = vadd.f32 %v4760_v42, %v4730_v24 }
 0x43d   : > { %v3455_v59 = vpop.f32.mrf.mxu1  ;;  %v4358_v47 = vadd.f32 %v4270_v46, %v4109_v8  ;;  %v4762_v11 = vadd.f32 %v4761_v44, %v4731_v48  ;;  %v3388_v8 = vld [vmem:[#allocation2 + $0x206] sm:$0xff]  ;;  %v3389_v48 = vld [vmem:[#allocation2 + $0x20e] sm:$0xff] }
 0x43e   : > { %v3533_v43 = vadd.f32 %v3455_v59, %v7117_v62  ;;  %v4412_v62 = vld [vmem:[%s7961_s3 + $0xd0] sm:$0xff]  ;;  %v4733_v59 = vld [vmem:[#allocation2 + $0x1a8] sm:$0xff] }
 0x43f   : > { %v4582_v22 = vmul.f32 %v4441_v57, %v4358_v47  ;;  %4045 = vmatmul.f32.gmra.mxu2 %v3938_v55  ;;  %4158 = vmatmul.f32.gmra.mxu3 %v3897_v15  ;;  %v4214_v55 = vld [vmem:[#allocation2 + $0x24c] sm:$0xff]  ;;  %v4763_v15 = vadd.f32 %v4762_v11, %v4732_v6  ;;  %v4735_v11 = vld [vmem:[#allocation2 + $0x1b8] sm:$0xff] }
 0x440   : > { %v3757_v16 = vmul.f32 %v7382_v23, %v3533_v43  ;;  %3502 = vmatmul.f32.gmra.mxu1 %v3387_v28  ;;  %v4273_v51 = vpop.f32.mrf.mxu0  ;;  %v4446_v23 = vpop.permute.xlu2 %4445 }
 0x441   : > { %v7639_v36 = vadd.f32 %v4582_v22, %v7564_v38  ;;  %4550 = vperm.xlu2 %5266, %v4412_v62   ;;  %v4451_v22 = vpop.permute.xlu0 %4450 }
 0x442   : > { %v3998_v5 = vpop.f32.mrf.mxu2  ;;  %v4111_v46 = vpop.f32.mrf.mxu3  ;;  %v7642_v18 = vadd.f32 %v3757_v16, %v7128_v2  ;;  %v3940_v16 = vld [vmem:[#allocation2 + $0x194] sm:$0xff] }
 0x443   : > { %v4112_v34 = vadd.f32 %v4111_v46, %v3998_v5  ;;  %4320 = vmatmul.f32.gmra.mxu0 %v4213_v26  ;;  %v4734_v5 = vld [vmem:[#allocation2 + $0x1b0] sm:$0xff] }
 0x445   : > { %v3458_v14 = vpop.f32.mrf.mxu1  ;;  %v4359_v38 = vadd.f32 %v4273_v51, %v4112_v34  ;;  %v3899_v51 = vld [vmem:[#allocation2 + $0xd4] sm:$0xff] }
 0x446   : > { %v3534_v56 = vadd.f32 %v3458_v14, %v7133_v45  ;;  %v4810_v45 = vld [vmem:[#allocation7 + $0x890] sm:$0xff] }
 0x447   : > { %v4583_v17 = vmul.f32 %v4446_v23, %v4359_v38  ;;  %4048 = vmatmul.f32.gmra.mxu2 %v3939_v54  ;;  %4161 = vmatmul.f32.gmra.mxu3 %v3898_v39  ;;  %v4215_v23 = vld [vmem:[#allocation2 + $0x254] sm:$0xff] }
 0x448   : > { %v3758_v2 = vmul.f32 %v7400_v1, %v3534_v56  ;;  %3505 = vmatmul.f32.gmra.mxu1 %v3388_v8  ;;  %v4276_v57 = vpop.f32.mrf.mxu0  ;;  %v4415_v1 = vld [vmem:[%s7961_s3 + $0xe8] sm:$0xff]  ;;  %v3941_v56 = vld [vmem:[#allocation2 + $0x19c] sm:$0xff] }
 0x449   : > { %v7650_v42 = vadd.f32 %v4583_v17, %v7580_v4  ;;  %4837 = vmatpush.msrb.mxu1 %v4810_v45  ;;  %4565 = vperm.xlu2 %5266, %v4415_v1   ;;  %v4764_v4 = vadd.f32 %v4763_v15, %v4733_v59  ;;  %v4809_v17 = vld [vmem:[#allocation7 + $0x888] sm:$0xff]  ;;  %v4736_v15 = vld [vmem:[#allocation2 + $0x1c0] sm:$0xff] }
 0x44a   : > { %v4001_v47 = vpop.f32.mrf.mxu2  ;;  %v4114_v28 = vpop.f32.mrf.mxu3  ;;  %v7653_v24 = vadd.f32 %v3758_v2, %v7144_v53  ;;  %v4808_v59 = vld [vmem:[#allocation7 + $0x880] sm:$0xff] }
 0x44b   : > { %v4115_v43 = vadd.f32 %v4114_v28, %v4001_v47  ;;  %4323 = vmatmul.f32.gmra.mxu0 %v4214_v55  ;;  %v4765_v54 = vadd.f32 %v4764_v4, %v4734_v5  ;;  %v3390_v55 = vld [vmem:[#allocation2 + $0x216] sm:$0xff]  ;;  %4838 = vmatpush.msrb.mxu1 %v4809_v17  ;;  %v3943_v17 = vld [vmem:[#allocation2 + $0x1ac] sm:$0xff] }
 0x44c   : > { %v5305_v28 = vld [vmem:[#allocation2 + $0xdc] sm:$0xff] }
 0x44d   : > { %v3461_v26 = vpop.f32.mrf.mxu1  ;;  %v4360_v44 = vadd.f32 %v4276_v57, %v4115_v43  ;;  %v4766_v2 = vadd.f32 %v4765_v54, %v4735_v11  ;;  %v4216_v45 = vld [vmem:[#allocation2 + $0x25c] sm:$0xff]  ;;  %4839 = vmatpush.msrb.mxu1 %v4808_v59  ;;  %v5307_v59 = vld [vmem:[#allocation2 + $0xec] sm:$0xff] }
 0x44e   : > { %v3535_v53 = vadd.f32 %v3461_v26, %v7149_v33  ;;  %v4456_v33 = vpop.permute.xlu1 %4455 }
 0x44f   : > { %v4584_v46 = vmul.f32 %v4451_v22, %v4360_v44  ;;  %4051 = vmatmul.f32.gmra.mxu2 %v3940_v16  ;;  %4164 = vmatmul.f32.gmra.mxu3 %v3899_v51  ;;  %v4767_v1 = vadd.f32 %v4766_v2, %v4736_v15  ;;  %v4737_v16 = vld [vmem:[#allocation2 + $0x1c8] sm:$0xff]  ;;  %v4461_v44 = vpop.permute.xlu2 %4460 }
 0x450   : > { %v3759_v34 = vmul.f32 %v7390_v58, %v3535_v53  ;;  %3508 = vmatmul.f32.gmra.mxu1 %v3389_v48  ;;  %v4279_v62 = vpop.f32.mrf.mxu0  ;;  %v3942_v48 = vld [vmem:[#allocation2 + $0x1a4] sm:$0xff] }
 0x451   : > { %v7661_v39 = vadd.f32 %v4584_v46, %v7594_v21  ;;  %v4768_v5 = vadd.f32 %v4767_v1, %v4737_v16  ;;  %v3391_v46 = vld [vmem:[#allocation2 + $0x21e] sm:$0xff] }
 0x452   : > { %v4004_v14 = vpop.f32.mrf.mxu2  ;;  %v4117_v38 = vpop.f32.mrf.mxu3  ;;  %v7664_v8 = vadd.f32 %v3759_v34, %v7160_v0  ;;  %v8169_v1 = vld [vmem:[#allocation26_spill] sm:$0xff] }
 0x453   : > { %v4118_v6 = vadd.f32 %v4117_v38, %v4004_v14  ;;  %4326 = vmatmul.f32.gmra.mxu0 %v4215_v23  ;;  %v4769_v11 = vrot.slane %v4768_v5, 4 }
 0x455   : > { %v3464_v58 = vpop.f32.mrf.mxu1  ;;  %v4361_v57 = vadd.f32 %v4279_v62, %v4118_v6  ;;  %v4770_v2 = vadd.f32 %v4769_v11, %v4768_v5 }
 0x456   : > { %v3536_v21 = vadd.f32 %v3464_v58, %v7166_v37 }
 0x457   : > { %v4585_v47 = vmul.f32 %v4456_v33, %v4361_v57  ;;  %4054 = vmatmul.f32.gmra.mxu2 %v3941_v56  ;;  %4167 = vmatmul.f32.gmra.mxu3 %v5305_v28  ;;  %v4771_v28 = vrot.slane %v4770_v2, 2 }
 0x458   : > { %v3760_v0 = vmul.f32 %v7408_v20, %v3536_v21  ;;  %3511 = vmatmul.f32.gmra.mxu1 %v3390_v55  ;;  %v4282_v43 = vpop.f32.mrf.mxu0  ;;  %v8168_v55 = vld [vmem:[#allocation25_spill] sm:$0xff] }
 0x459   : > { %v7669_v22 = vadd.f32 %v4585_v47, %v7611_v29  ;;  %v5306_v29 = vld [vmem:[#allocation2 + $0xe4] sm:$0xff] }
 0x45a   : > { %v4007_v51 = vpop.f32.mrf.mxu2  ;;  %v4120_v4 = vpop.f32.mrf.mxu3  ;;  %v7672_v37 = vadd.f32 %v3760_v0, %v7177_v61  ;;  %v4217_v61 = vld [vmem:[#allocation2 + $0x264] sm:$0xff] }
 0x45b   : > { %v4121_v26 = vadd.f32 %v4120_v4, %v4007_v51  ;;  %4329 = vmatmul.f32.gmra.mxu0 %v4216_v45  ;;  %v4471_v4 = vpop.permute.xlu1 %4470 }
 0x45d   : > { %v3467_v20 = vpop.f32.mrf.mxu1  ;;  %v4362_v53 = vadd.f32 %v4282_v43, %v4121_v26  ;;  %v3944_v26 = vld [vmem:[#allocation2 + $0x1b4] sm:$0xff] }
 0x45e   : > { %v3537_v34 = vadd.f32 %v3467_v20, %v7185_v60  ;;  %v4466_v60 = vpop.permute.xlu0 %4465  ;;  %v8170_v20 = vld [vmem:[#allocation28_spill] sm:$0xff] }
 0x45f   : > { %v4586_v62 = vmul.f32 %v4461_v44, %v4362_v53  ;;  %4057 = vmatmul.f32.gmra.mxu2 %v3942_v48  ;;  %4170 = vmatmul.f32.gmra.mxu3 %v5306_v29  ;;  %v4772_v44 = vadd.f32 %v4771_v28, %v4770_v2  ;;  %v4219_v29 = vld [vmem:[#allocation2 + $0x274] sm:$0xff]  ;;  %v8173_v28 = vld [vmem:[#allocation31_spill] sm:$0xff] }
 0x460   : > { %v3761_v23 = vmul.f32 %v7426_v32, %v3537_v34  ;;  %3514 = vmatmul.f32.gmra.mxu1 %v3391_v46  ;;  %v4285_v54 = vpop.f32.mrf.mxu0  ;;  %v3392_v32 = vld [vmem:[#allocation2 + $0x226] sm:$0xff]  ;;  %v5308_v34 = vld [vmem:[#allocation2 + $0xf4] sm:$0xff] }
 0x461   : > { %v7677_v14 = vadd.f32 %v4586_v62, %v7628_v41 }
 0x462   : > { %v4010_v38 = vpop.f32.mrf.mxu2  ;;  %v4123_v6 = vpop.f32.mrf.mxu3  ;;  %v7680_v33 = vadd.f32 %v3761_v23, %v7196_v7  ;;  %v4218_v7 = vld [vmem:[#allocation2 + $0x26c] sm:$0xff]  ;;  %v4773_v23 = vrot.slane %v4772_v44, 1 }
 0x463   : > { %v4124_v56 = vadd.f32 %v4123_v6, %v4010_v38  ;;  %4332 = vmatmul.f32.gmra.mxu0 %v4217_v61  ;;  %v8171_v38 = vld [vmem:[#allocation27_spill] sm:$0xff] }
 0x464   : > { %v4774_v2 = vadd.f32 %v4773_v23, %v4772_v44  ;;  %v8174_v44 = vld [vmem:[#allocation30_spill] sm:$0xff] }
 0x465   : > { %v3470_v58 = vpop.f32.mrf.mxu1  ;;  %v4363_v57 = vadd.f32 %v4285_v54, %v4124_v56 }
 0x466   : > { %v3538_v15 = vadd.f32 %v3470_v58, %v8168_v55 }
 0x467   : > { %v4587_v21 = vmul.f32 %v4466_v60, %v4363_v57  ;;  %4060 = vmatmul.f32.gmra.mxu2 %v3943_v17  ;;  %4173 = vmatmul.f32.gmra.mxu3 %v5307_v59  ;;  %v4476_v60 = vpop.permute.xlu2 %4475  ;;  %v3945_v17 = vld [vmem:[#allocation2 + $0x1bc] sm:$0xff] }
 0x468   : > { %v3762_v41 = vmul.f32 %v7413_v12, %v3538_v15  ;;  %3517 = vmatmul.f32.gmra.mxu1 %v3392_v32  ;;  %v4288_v47 = vpop.f32.mrf.mxu0  ;;  %v3393_v12 = vld [vmem:[#allocation2 + $0x22e] sm:$0xff]  ;;  %v5309_v15 = vld [vmem:[#allocation2 + $0xfc] sm:$0xff] }
 0x469   : > { %v7685_v0 = vadd.f32 %v4587_v21, %v7642_v18  ;;  %v4220_v59 = vld [vmem:[#allocation2 + $0x27c] sm:$0xff] }
 0x46a   : > { %v4013_v43 = vpop.f32.mrf.mxu2  ;;  %v4126_v45 = vpop.f32.mrf.mxu3  ;;  %v7688_v16 = vadd.f32 %v3762_v41, %v8169_v1 }
 0x46b   : > { %v4127_v51 = vadd.f32 %v4126_v45, %v4013_v43  ;;  %4335 = vmatmul.f32.gmra.mxu0 %v4218_v7  ;;  %v4481_v1 = vpop.permute.xlu0 %4480 }
 0x46d   : > { %v3473_v48 = vpop.f32.mrf.mxu1  ;;  %v4364_v5 = vadd.f32 %v4288_v47, %v4127_v51  ;;  %v3946_v51 = vld [vmem:[#allocation2 + $0x1c4] sm:$0xff] }
 0x46e   : > { %v3539_v53 = vadd.f32 %v3473_v48, %v8170_v20 }
 0x46f   : > { %v4588_v46 = vmul.f32 %v4471_v4, %v4364_v5  ;;  %4063 = vmatmul.f32.gmra.mxu2 %v3944_v26  ;;  %4176 = vmatmul.f32.gmra.mxu3 %v5308_v34  ;;  %v5310_v5 = vld [vmem:[#allocation2 + $0x104] sm:$0xff] }
 0x470   : > { %v3763_v18 = vmul.f32 %v7431_v52, %v3539_v53  ;;  %3520 = vmatmul.f32.gmra.mxu1 %v3393_v12  ;;  %v4291_v62 = vpop.f32.mrf.mxu0  ;;  %v8172_v52 = vld [vmem:[#allocation29_spill] sm:$0xff]  ;;  %v4221_v53 = vld [vmem:[#allocation2 + $0x284] sm:$0xff] }
 0x471   : > { %v7693_v54 = vadd.f32 %v4588_v46, %v7653_v24  ;;  %v8175_v12 = vld [vmem:[#allocation45_spill] sm:$0xff] }
 0x472   : > { %v4016_v61 = vpop.f32.mrf.mxu2  ;;  %v4129_v11 = vpop.f32.mrf.mxu3  ;;  %v7696_v6 = vadd.f32 %v3763_v18, %v8171_v38 }
 0x473   : > { %v4130_v56 = vadd.f32 %v4129_v11, %v4016_v61  ;;  %4338 = vmatmul.f32.gmra.mxu0 %v4219_v29  ;;  %v4486_v61 = vpop.permute.xlu1 %4485  ;;  %v3947_v11 = vld [vmem:[#allocation2 + $0x1cc] sm:$0xff] }
 0x475   : > { %v3476_v58 = vpop.f32.mrf.mxu1  ;;  %v4365_v57 = vadd.f32 %v4291_v62, %v4130_v56  ;;  %v8176_v62 = vld [vmem:[#allocation33_spill] sm:$0xff] }
 0x476   : > { %v3540_v32 = vadd.f32 %v3476_v58, %v8172_v52  ;;  %v5311_v58 = vld [vmem:[#allocation2 + $0x10c] sm:$0xff] }
 0x477   : > { %v4589_v55 = vmul.f32 %v4476_v60, %v4365_v57  ;;  %4066 = vmatmul.f32.gmra.mxu2 %v3945_v17  ;;  %4179 = vmatmul.f32.gmra.mxu3 %v5309_v15  ;;  %v8177_v60 = vld [vmem:[#allocation32_spill] sm:$0xff]  ;;  %v8178_v57 = vld [vmem:[#allocation47_spill] sm:$0xff] }
 0x478   : > { %v3764_v24 = vmul.f32 %v7449_v31, %v3540_v32  ;;  %4840 = vmatmul.f32.vlgmr.msrb.gmra.mxu1 %v4774_v2  ;;  %v4294_v21 = vpop.f32.mrf.mxu0  ;;  %v4222_v32 = vld [vmem:[#allocation2 + $0x28c] sm:$0xff] }
 0x479   : > { %v7701_v41 = vadd.f32 %v4589_v55, %v7664_v8 }
 0x47a   : > { %v4019_v47 = vpop.f32.mrf.mxu2  ;;  %v4132_v7 = vpop.f32.mrf.mxu3  ;;  %v7704_v43 = vadd.f32 %v3764_v24, %v8173_v28  ;;  %v3948_v28 = vld [vmem:[#allocation2 + $0x1d4] sm:$0xff] }
 0x47b   : > { %v4133_v45 = vadd.f32 %v4132_v7, %v4019_v47  ;;  %4341 = vmatmul.f32.gmra.mxu0 %v4220_v59  ;;  %v4491_v7 = vpop.permute.xlu2 %4490 }
 0x47d   : > { %v3479_v4 = vpop.f32.mrf.mxu1  ;;  %v4366_v26 = vadd.f32 %v4294_v21, %v4133_v45  ;;  %v8179_v21 = vld [vmem:[#allocation35_spill] sm:$0xff] }
 0x47e   : > { %v3541_v48 = vadd.f32 %v3479_v4, %v8174_v44  ;;  %v5312_v44 = vld [vmem:[#allocation2 + $0x114] sm:$0xff] }
 0x47f   : > { %v4590_v31 = vmul.f32 %v4481_v1, %v4366_v26  ;;  %4069 = vmatmul.f32.gmra.mxu2 %v3946_v51  ;;  %4182 = vmatmul.f32.gmra.mxu3 %v5310_v5  ;;  %v8180_v51 = vld [vmem:[#allocation34_spill] sm:$0xff] }
 0x480   : > { %v3765_v8 = vmul.f32 %v8175_v12, %v3541_v48  ;;  %v4297_v20 = vpop.f32.mrf.mxu0  ;;  %v8181_v12 = vld [vmem:[#allocation36_spill] sm:$0xff] }
 0x481   : > { %v7709_v46 = vadd.f32 %v4590_v31, %v7672_v37  ;;  %v4223_v31 = vld [vmem:[#allocation2 + $0x294] sm:$0xff] }
 0x482   : > { %v4022_v34 = vpop.f32.mrf.mxu2  ;;  %v4135_v18 = vpop.f32.mrf.mxu3  ;;  %v7712_v29 = vadd.f32 %v3765_v8, %v8176_v62 }
 0x483   : > { %v4136_v23 = vadd.f32 %v4135_v18, %v4022_v34  ;;  %4344 = vmatmul.f32.gmra.mxu0 %v4221_v53  ;;  %v4496_v18 = vpop.permute.xlu0 %4495 }
 0x485   : > { %v3482_v38 = vpop.f32.mrf.mxu1  ;;  %v4367_v56 = vadd.f32 %v4297_v20, %v4136_v23 }
 0x486   : > { %v3542_v17 = vadd.f32 %v3482_v38, %v8177_v60 }
 0x487   : > { %v4591_v2 = vmul.f32 %v4486_v61, %v4367_v56  ;;  %4072 = vmatmul.f32.gmra.mxu2 %v3947_v11  ;;  %4185 = vmatmul.f32.gmra.mxu3 %v5311_v58  ;;  %v8182_v61 = vld [vmem:[#allocation71_spill] sm:$0xff] }
 0x488   : > { %v3766_v37 = vmul.f32 %v8178_v57, %v3542_v17  ;;  %v4300_v52 = vpop.f32.mrf.mxu0 }
 0x489   : > { %v7717_v55 = vadd.f32 %v4591_v2, %v7680_v33 }
 0x48a   : > { %v4025_v15 = vpop.f32.mrf.mxu2  ;;  %v4138_v24 = vpop.f32.mrf.mxu3  ;;  %v7720_v59 = vadd.f32 %v3766_v37, %v8179_v21 }
 0x48b   : > { %v4139_v47 = vadd.f32 %v4138_v24, %v4025_v15  ;;  %4347 = vmatmul.f32.gmra.mxu0 %v4222_v32  ;;  %v4501_v37 = vpop.permute.xlu1 %4500  ;;  %v8184_v15 = vld [vmem:[#allocation37_spill] sm:$0xff] }
 0x48d   : > { %v3485_v45 = vpop.f32.mrf.mxu1  ;;  %v4368_v1 = vadd.f32 %v4300_v52, %v4139_v47 }
 0x48e   : > { %v3543_v4 = vadd.f32 %v3485_v45, %v8180_v51 }
 0x48f   : > { %v4592_v26 = vmul.f32 %v4491_v7, %v4368_v1  ;;  %4075 = vmatmul.f32.gmra.mxu2 %v3948_v28  ;;  %4188 = vmatmul.f32.gmra.mxu3 %v5312_v44  ;;  %v8185_v28 = vld [vmem:[#allocation70_spill] sm:$0xff] }
 0x490   : > { %v3767_v33 = vmul.f32 %v7472_v35, %v3543_v4  ;;  %v4303_v48 = vpop.f32.mrf.mxu0  ;;  %v4506_v4 = vpop.permute.xlu2 %4505 }
 0x491   : > { %v7725_v5 = vadd.f32 %v4592_v26, %v7688_v16  ;;  %v8183_v16 = vld [vmem:[#allocation38_spill] sm:$0xff] }
 0x492   : > { %v3831_v8 = vadd.f32 %v3767_v33, %v8181_v12  ;;  %v4028_v20 = vpop.f32.mrf.mxu2  ;;  %v4141_v53 = vpop.f32.mrf.mxu3  ;;  %v8186_v33 = vld [vmem:[#allocation40_spill] sm:$0xff] }
 0x493   : > { %v4142_v34 = vadd.f32 %v4141_v53, %v4028_v20  ;;  %4350 = vmatmul.f32.gmra.mxu0 %v4223_v31  ;;  %v8187_v53 = vld [vmem:[#allocation39_spill] sm:$0xff] }
 0x495   : > { %v3488_v62 = vpop.f32.mrf.mxu1  ;;  %v4369_v23 = vadd.f32 %v4303_v48, %v4142_v34 }
 0x496   : > { %v3544_v11 = vadd.f32 %v3488_v62, %v8182_v61 }
 0x497   : > { %v4593_v38 = vmul.f32 %v4496_v18, %v4369_v23  ;;  %v4511_v23 = vpop.permute.xlu0 %4510 }
 0x498   : > { %v3768_v56 = vmul.f32 %v7458_v30, %v3544_v11  ;;  %v4306_v35 = vpop.f32.mrf.mxu0 }
 0x499   : > { %v7731_v60 = vadd.f32 %v4593_v38, %v7696_v6  ;;  %v8188_v38 = vld [vmem:[#allocation77_spill] sm:$0xff] }
 0x49a   : > { %v3832_v17 = vadd.f32 %v3768_v56, %v8183_v16  ;;  %v4031_v2 = vpop.f32.mrf.mxu2  ;;  %v4144_v58 = vpop.f32.mrf.mxu3 }
 0x49b   : > { %v4145_v57 = vadd.f32 %v4144_v58, %v4031_v2 }
 0x49d   : > { %v3491_v52 = vpop.f32.mrf.mxu1  ;;  %v4370_v32 = vadd.f32 %v4306_v35, %v4145_v57 }
 0x49e   : > { %v3545_v24 = vadd.f32 %v3491_v52, %v8184_v15 }
 0x49f   : > { %v4594_v21 = vmul.f32 %v4501_v37, %v4370_v32 }
 0x4a0   : > { %v3769_v47 = vmul.f32 %v7479_v40, %v3545_v24  ;;  %v4309_v7 = vpop.f32.mrf.mxu0  ;;  %v4516_v24 = vpop.permute.xlu1 %4515 }
 0x4a1   : > { %v7737_v30 = vadd.f32 %v4594_v21, %v7704_v43  ;;  %v8190_v21 = vld [vmem:[#allocation41_spill] sm:$0xff] }
 0x4a2   : > { %v3833_v6 = vadd.f32 %v3769_v47, %v8185_v28  ;;  %v4034_v45 = vpop.f32.mrf.mxu2  ;;  %v4147_v1 = vpop.f32.mrf.mxu3 }
 0x4a3   : > { %v4148_v51 = vadd.f32 %v4147_v1, %v4034_v45  ;;  %v8191_v1 = vld [vmem:[#allocation44_spill] sm:$0xff] }
 0x4a5   : > { %v3494_v26 = vpop.f32.mrf.mxu1  ;;  %v4371_v44 = vadd.f32 %v4309_v7, %v4148_v51 }
 0x4a6   : > { %v3546_v48 = vadd.f32 %v3494_v26, %v8186_v33 }
 0x4a7   : > { %v4595_v31 = vmul.f32 %v4506_v4, %v4371_v44 }
 0x4a8   : > { %v3770_v12 = vmul.f32 %v7500_v10, %v3546_v48  ;;  %v4312_v20 = vpop.f32.mrf.mxu0  ;;  %v4521_v48 = vpop.permute.xlu2 %4520 }
 0x4a9   : > { %v7743_v40 = vadd.f32 %v4595_v31, %v7712_v29  ;;  %v8189_v29 = vld [vmem:[#allocation42_spill] sm:$0xff]  ;;  %v8192_v31 = vld [vmem:[#allocation43_spill] sm:$0xff] }
 0x4aa   : > { %v7746_v43 = vadd.f32 %v3770_v12, %v8187_v53  ;;  %v4037_v34 = vpop.f32.mrf.mxu2  ;;  %v4150_v18 = vpop.f32.mrf.mxu3 }
 0x4ab   : > { %v4151_v62 = vadd.f32 %v4150_v18, %v4037_v34 }
 0x4ad   : > { %v3497_v61 = vpop.f32.mrf.mxu1  ;;  %v4372_v11 = vadd.f32 %v4312_v20, %v4151_v62 }
 0x4ae   : > { %v3547_v56 = vadd.f32 %v3497_v61, %v8188_v38 }
 0x4af   : > { %v4596_v35 = vmul.f32 %v4511_v23, %v4372_v11 }
 0x4b0   : > { %v3771_v16 = vmul.f32 %v7485_v49, %v3547_v56  ;;  %v4315_v2 = vpop.f32.mrf.mxu0  ;;  %v4526_v56 = vpop.permute.xlu0 %4525 }
 0x4b1   : > { %v7751_v10 = vadd.f32 %v4596_v35, %v7720_v59  ;;  %v8194_v35 = vld [vmem:[#allocation48_spill] sm:$0xff] }
 0x4b2   : > { %v7754_v58 = vadd.f32 %v3771_v16, %v8189_v29  ;;  %v4040_v57 = vpop.f32.mrf.mxu2  ;;  %v4153_v37 = vpop.f32.mrf.mxu3 }
 0x4b3   : > { %v4154_v52 = vadd.f32 %v4153_v37, %v4040_v57 }
 0x4b5   : > { %v3500_v32 = vpop.f32.mrf.mxu1  ;;  %v4373_v15 = vadd.f32 %v4315_v2, %v4154_v52 }
 0x4b6   : > { %v3548_v47 = vadd.f32 %v3500_v32, %v8190_v21 }
 0x4b7   : > { %v4597_v7 = vmul.f32 %v4516_v24, %v4373_v15  ;;  %v8196_v24 = vld [vmem:[#allocation50_spill] sm:$0xff] }
 0x4b8   : > { %v3772_v28 = vmul.f32 %v7506_v63, %v3548_v47  ;;  %v4318_v45 = vpop.f32.mrf.mxu0  ;;  %v8193_v63 = vld [vmem:[#allocation46_spill] sm:$0xff]  ;;  %v8197_v47 = vld [vmem:[#allocation55_spill] sm:$0xff] }
 0x4b9   : > { %v7758_v49 = vadd.f32 %v4597_v7, %v3831_v8 }
 0x4ba   : > { %v7761_v59 = vadd.f32 %v3772_v28, %v8191_v1  ;;  %v4043_v51 = vpop.f32.mrf.mxu2  ;;  %v4156_v4 = vpop.f32.mrf.mxu3 }
 0x4bb   : > { %v4157_v26 = vadd.f32 %v4156_v4, %v4043_v51 }
 0x4bd   : > { %v3503_v44 = vpop.f32.mrf.mxu1  ;;  %v4374_v33 = vadd.f32 %v4318_v45, %v4157_v26  ;;  %v8198_v45 = vld [vmem:[#allocation75_spill] sm:$0xff] }
 0x4be   : > { %v3549_v12 = vadd.f32 %v3503_v44, %v8192_v31  ;;  %v8200_v44 = vld [vmem:[#allocation59_spill] sm:$0xff]  ;;  %v8201_v31 = vld [vmem:[#allocation52_spill] sm:$0xff] }
 0x4bf   : > { %v4598_v20 = vmul.f32 %v4521_v48, %v4374_v33 }
 0x4c0   : > { %v3773_v53 = vmul.f32 %v7528_v13, %v3549_v12  ;;  %v4321_v34 = vpop.f32.mrf.mxu0 }
 0x4c1   : > { %v7765_v18 = vadd.f32 %v4598_v20, %v3832_v17  ;;  %v8195_v17 = vld [vmem:[#allocation72_spill] sm:$0xff] }
 0x4c2   : > { %v7768_v8 = vadd.f32 %v3773_v53, %v8193_v63  ;;  %v4046_v62 = vpop.f32.mrf.mxu2  ;;  %v4159_v23 = vpop.f32.mrf.mxu3  ;;  %v8202_v63 = vld [vmem:[#allocation51_spill] sm:$0xff] }
 0x4c3   : > { %v4160_v61 = vadd.f32 %v4159_v23, %v4046_v62  ;;  %v8203_v23 = vld [vmem:[#allocation58_spill] sm:$0xff] }
 0x4c5   : > { %v3506_v11 = vpop.f32.mrf.mxu1  ;;  %v4375_v38 = vadd.f32 %v4321_v34, %v4160_v61 }
 0x4c6   : > { %v3550_v16 = vadd.f32 %v3506_v11, %v8194_v35 }
 0x4c7   : > { %v4599_v2 = vmul.f32 %v4526_v56, %v4375_v38  ;;  %v8204_v38 = vld [vmem:[#allocation54_spill] sm:$0xff] }
 0x4c8   : > { %v3774_v29 = vmul.f32 %v7512_v3, %v3550_v16  ;;  %v7772_v57 = vpop.f32.mrf.mxu0 }
 0x4c9   : > { %v7774_v13 = vadd.f32 %v4599_v2, %v3833_v6  ;;  %v8199_v6 = vld [vmem:[#allocation49_spill] sm:$0xff] }
 0x4ca   : > { %v7777_v37 = vadd.f32 %v3774_v29, %v8195_v17  ;;  %v4049_v52 = vpop.f32.mrf.mxu2  ;;  %v4162_v32 = vpop.f32.mrf.mxu3  ;;  %v8205_v29 = vld [vmem:[#allocation53_spill] sm:$0xff] }
 0x4cd   : > { %v3509_v15 = vpop.f32.mrf.mxu1 }
 0x4ce   : > { %v3551_v21 = vadd.f32 %v3509_v15, %v8196_v24  ;;  %v8206_v15 = vld [vmem:[#allocation62_spill] sm:$0xff] }
 0x4d0   : > { %v3775_v7 = vmul.f32 %v8197_v47, %v3551_v21  ;;  %v7781_v28 = vpop.f32.mrf.mxu0  ;;  %v8207_v47 = vld [vmem:[#allocation56_spill] sm:$0xff] }
 0x4d2   : > { %v7784_v1 = vadd.f32 %v3775_v7, %v8198_v45  ;;  %v4052_v3 = vpop.f32.mrf.mxu2  ;;  %v4165_v51 = vpop.f32.mrf.mxu3 }
 0x4d5   : > { %v3512_v4 = vpop.f32.mrf.mxu1 }
 0x4d6   : > { %v3552_v26 = vadd.f32 %v3512_v4, %v8199_v6 }
 0x4d8   : > { %v3776_v33 = vmul.f32 %v8200_v44, %v3552_v26  ;;  %v7788_v48 = vpop.f32.mrf.mxu0  ;;  %v8208_v26 = vld [vmem:[#allocation57_spill] sm:$0xff] }
 0x4da   : > { %v7791_v12 = vadd.f32 %v3776_v33, %v8201_v31  ;;  %v4055_v20 = vpop.f32.mrf.mxu2  ;;  %v4168_v53 = vpop.f32.mrf.mxu3 }
 0x4dd   : > { %v3515_v34 = vpop.f32.mrf.mxu1 }
 0x4de   : > { %v3553_v62 = vadd.f32 %v3515_v34, %v8202_v63  ;;  %v8209_v34 = vld [vmem:[#allocation60_spill] sm:$0xff] }
 0x4e0   : > { %v3777_v61 = vmul.f32 %v8203_v23, %v3553_v62  ;;  %v7795_v11 = vpop.f32.mrf.mxu0 }
 0x4e2   : > { %v7798_v56 = vadd.f32 %v3777_v61, %v8204_v38  ;;  %v4058_v35 = vpop.f32.mrf.mxu2  ;;  %v4171_v16 = vpop.f32.mrf.mxu3 }
 0x4e3   : > { %v4531_v61 = vpop.permute.xlu1 %4530  ;;  %v4536_v38 = vpop.permute.xlu2 %4535 }
 0x4e5   : > { %v3518_v2 = vpop.f32.mrf.mxu1 }
 0x4e6   : > { %v3554_v17 = vadd.f32 %v3518_v2, %v8205_v29 }
 0x4e8   : > { %v3778_v24 = vmul.f32 %v8206_v15, %v3554_v17  ;;  %v7802_v21 = vpop.f32.mrf.mxu0 }
 0x4ea   : > { %v7805_v7 = vadd.f32 %v3778_v24, %v8207_v47  ;;  %v4061_v45 = vpop.f32.mrf.mxu2  ;;  %v4174_v4 = vpop.f32.mrf.mxu3 }
 0x4eb   : > { %v4541_v47 = vpop.permute.xlu0 %4540 }
 0x4ed   : > { %v3521_v6 = vpop.f32.mrf.mxu1 }
 0x4ee   : > { %v3555_v44 = vadd.f32 %v3521_v6, %v8208_v26 }
 0x4f0   : > { %v3779_v33 = vmul.f32 %v7577_v27, %v3555_v44  ;;  %v4339_v31 = vpop.f32.mrf.mxu0 }
 0x4f2   : > { %v7810_v63 = vadd.f32 %v3779_v33, %v8209_v34  ;;  %v4064_v62 = vpop.f32.mrf.mxu2  ;;  %v4177_v23 = vpop.f32.mrf.mxu3 }
 0x4f3   : > { %v4546_v34 = vpop.permute.xlu1 %4545 }
 0x4f5   : > { %v4841_v2 = vpop.f32.mrf.mxu1 }
 0x4f6   : > { %v7812_v29 = vperm.slane %v4841_v2, 0  ;;  %v4551_v2 = vpop.permute.xlu2 %4550 }
 0x4f8   : > { %v4845_v17 = vadd.f32 %v7812_v29, %v7575_v19  ;;  %v4846_v15 = vadd.f32 %v7812_v29, %v7591_v50  ;;  %v4847_v27 = vadd.f32 %v7812_v29, %v7608_v9  ;;  %v4342_v24 = vpop.f32.mrf.mxu0  ;;  %v4848_v6 = vadd.f32 %v7812_v29, %v7625_v25 }
 0x4f9   : > { %v4849_v26 = vadd.f32 %v7812_v29, %v7639_v36  ;;  %v4850_v50 = vadd.f32 %v7812_v29, %v7650_v42  ;;  %v4851_v9 = vadd.f32 %v7812_v29, %v7661_v39  ;;  %v4852_v25 = vadd.f32 %v7812_v29, %v7669_v22 }
 0x4fa   : > { %v4067_v44 = vpop.f32.mrf.mxu2  ;;  %4944 = vst [vmem:[%s7826_s12] sm:$0xff] %v4845_v17  ;;  %v4180_v19 = vpop.f32.mrf.mxu3  ;;  %v4163_v36 = vadd.f32 %v4162_v32, %v4049_v52  ;;  %v4853_v33 = vadd.f32 %v7812_v29, %v7677_v14  ;;  %v4166_v42 = vadd.f32 %v4165_v51, %v4052_v3  ;;  %v4854_v17 = vadd.f32 %v7812_v29, %v7685_v0 }
 0x4fb   : > { %4945 = vst [vmem:[%s7826_s12 + $0x8] sm:$0xff] %v4846_v15  ;;  %v4169_v39 = vadd.f32 %v4168_v53, %v4055_v20  ;;  %v4855_v15 = vadd.f32 %v7812_v29, %v7693_v54  ;;  %v4172_v52 = vadd.f32 %v4171_v16, %v4058_v35  ;;  %v4178_v32 = vadd.f32 %v4177_v23, %v4064_v62  ;;  %v4556_v62 = vpop.permute.xlu0 %4555 }
 0x4fc   : > { %4946 = vst [vmem:[%s7826_s12 + $0x10] sm:$0xff] %v4847_v27  ;;  %v4856_v14 = vadd.f32 %v7812_v29, %v7701_v41  ;;  %v4376_v3 = vadd.f32 %v7772_v57, %v4163_v36  ;;  %v4175_v51 = vadd.f32 %v4174_v4, %v4061_v45  ;;  %v4857_v0 = vadd.f32 %v7812_v29, %v7709_v46 }
 0x4fd   : > { %4947 = vst [vmem:[%s7826_s12 + $0x18] sm:$0xff] %v4848_v6  ;;  %v4181_v20 = vadd.f32 %v4180_v19, %v4067_v44  ;;  %v4377_v35 = vadd.f32 %v7781_v28, %v4166_v42  ;;  %v4858_v16 = vadd.f32 %v7812_v29, %v7717_v55  ;;  %v4378_v57 = vadd.f32 %v7788_v48, %v4169_v39 }
 0x4fe   : > { %4948 = vst [vmem:[%s7826_s12 + $0x20] sm:$0xff] %v4849_v26  ;;  %v4859_v46 = vadd.f32 %v7812_v29, %v7725_v5  ;;  %v4379_v45 = vadd.f32 %v7795_v11, %v4172_v52  ;;  %v4381_v4 = vadd.f32 %v4339_v31, %v4178_v32  ;;  %v4860_v28 = vadd.f32 %v7812_v29, %v7731_v60  ;;  %v4566_v26 = vpop.permute.xlu2 %4565 }
 0x4ff   : > { %4949 = vst [vmem:[%s7826_s12 + $0x28] sm:$0xff] %v4850_v50  ;;  %v4600_v23 = vmul.f32 %v4531_v61, %v4376_v3  ;;  %v4380_v55 = vadd.f32 %v7802_v21, %v4175_v51  ;;  %v4861_v27 = vadd.f32 %v7812_v29, %v7737_v30  ;;  %v4382_v48 = vadd.f32 %v4342_v24, %v4181_v20  ;;  %v4561_v21 = vpop.permute.xlu1 %4560 }
 0x500   : > { %4950 = vst [vmem:[%s7826_s12 + $0x30] sm:$0xff] %v4851_v9  ;;  %v4345_v22 = vpop.f32.mrf.mxu0  ;;  %v4601_v6 = vmul.f32 %v4536_v38, %v4377_v35  ;;  %v4862_v5 = vadd.f32 %v7812_v29, %v7743_v40  ;;  %v4602_v31 = vmul.f32 %v4541_v47, %v4378_v57  ;;  %v4863_v60 = vadd.f32 %v7812_v29, %v7751_v10 }
 0x501   : > { %4951 = vst [vmem:[%s7826_s12 + $0x38] sm:$0xff] %v4852_v25  ;;  %v4603_v30 = vmul.f32 %v4546_v34, %v4379_v45  ;;  %v4605_v44 = vmul.f32 %v4556_v62, %v4381_v4  ;;  %v4864_v38 = vadd.f32 %v7812_v29, %v7758_v49  ;;  %v4664_v40 = vadd.f32 %v4600_v23, %v7746_v43 }
 0x502   : > { %4952 = vst [vmem:[%s7826_s12 + $0x40] sm:$0xff] %v4853_v33  ;;  %v4070_v54 = vpop.f32.mrf.mxu2  ;;  %v4183_v53 = vpop.f32.mrf.mxu3  ;;  %v4604_v24 = vmul.f32 %v4551_v2, %v4380_v55  ;;  %v4865_v47 = vadd.f32 %v7812_v29, %v7765_v18  ;;  %v4606_v10 = vmul.f32 %v4561_v21, %v4382_v48  ;;  %v4665_v9 = vadd.f32 %v4601_v6, %v7754_v58 }
 0x503   : > { %4953 = vst [vmem:[%s7826_s12 + $0x48] sm:$0xff] %v4854_v17  ;;  %v4184_v41 = vadd.f32 %v4183_v53, %v4070_v54  ;;  %v4866_v25 = vadd.f32 %v7812_v29, %v7774_v13  ;;  %v4666_v43 = vadd.f32 %v4602_v31, %v7761_v59  ;;  %v4867_v33 = vadd.f32 %v7812_v29, %v4664_v40  ;;  %v4571_v13 = vpop.permute.xlu0 %4570 }
 0x504   : > { %4954 = vst [vmem:[%s7826_s12 + $0x50] sm:$0xff] %v4855_v15  ;;  %v4667_v18 = vadd.f32 %v4603_v30, %v7768_v8  ;;  %v4669_v34 = vadd.f32 %v4605_v44, %v7784_v1  ;;  %v4868_v58 = vadd.f32 %v7812_v29, %v4665_v9  ;;  %v4668_v42 = vadd.f32 %v4604_v24, %v7777_v37 }
 0x505   : > { %4955 = vst [vmem:[%s7826_s12 + $0x58] sm:$0xff] %v4856_v14  ;;  %v4383_v11 = vadd.f32 %v4345_v22, %v4184_v41  ;;  %v4869_v59 = vadd.f32 %v7812_v29, %v4666_v43  ;;  %v4670_v17 = vadd.f32 %v4606_v10, %v7791_v12 }
 0x506   : > { %4956 = vst [vmem:[%s7826_s12 + $0x60] sm:$0xff] %v4857_v0  ;;  %v4870_v8 = vadd.f32 %v7812_v29, %v4667_v18  ;;  %v4871_v15 = vadd.f32 %v7812_v29, %v4668_v42  ;;  %v4872_v22 = vadd.f32 %v7812_v29, %v4669_v34 }
 0x507   : > { %4957 = vst [vmem:[%s7826_s12 + $0x68] sm:$0xff] %v4858_v16  ;;  %v4607_v49 = vmul.f32 %v4566_v26, %v4383_v11  ;;  %v4873_v12 = vadd.f32 %v7812_v29, %v4670_v17  ;;  %v4576_v0 = vpop.permute.xlu1 %4575 }
 0x508   : > { %4958 = vst [vmem:[%s7826_s12 + $0x70] sm:$0xff] %v4859_v46  ;;  %v4348_v61 = vpop.f32.mrf.mxu0 }
 0x509   : > { %4959 = vst [vmem:[%s7826_s12 + $0x78] sm:$0xff] %v4860_v28  ;;  %v4671_v1 = vadd.f32 %v4607_v49, %v7798_v56 }
 0x50a   : > { %4960 = vst [vmem:[%s7826_s12 + $0x80] sm:$0xff] %v4861_v27  ;;  %v4073_v19 = vpop.f32.mrf.mxu2  ;;  %v4186_v50 = vpop.f32.mrf.mxu3 }
 0x50b   : > { %4961 = vst [vmem:[%s7826_s12 + $0x88] sm:$0xff] %v4862_v5  ;;  %v4187_v36 = vadd.f32 %v4186_v50, %v4073_v19  ;;  %v4874_v14 = vadd.f32 %v7812_v29, %v4671_v1 }
 0x50c   : > { %4962 = vst [vmem:[%s7826_s12 + $0x90] sm:$0xff] %v4863_v60 }
 0x50d   : > { %4963 = vst [vmem:[%s7826_s12 + $0x98] sm:$0xff] %v4864_v38  ;;  %v4384_v2 = vadd.f32 %v4348_v61, %v4187_v36 }
 0x50e   : > { %4964 = vst [vmem:[%s7826_s12 + $0xa0] sm:$0xff] %v4865_v47 }
 0x50f   : > { %4965 = vst [vmem:[%s7826_s12 + $0xa8] sm:$0xff] %v4866_v25  ;;  %v4608_v39 = vmul.f32 %v4571_v13, %v4384_v2 }
 0x510   : > { %4966 = vst [vmem:[%s7826_s12 + $0xb0] sm:$0xff] %v4867_v33  ;;  %v4351_v52 = vpop.f32.mrf.mxu0 }
 0x511   : > { %4967 = vst [vmem:[%s7826_s12 + $0xb8] sm:$0xff] %v4868_v58  ;;  %v4672_v37 = vadd.f32 %v4608_v39, %v7805_v7 }
 0x512   : > { %4968 = vst [vmem:[%s7826_s12 + $0xc0] sm:$0xff] %v4869_v59  ;;  %v4076_v56 = vpop.f32.mrf.mxu2  ;;  %v4189_v32 = vpop.f32.mrf.mxu3 }
 0x513   : > { %4969 = vst [vmem:[%s7826_s12 + $0xc8] sm:$0xff] %v4870_v8  ;;  %v4190_v3 = vadd.f32 %v4189_v32, %v4076_v56  ;;  %v4875_v51 = vadd.f32 %v7812_v29, %v4672_v37 }
 0x514   : > { %4970 = vst [vmem:[%s7826_s12 + $0xd0] sm:$0xff] %v4871_v15 }
 0x515   : > { %4971 = vst [vmem:[%s7826_s12 + $0xd8] sm:$0xff] %v4872_v22  ;;  %v4385_v7 = vadd.f32 %v4351_v52, %v4190_v3 }
 0x516   : > { %4972 = vst [vmem:[%s7826_s12 + $0xe0] sm:$0xff] %v4873_v12 }
 0x517   : > { %4973 = vst [vmem:[%s7826_s12 + $0xe8] sm:$0xff] %v4874_v14  ;;  %v4609_v20 = vmul.f32 %v4576_v0, %v4385_v7 }
 0x518   : > { %4974 = vst [vmem:[%s7826_s12 + $0xf0] sm:$0xff] %v4875_v51 }
 0x519   : > { %v4673_v54 = vadd.f32 %v4609_v20, %v7810_v63 }
 0x51b   : > { %v4876_v53 = vadd.f32 %v7812_v29, %v4673_v54 }
 0x51d   : > { %4975 = vst [vmem:[%s7826_s12 + $0xf8] sm:$0xff] %v4876_v53 }
 0x51e   : > { %5430 = shalt.err (!%p5427_p0)
}
 0x51f   : > { %s5500_s14 = smov 128   ;;  %s5501_s8 = smov 8  }
 0x520   : > { %5175 = dma.vmem_to_hbm [thread:$0]  (%p5602_p2), %s4990_s1, 4096, %s4992_s23, %s4977_s24, %s5500_s14, %s5500_s14, %s5501_s8  }
 0x521 PF: > { %s5006_s11 = sand.u32 1, %s5469_s15   ;;  %p5189_p4 = pnand %p5101_p10, %p5572_p5 }
 0x522   : > { %s5007_s12 = scalar_lea.sflag [#allocation6], %s5006_s11 }
 0x523   : > { %p5190_p6 = pneg %p5189_p4 }
 0x525   : > { %5464 = dma.done.wait (%p5190_p6), %s5007_s12, 4096  }
 0x526   : > { %5466 = vsyncadd (%p5190_p6), %s5007_s12, 4294963200  ;;  %s21_s20 = sadd.s32 1, %s5489_s20   ;;  %s8210_s15 = smov %s5473_s16 }
 0x527   : > { %p18_p8 = scmp.ge.s32.totalorder %s21_s20, 4   ;;  %s8211_s16 = smov %s5477_s17 }
 0x528   : > { %s8212_s17 = smov %s5612_s30  ;;  %s8213_s18 = smov %s5485_s19 }
 0x529   : > { %s8214_s19 = smov %s8216_s13  ;;  %20 = sbr.rel (!%p18_p8) target bundleno = 9 (0x9), region = 115 }
 0x52e   :  { %5013 = vsyncpa [#allocation5], 1 }
 0x52f   :  { %5015 = vsyncpa [#allocation5 + $0x1], 1 }
 0x530   :  { %5016 = vsyncpa [#allocation8], 1 }
 0x531   :  { %5017 = vsyncpa [#allocation6], 1 }
 0x532   :  { %5019 = vsyncpa [#allocation6 + $0x1], 1 }

</bundles_post_ra>
